<compile_context>
chip_gen: v6e
topology: v6e:2x2x1
jax: 0.10.0
libtpu: 0.0.40
codegen_flags: <defaults>
</compile_context>

<pallas_src>
import functools
import numpy as np
import jax
import jax.numpy as jnp
from jax import lax
from jax.experimental import pallas as pl
from jax.experimental.pallas import tpu as pltpu

LANE = 128
SUBLANE = 8


def _ru(n, m):
    return ((n + m - 1) // m) * m


# ----------------------------------------------------------------------------
# Fused Pallas kernel: 3 stacked LSTM layers + sigmoid-linear + tied decode head
# ----------------------------------------------------------------------------
def _fused_rnn_kernel(x_ref, h0_ref, c0_ref, wih0_ref, wihr_ref, whh_ref, b_ref,
                      wlp_ref, blp_ref, wld_ref, bld_ref,
                      ept_ref, bdp_ref, edt_ref, bdd_ref,
                      dec_p_ref, dec_d_ref, h_out_ref, c_out_ref,
                      *, T, Bp, L, H):
    bf16 = jnp.bfloat16
    seq = None                                   # previous layer's output sequence (value)
    for l in range(L):
        if l == 0:
            src = x_ref[...]                     # (T*Bp, lstm_in)  bf16
            wih = wih0_ref[...]                  # (lstm_in, 4H)    bf16
        else:
            src = seq                            # (T*Bp, H)        bf16
            wih = wihr_ref[l - 1]                # (H, 4H)          bf16

        # Time-parallel part of the gates: one MXU matmul per layer, kept in vregs.
        gih = jnp.dot(src, wih, preferred_element_type=jnp.float32) + b_ref[l]  # (T*Bp, 4H) f32

        whh = whh_ref[l]                         # (H, 4H) bf16, hoisted out of the t loop
        h = h0_ref[l]                            # (Bp, H) f32
        c = c0_ref[l]                            # (Bp, H) f32

        outs = []
        # T is tiny & static -> fully unrolled. TODO(synk): fori_loop(unroll=True) if T grows.
        for t in range(T):
            g = gih[t * Bp:(t + 1) * Bp, :] + jnp.dot(
                h.astype(bf16), whh, preferred_element_type=jnp.float32)   # (Bp, 4H) f32
            # Gates packed contiguously: 32-lane static slices (PyTorch order i,f,g,o).
            i_g = jax.nn.sigmoid(g[:, 0 * H:1 * H])
            f_g = jax.nn.sigmoid(g[:, 1 * H:2 * H])
            g_g = jnp.tanh(g[:, 2 * H:3 * H])
            o_g = jax.nn.sigmoid(g[:, 3 * H:4 * H])
            c = f_g * c + i_g * g_g
            h = o_g * jnp.tanh(c)
            outs.append(h.astype(bf16))

        h_out_ref[l] = h                         # written once per layer (last step only)
        c_out_ref[l] = c
        seq = jnp.concatenate(outs, axis=0)      # (T*Bp, H) bf16, stays in vregs

    # Fused output head (decode weights tied to embeddings, pre-transposed/padded):
    #   dec_p = sigmoid(out @ Wlp + blp) @ E_pitch.T + bdp
    #   dec_d = sigmoid(out @ Wld + bld) @ E_dur.T   + bdd
    out = seq                                    # (T*Bp, H) bf16
    op = jax.nn.sigmoid(jnp.dot(out, wlp_ref[...],
                                preferred_element_type=jnp.float32) + blp_ref[...])
    od = jax.nn.sigmoid(jnp.dot(out, wld_ref[...],
                                preferred_element_type=jnp.float32) + bld_ref[...])
    dec_p_ref[...] = jnp.dot(op.astype(bf16), ept_ref[...],
                             preferred_element_type=jnp.float32) + bdp_ref[...]
    dec_d_ref[...] = jnp.dot(od.astype(bf16), edt_ref[...],
                             preferred_element_type=jnp.float32) + bdd_ref[...]


def _full_spec(shape):
    n = len(shape)
    return pl.BlockSpec(shape, lambda i, _n=n: (0,) * _n)


def fused_forward_call(x, h0, c0, pp, *, T, Bp):
    L, _, H = h0.shape
    N = T * Bp
    VpP = pp['ept'].shape[1]
    VdP = pp['edt'].shape[1]

    kernel = functools.partial(_fused_rnn_kernel, T=T, Bp=Bp, L=L, H=H)

    in_arrays = (x, h0, c0, pp['w_ih0'], pp['w_ih_rest'], pp['w_hh'], pp['b'],
                 pp['wlp'], pp['blp'], pp['wld'], pp['bld'],
                 pp['ept'], pp['bdp'], pp['edt'], pp['bdd'])
    in_specs = [_full_spec(a.shape) for a in in_arrays]

    out_shape = (
        jax.ShapeDtypeStruct((N, VpP), jnp.float32),   # decoded pitch (lane-padded cols)
        jax.ShapeDtypeStruct((N, VdP), jnp.float32),   # decoded duration (lane-padded cols)
        jax.ShapeDtypeStruct((L, Bp, H), jnp.float32),  # h_T (batch-padded)
        jax.ShapeDtypeStruct((L, Bp, H), jnp.float32),  # c_T (batch-padded)
    )
    out_specs = tuple(_full_spec(s.shape) for s in out_shape)

    return pl.pallas_call(
        kernel,
        out_shape=out_shape,
        grid=(1,),
        in_specs=in_specs,
        out_specs=out_specs,
        compiler_params=pltpu.CompilerParams(
            dimension_semantics=("arbitrary",)),
    )(*in_arrays)


# ----------------------------------------------------------------------------
# One-time parameter preparation: pre-transpose tied decode tables, cast MXU
# operands to bf16, pad only the output-head vocab columns to 128 lanes.
# ----------------------------------------------------------------------------
def prepare_pallas_params(params):
    H = params['hidden_size']
    L = params['num_layers']
    Vp, Ep = params['E_pitch'].shape
    Vd, Ed = params['E_dur'].shape
    bf16 = jnp.bfloat16

    # LSTM weights: keep the packed 4*H gate columns (no per-gate lane padding) so the
    # recurrent matmul output is a single 128-lane block when H == 32.
    w_ih0 = params['w_ih_t'][0].astype(bf16)                                   # (lstm_in, 4H)
    w_ih_rest = jnp.stack([params['w_ih_t'][l] for l in range(1, L)]).astype(bf16)  # (L-1, H, 4H)
    w_hh = jnp.stack(params['w_hh_t']).astype(bf16)                            # (L, H, 4H)
    b = jnp.stack(params['b_lstm'])                                            # (L, 1, 4H) f32

    VpP, VdP = _ru(Vp, LANE), _ru(Vd, LANE)

    def padcols(a, n):
        return jnp.pad(a, ((0, 0), (0, n - a.shape[1])))

    pp = dict(
        w_ih0=w_ih0, w_ih_rest=w_ih_rest, w_hh=w_hh, b=b,
        wlp=params['Wlp_t'].astype(bf16), blp=params['blp'],
        wld=params['Wld_t'].astype(bf16), bld=params['bld'],
        ept=padcols(params['E_pitch'].T, VpP).astype(bf16), bdp=padcols(params['bdp'], VpP),
        edt=padcols(params['E_dur'].T, VdP).astype(bf16), bdd=padcols(params['bdd'], VdP),
        H=H, Vp=Vp, Vd=Vd,
    )
    return pp


# ----------------------------------------------------------------------------
# Model wrapper (embedding gather/concat + batch padding glue in plain JAX)
# ----------------------------------------------------------------------------
def forward_pallas(params, pp, inputs, hidden):
    """inputs: (T, B, 3) int32; hidden: (h, c) each (num_layers, B, H)."""
    T, B, _ = inputs.shape
    pitch, duration, offset = inputs[..., 0], inputs[..., 1], inputs[..., 2]
    embedded = jnp.concatenate([params['E_pitch'][pitch],
                                params['E_dur'][duration],
                                params['E_off'][offset]], axis=-1)   # (T, B, 3*E) f32
    # TODO(synk): embedding gather + concat could move in-kernel via scalar-prefetched
    # row-gather BlockSpecs; kept in XLA since it is a tiny one-shot gather.

    Bp = _ru(B, SUBLANE)                       # sublane-aligned batch (padded rows are zero)
    emb_p = jnp.pad(embedded, ((0, 0), (0, Bp - B), (0, 0)))
    x = emb_p.reshape(T * Bp, emb_p.shape[-1]).astype(jnp.bfloat16)

    h_in, c_in = hidden
    h0 = jnp.pad(h_in, ((0, 0), (0, Bp - B), (0, 0)))
    c0 = jnp.pad(c_in, ((0, 0), (0, Bp - B), (0, 0)))

    dec_p_pad, dec_d_pad, h_out, c_out = fused_forward_call(x, h0, c0, pp, T=T, Bp=Bp)

    Vp, Vd = pp['Vp'], pp['Vd']
    dec_p = dec_p_pad.reshape(T, Bp, -1)[:, :B, :Vp].reshape(T * B, Vp)
    dec_d = dec_d_pad.reshape(T, Bp, -1)[:, :B, :Vd].reshape(T * B, Vd)
    return dec_p, dec_d, (h_out[:, :B, :], c_out[:, :B, :])


# ----------------------------------------------------------------------------
# Pure-JAX reference (mirrors PyTorch semantics, f32) for correctness check
# ----------------------------------------------------------------------------
def forward_reference(params, inputs, hidden):
    T, B, _ = inputs.shape
    pitch, duration, offset = inputs[..., 0], inputs[..., 1], inputs[..., 2]
    embedded = jnp.concatenate([params['E_pitch'][pitch],
                                params['E_dur'][duration],
                                params['E_off'][offset]], axis=-1)
    h_in, c_in = hidden
    raw = embedded
    new_h, new_c = [], []
    H = params['hidden_size']
    for l in range(params['num_layers']):
        wih, whh, b = params['w_ih_t'][l], params['w_hh_t'][l], params['b_lstm'][l]

        def step(carry, x_t):
            h, c = carry
            g = x_t @ wih + h @ whh + b[0]
            i = jax.nn.sigmoid(g[:, 0 * H:1 * H])
            f = jax.nn.sigmoid(g[:, 1 * H:2 * H])
            gg = jnp.tanh(g[:, 2 * H:3 * H])
            o = jax.nn.sigmoid(g[:, 3 * H:4 * H])
            c2 = f * c + i * gg
            h2 = o * jnp.tanh(c2)
            return (h2, c2), h2

        (hT, cT), ys = lax.scan(step, (h_in[l], c_in[l]), raw)
        raw = ys
        new_h.append(hT)
        new_c.append(cT)

    out = raw.reshape(T * B, H)
    op = jax.nn.sigmoid(out @ params['Wlp_t'] + params['blp'][0])
    od = jax.nn.sigmoid(out @ params['Wld_t'] + params['bld'][0])
    dec_p = op @ params['E_pitch'].T + params['bdp'][0]
    dec_d = od @ params['E_dur'].T + params['bdd'][0]
    return dec_p, dec_d, (jnp.stack(new_h), jnp.stack(new_c))


# ----------------------------------------------------------------------------
# Deterministic parameter construction
# ----------------------------------------------------------------------------
def make_params(key, hidden_size, num_layers, pitch_sizes, duration_sizes, offset_sizes):
    Vp, Ep = pitch_sizes
    Vd, Ed = duration_sizes
    Vo, Eo = offset_sizes
    ks = iter(jax.random.split(key, 64))
    nrm = lambda shp, s=0.1: (s * jax.random.normal(next(ks), shp)).astype(jnp.float32)

    params = dict(hidden_size=hidden_size, num_layers=num_layers)
    params['E_pitch'] = nrm((Vp, Ep))
    params['E_dur'] = nrm((Vd, Ed))
    params['E_off'] = nrm((Vo, Eo))

    lstm_in = Ep + Ed + Eo
    w_ih_t, w_hh_t, b_lstm = [], [], []
    for l in range(num_layers):
        in_sz = lstm_in if l == 0 else hidden_size
        w_ih_t.append(nrm((in_sz, 4 * hidden_size)))          # = weight_ih_l0.T
        w_hh_t.append(nrm((hidden_size, 4 * hidden_size)))    # = weight_hh_l0.T
        b_lstm.append(nrm((1, 4 * hidden_size)))              # = b_ih + b_hh
    params['w_ih_t'], params['w_hh_t'], params['b_lstm'] = w_ih_t, w_hh_t, b_lstm

    params['Wlp_t'] = nrm((hidden_size, Ep))   # linear_pitch.weight.T
    params['blp'] = nrm((1, Ep))
    params['Wld_t'] = nrm((hidden_size, Ed))   # linear_duration.weight.T
    params['bld'] = nrm((1, Ed))
    params['bdp'] = nrm((1, Vp))               # decode_pitch bias (weight tied to E_pitch)
    params['bdd'] = nrm((1, Vd))               # decode_duration bias (tied to E_dur)
    # TODO(synk): decode_octave / reward-attention heads are unused by forward(); not implemented.
    return params


if __name__ == "__main__":
    key = jax.random.PRNGKey(0)
    k_par, k_pit, k_dur, k_off, k_h, k_c = jax.random.split(key, 6)

    hidden_size, num_layers = 32, 3
    pitch_sizes, duration_sizes, offset_sizes = (50, 16), (20, 16), (48, 16)
    bptt, batch = 8, 2

    params = make_params(k_par, hidden_size, num_layers,
                         pitch_sizes, duration_sizes, offset_sizes)
    pp = prepare_pallas_params(params)   # one-time: pre-transposed, bf16-cast, vocab-padded

    inputs = jnp.stack([
        jax.random.randint(k_pit, (bptt, batch), 0, pitch_sizes[0]),
        jax.random.randint(k_dur, (bptt, batch), 0, duration_sizes[0]),
        jax.random.randint(k_off, (bptt, batch), 0, offset_sizes[0]),
    ], axis=-1).astype(jnp.int32)                               # (T, B, 3)

    hidden = (0.1 * jax.random.normal(k_h, (num_layers, batch, hidden_size)).astype(jnp.float32),
              0.1 * jax.random.normal(k_c, (num_layers, batch, hidden_size)).astype(jnp.float32))

    dec_p, dec_d, (h_out, c_out) = forward_pallas(params, pp, inputs, hidden)
    jax.block_until_ready((dec_p, dec_d, h_out, c_out))

    # Tolerance loosened for bf16 MXU operands (kernel) vs f32 reference.
    ref_p, ref_d, (ref_h, ref_c) = forward_reference(params, inputs, hidden)
    np.testing.assert_allclose(np.asarray(dec_p), np.asarray(ref_p), rtol=3e-2, atol=3e-2)
    np.testing.assert_allclose(np.asarray(dec_d), np.asarray(ref_d), rtol=3e-2, atol=3e-2)
    np.testing.assert_allclose(np.asarray(h_out), np.asarray(ref_h), rtol=3e-2, atol=3e-2)
    np.testing.assert_allclose(np.asarray(c_out), np.asarray(ref_c), rtol=3e-2, atol=3e-2)

    print("KERNEL_OK")
</pallas_src>

<mosaic_0001>
module attributes {stable_mosaic.version = 11 : i64} {
  func.func @_fused_rnn_kernel(%arg0: i32, %arg1: memref<64x48xbf16, #tpu.memory_space<vmem>>, %arg2: memref<3x8x32xf32, #tpu.memory_space<vmem>>, %arg3: memref<3x8x32xf32, #tpu.memory_space<vmem>>, %arg4: memref<48x128xbf16, #tpu.memory_space<vmem>>, %arg5: memref<2x32x128xbf16, #tpu.memory_space<vmem>>, %arg6: memref<3x32x128xbf16, #tpu.memory_space<vmem>>, %arg7: memref<3x1x128xf32, #tpu.memory_space<vmem>>, %arg8: memref<32x16xbf16, #tpu.memory_space<vmem>>, %arg9: memref<1x16xf32, #tpu.memory_space<vmem>>, %arg10: memref<32x16xbf16, #tpu.memory_space<vmem>>, %arg11: memref<1x16xf32, #tpu.memory_space<vmem>>, %arg12: memref<16x128xbf16, #tpu.memory_space<vmem>>, %arg13: memref<1x128xf32, #tpu.memory_space<vmem>>, %arg14: memref<16x128xbf16, #tpu.memory_space<vmem>>, %arg15: memref<1x128xf32, #tpu.memory_space<vmem>>, %arg16: memref<64x128xf32, #tpu.memory_space<vmem>>, %arg17: memref<64x128xf32, #tpu.memory_space<vmem>>, %arg18: memref<3x8x32xf32, #tpu.memory_space<vmem>>, %arg19: memref<3x8x32xf32, #tpu.memory_space<vmem>>) attributes {dimension_semantics = [#tpu.dimension_semantics<arbitrary>], iteration_bounds = array<i64: 1>, scalar_prefetch = 0 : i64, scratch_operands = 0 : i64, tpu.core_type = #tpu.core_type<tc>, window_params = [{pipeline_mode = #tpu.pipeline_mode<synchronous>, transform_indices = @transform_0, window_bounds = array<i64: 64, 48>}, {pipeline_mode = #tpu.pipeline_mode<synchronous>, transform_indices = @transform_1, window_bounds = array<i64: 3, 8, 32>}, {pipeline_mode = #tpu.pipeline_mode<synchronous>, transform_indices = @transform_2, window_bounds = array<i64: 3, 8, 32>}, {pipeline_mode = #tpu.pipeline_mode<synchronous>, transform_indices = @transform_3, window_bounds = array<i64: 48, 128>}, {pipeline_mode = #tpu.pipeline_mode<synchronous>, transform_indices = @transform_4, window_bounds = array<i64: 2, 32, 128>}, {pipeline_mode = #tpu.pipeline_mode<synchronous>, transform_indices = @transform_5, window_bounds = array<i64: 3, 32, 128>}, {pipeline_mode = #tpu.pipeline_mode<synchronous>, transform_indices = @transform_6, window_bounds = array<i64: 3, 1, 128>}, {pipeline_mode = #tpu.pipeline_mode<synchronous>, transform_indices = @transform_7, window_bounds = array<i64: 32, 16>}, {pipeline_mode = #tpu.pipeline_mode<synchronous>, transform_indices = @transform_8, window_bounds = array<i64: 1, 16>}, {pipeline_mode = #tpu.pipeline_mode<synchronous>, transform_indices = @transform_9, window_bounds = array<i64: 32, 16>}, {pipeline_mode = #tpu.pipeline_mode<synchronous>, transform_indices = @transform_10, window_bounds = array<i64: 1, 16>}, {pipeline_mode = #tpu.pipeline_mode<synchronous>, transform_indices = @transform_11, window_bounds = array<i64: 16, 128>}, {pipeline_mode = #tpu.pipeline_mode<synchronous>, transform_indices = @transform_12, window_bounds = array<i64: 1, 128>}, {pipeline_mode = #tpu.pipeline_mode<synchronous>, transform_indices = @transform_13, window_bounds = array<i64: 16, 128>}, {pipeline_mode = #tpu.pipeline_mode<synchronous>, transform_indices = @transform_14, window_bounds = array<i64: 1, 128>}, {pipeline_mode = #tpu.pipeline_mode<synchronous>, transform_indices = @transform_15, window_bounds = array<i64: 64, 128>}, {pipeline_mode = #tpu.pipeline_mode<synchronous>, transform_indices = @transform_16, window_bounds = array<i64: 64, 128>}, {pipeline_mode = #tpu.pipeline_mode<synchronous>, transform_indices = @transform_17, window_bounds = array<i64: 3, 8, 32>}, {pipeline_mode = #tpu.pipeline_mode<synchronous>, transform_indices = @transform_18, window_bounds = array<i64: 3, 8, 32>}]} {
    %c0 = arith.constant 0 : index
    %c0_0 = arith.constant 0 : index
    %0 = vector.load %arg1[%c0, %c0_0] : memref<64x48xbf16, #tpu.memory_space<vmem>>, vector<64x48xbf16>
    %c0_1 = arith.constant 0 : index
    %c0_2 = arith.constant 0 : index
    %1 = vector.load %arg4[%c0_1, %c0_2] : memref<48x128xbf16, #tpu.memory_space<vmem>>, vector<48x128xbf16>
    %cst = arith.constant dense<0.000000e+00> : vector<64x128xf32>
    %2 = tpu.matmul %0, %1, %cst {dimension_numbers = #tpu.dot_dimension_numbers<[1], [0], [0], [1], [0, 0, 1, 1], [], []>} : vector<64x48xbf16>, vector<48x128xbf16>, vector<64x128xf32> -> vector<64x128xf32>
    %c0_3 = arith.constant 0 : index
    %c0_4 = arith.constant 0 : index
    %c0_5 = arith.constant 0 : index
    %3 = vector.load %arg7[%c0_3, %c0_4, %c0_5] : memref<3x1x128xf32, #tpu.memory_space<vmem>>, vector<1x1x128xf32>
    %4 = vector.shape_cast %3 : vector<1x1x128xf32> to vector<1x128xf32>
    %5 = vector.broadcast %4 : vector<1x128xf32> to vector<64x128xf32>
    %6 = arith.addf %2, %5 : vector<64x128xf32>
    %c0_6 = arith.constant 0 : index
    %c0_7 = arith.constant 0 : index
    %c0_8 = arith.constant 0 : index
    %7 = vector.load %arg6[%c0_6, %c0_7, %c0_8] : memref<3x32x128xbf16, #tpu.memory_space<vmem>>, vector<1x32x128xbf16>
    %8 = vector.shape_cast %7 : vector<1x32x128xbf16> to vector<32x128xbf16>
    %c0_9 = arith.constant 0 : index
    %c0_10 = arith.constant 0 : index
    %c0_11 = arith.constant 0 : index
    %9 = vector.load %arg2[%c0_9, %c0_10, %c0_11] : memref<3x8x32xf32, #tpu.memory_space<vmem>>, vector<1x8x32xf32>
    %10 = vector.shape_cast %9 : vector<1x8x32xf32> to vector<8x32xf32>
    %c0_12 = arith.constant 0 : index
    %c0_13 = arith.constant 0 : index
    %c0_14 = arith.constant 0 : index
    %11 = vector.load %arg3[%c0_12, %c0_13, %c0_14] : memref<3x8x32xf32, #tpu.memory_space<vmem>>, vector<1x8x32xf32>
    %12 = vector.shape_cast %11 : vector<1x8x32xf32> to vector<8x32xf32>
    %13 = vector.extract_strided_slice %6 {offsets = [0, 0], sizes = [8, 128], strides = [1, 1]} : vector<64x128xf32> to vector<8x128xf32>
    %14 = arith.truncf %10 : vector<8x32xf32> to vector<8x32xbf16>
    %cst_15 = arith.constant dense<0.000000e+00> : vector<8x128xf32>
    %15 = tpu.matmul %14, %8, %cst_15 {dimension_numbers = #tpu.dot_dimension_numbers<[1], [0], [0], [1], [0, 0, 1, 1], [], []>} : vector<8x32xbf16>, vector<32x128xbf16>, vector<8x128xf32> -> vector<8x128xf32>
    %16 = arith.addf %13, %15 : vector<8x128xf32>
    %17 = vector.extract_strided_slice %16 {offsets = [0, 0], sizes = [8, 32], strides = [1, 1]} : vector<8x128xf32> to vector<8x32xf32>
    %18 = arith.negf %17 : vector<8x32xf32>
    %19 = math.exp %18 : vector<8x32xf32>
    %cst_16 = arith.constant 1.000000e+00 : f32
    %20 = vector.broadcast %cst_16 : f32 to vector<8x32xf32>
    %21 = arith.addf %20, %19 : vector<8x32xf32>
    %22 = arith.divf %20, %21 : vector<8x32xf32>
    %23 = vector.extract_strided_slice %16 {offsets = [0, 32], sizes = [8, 32], strides = [1, 1]} : vector<8x128xf32> to vector<8x32xf32>
    %24 = arith.negf %23 : vector<8x32xf32>
    %25 = math.exp %24 : vector<8x32xf32>
    %cst_17 = arith.constant 1.000000e+00 : f32
    %26 = vector.broadcast %cst_17 : f32 to vector<8x32xf32>
    %27 = arith.addf %26, %25 : vector<8x32xf32>
    %28 = arith.divf %26, %27 : vector<8x32xf32>
    %29 = vector.extract_strided_slice %16 {offsets = [0, 64], sizes = [8, 32], strides = [1, 1]} : vector<8x128xf32> to vector<8x32xf32>
    %30 = math.tanh %29 : vector<8x32xf32>
    %31 = vector.extract_strided_slice %16 {offsets = [0, 96], sizes = [8, 32], strides = [1, 1]} : vector<8x128xf32> to vector<8x32xf32>
    %32 = arith.negf %31 : vector<8x32xf32>
    %33 = math.exp %32 : vector<8x32xf32>
    %cst_18 = arith.constant 1.000000e+00 : f32
    %34 = vector.broadcast %cst_18 : f32 to vector<8x32xf32>
    %35 = arith.addf %34, %33 : vector<8x32xf32>
    %36 = arith.divf %34, %35 : vector<8x32xf32>
    %37 = arith.mulf %28, %12 : vector<8x32xf32>
    %38 = arith.mulf %22, %30 : vector<8x32xf32>
    %39 = arith.addf %37, %38 : vector<8x32xf32>
    %40 = math.tanh %39 : vector<8x32xf32>
    %41 = arith.mulf %36, %40 : vector<8x32xf32>
    %42 = arith.truncf %41 : vector<8x32xf32> to vector<8x32xbf16>
    %43 = vector.extract_strided_slice %6 {offsets = [8, 0], sizes = [8, 128], strides = [1, 1]} : vector<64x128xf32> to vector<8x128xf32>
    %44 = arith.truncf %41 : vector<8x32xf32> to vector<8x32xbf16>
    %cst_19 = arith.constant dense<0.000000e+00> : vector<8x128xf32>
    %45 = tpu.matmul %44, %8, %cst_19 {dimension_numbers = #tpu.dot_dimension_numbers<[1], [0], [0], [1], [0, 0, 1, 1], [], []>} : vector<8x32xbf16>, vector<32x128xbf16>, vector<8x128xf32> -> vector<8x128xf32>
    %46 = arith.addf %43, %45 : vector<8x128xf32>
    %47 = vector.extract_strided_slice %46 {offsets = [0, 0], sizes = [8, 32], strides = [1, 1]} : vector<8x128xf32> to vector<8x32xf32>
    %48 = arith.negf %47 : vector<8x32xf32>
    %49 = math.exp %48 : vector<8x32xf32>
    %cst_20 = arith.constant 1.000000e+00 : f32
    %50 = vector.broadcast %cst_20 : f32 to vector<8x32xf32>
    %51 = arith.addf %50, %49 : vector<8x32xf32>
    %52 = arith.divf %50, %51 : vector<8x32xf32>
    %53 = vector.extract_strided_slice %46 {offsets = [0, 32], sizes = [8, 32], strides = [1, 1]} : vector<8x128xf32> to vector<8x32xf32>
    %54 = arith.negf %53 : vector<8x32xf32>
    %55 = math.exp %54 : vector<8x32xf32>
    %cst_21 = arith.constant 1.000000e+00 : f32
    %56 = vector.broadcast %cst_21 : f32 to vector<8x32xf32>
    %57 = arith.addf %56, %55 : vector<8x32xf32>
    %58 = arith.divf %56, %57 : vector<8x32xf32>
    %59 = vector.extract_strided_slice %46 {offsets = [0, 64], sizes = [8, 32], strides = [1, 1]} : vector<8x128xf32> to vector<8x32xf32>
    %60 = math.tanh %59 : vector<8x32xf32>
    %61 = vector.extract_strided_slice %46 {offsets = [0, 96], sizes = [8, 32], strides = [1, 1]} : vector<8x128xf32> to vector<8x32xf32>
    %62 = arith.negf %61 : vector<8x32xf32>
    %63 = math.exp %62 : vector<8x32xf32>
    %cst_22 = arith.constant 1.000000e+00 : f32
    %64 = vector.broadcast %cst_22 : f32 to vector<8x32xf32>
    %65 = arith.addf %64, %63 : vector<8x32xf32>
    %66 = arith.divf %64, %65 : vector<8x32xf32>
    %67 = arith.mulf %58, %39 : vector<8x32xf32>
    %68 = arith.mulf %52, %60 : vector<8x32xf32>
    %69 = arith.addf %67, %68 : vector<8x32xf32>
    %70 = math.tanh %69 : vector<8x32xf32>
    %71 = arith.mulf %66, %70 : vector<8x32xf32>
    %72 = arith.truncf %71 : vector<8x32xf32> to vector<8x32xbf16>
    %73 = vector.extract_strided_slice %6 {offsets = [16, 0], sizes = [8, 128], strides = [1, 1]} : vector<64x128xf32> to vector<8x128xf32>
    %74 = arith.truncf %71 : vector<8x32xf32> to vector<8x32xbf16>
    %cst_23 = arith.constant dense<0.000000e+00> : vector<8x128xf32>
    %75 = tpu.matmul %74, %8, %cst_23 {dimension_numbers = #tpu.dot_dimension_numbers<[1], [0], [0], [1], [0, 0, 1, 1], [], []>} : vector<8x32xbf16>, vector<32x128xbf16>, vector<8x128xf32> -> vector<8x128xf32>
    %76 = arith.addf %73, %75 : vector<8x128xf32>
    %77 = vector.extract_strided_slice %76 {offsets = [0, 0], sizes = [8, 32], strides = [1, 1]} : vector<8x128xf32> to vector<8x32xf32>
    %78 = arith.negf %77 : vector<8x32xf32>
    %79 = math.exp %78 : vector<8x32xf32>
    %cst_24 = arith.constant 1.000000e+00 : f32
    %80 = vector.broadcast %cst_24 : f32 to vector<8x32xf32>
    %81 = arith.addf %80, %79 : vector<8x32xf32>
    %82 = arith.divf %80, %81 : vector<8x32xf32>
    %83 = vector.extract_strided_slice %76 {offsets = [0, 32], sizes = [8, 32], strides = [1, 1]} : vector<8x128xf32> to vector<8x32xf32>
    %84 = arith.negf %83 : vector<8x32xf32>
    %85 = math.exp %84 : vector<8x32xf32>
    %cst_25 = arith.constant 1.000000e+00 : f32
    %86 = vector.broadcast %cst_25 : f32 to vector<8x32xf32>
    %87 = arith.addf %86, %85 : vector<8x32xf32>
    %88 = arith.divf %86, %87 : vector<8x32xf32>
    %89 = vector.extract_strided_slice %76 {offsets = [0, 64], sizes = [8, 32], strides = [1, 1]} : vector<8x128xf32> to vector<8x32xf32>
    %90 = math.tanh %89 : vector<8x32xf32>
    %91 = vector.extract_strided_slice %76 {offsets = [0, 96], sizes = [8, 32], strides = [1, 1]} : vector<8x128xf32> to vector<8x32xf32>
    %92 = arith.negf %91 : vector<8x32xf32>
    %93 = math.exp %92 : vector<8x32xf32>
    %cst_26 = arith.constant 1.000000e+00 : f32
    %94 = vector.broadcast %cst_26 : f32 to vector<8x32xf32>
    %95 = arith.addf %94, %93 : vector<8x32xf32>
    %96 = arith.divf %94, %95 : vector<8x32xf32>
    %97 = arith.mulf %88, %69 : vector<8x32xf32>
    %98 = arith.mulf %82, %90 : vector<8x32xf32>
    %99 = arith.addf %97, %98 : vector<8x32xf32>
    %100 = math.tanh %99 : vector<8x32xf32>
    %101 = arith.mulf %96, %100 : vector<8x32xf32>
    %102 = arith.truncf %101 : vector<8x32xf32> to vector<8x32xbf16>
    %103 = vector.extract_strided_slice %6 {offsets = [24, 0], sizes = [8, 128], strides = [1, 1]} : vector<64x128xf32> to vector<8x128xf32>
    %104 = arith.truncf %101 : vector<8x32xf32> to vector<8x32xbf16>
    %cst_27 = arith.constant dense<0.000000e+00> : vector<8x128xf32>
    %105 = tpu.matmul %104, %8, %cst_27 {dimension_numbers = #tpu.dot_dimension_numbers<[1], [0], [0], [1], [0, 0, 1, 1], [], []>} : vector<8x32xbf16>, vector<32x128xbf16>, vector<8x128xf32> -> vector<8x128xf32>
    %106 = arith.addf %103, %105 : vector<8x128xf32>
    %107 = vector.extract_strided_slice %106 {offsets = [0, 0], sizes = [8, 32], strides = [1, 1]} : vector<8x128xf32> to vector<8x32xf32>
    %108 = arith.negf %107 : vector<8x32xf32>
    %109 = math.exp %108 : vector<8x32xf32>
    %cst_28 = arith.constant 1.000000e+00 : f32
    %110 = vector.broadcast %cst_28 : f32 to vector<8x32xf32>
    %111 = arith.addf %110, %109 : vector<8x32xf32>
    %112 = arith.divf %110, %111 : vector<8x32xf32>
    %113 = vector.extract_strided_slice %106 {offsets = [0, 32], sizes = [8, 32], strides = [1, 1]} : vector<8x128xf32> to vector<8x32xf32>
    %114 = arith.negf %113 : vector<8x32xf32>
    %115 = math.exp %114 : vector<8x32xf32>
    %cst_29 = arith.constant 1.000000e+00 : f32
    %116 = vector.broadcast %cst_29 : f32 to vector<8x32xf32>
    %117 = arith.addf %116, %115 : vector<8x32xf32>
    %118 = arith.divf %116, %117 : vector<8x32xf32>
    %119 = vector.extract_strided_slice %106 {offsets = [0, 64], sizes = [8, 32], strides = [1, 1]} : vector<8x128xf32> to vector<8x32xf32>
    %120 = math.tanh %119 : vector<8x32xf32>
    %121 = vector.extract_strided_slice %106 {offsets = [0, 96], sizes = [8, 32], strides = [1, 1]} : vector<8x128xf32> to vector<8x32xf32>
    %122 = arith.negf %121 : vector<8x32xf32>
    %123 = math.exp %122 : vector<8x32xf32>
    %cst_30 = arith.constant 1.000000e+00 : f32
    %124 = vector.broadcast %cst_30 : f32 to vector<8x32xf32>
    %125 = arith.addf %124, %123 : vector<8x32xf32>
    %126 = arith.divf %124, %125 : vector<8x32xf32>
    %127 = arith.mulf %118, %99 : vector<8x32xf32>
    %128 = arith.mulf %112, %120 : vector<8x32xf32>
    %129 = arith.addf %127, %128 : vector<8x32xf32>
    %130 = math.tanh %129 : vector<8x32xf32>
    %131 = arith.mulf %126, %130 : vector<8x32xf32>
    %132 = arith.truncf %131 : vector<8x32xf32> to vector<8x32xbf16>
    %133 = vector.extract_strided_slice %6 {offsets = [32, 0], sizes = [8, 128], strides = [1, 1]} : vector<64x128xf32> to vector<8x128xf32>
    %134 = arith.truncf %131 : vector<8x32xf32> to vector<8x32xbf16>
    %cst_31 = arith.constant dense<0.000000e+00> : vector<8x128xf32>
    %135 = tpu.matmul %134, %8, %cst_31 {dimension_numbers = #tpu.dot_dimension_numbers<[1], [0], [0], [1], [0, 0, 1, 1], [], []>} : vector<8x32xbf16>, vector<32x128xbf16>, vector<8x128xf32> -> vector<8x128xf32>
    %136 = arith.addf %133, %135 : vector<8x128xf32>
    %137 = vector.extract_strided_slice %136 {offsets = [0, 0], sizes = [8, 32], strides = [1, 1]} : vector<8x128xf32> to vector<8x32xf32>
    %138 = arith.negf %137 : vector<8x32xf32>
    %139 = math.exp %138 : vector<8x32xf32>
    %cst_32 = arith.constant 1.000000e+00 : f32
    %140 = vector.broadcast %cst_32 : f32 to vector<8x32xf32>
    %141 = arith.addf %140, %139 : vector<8x32xf32>
    %142 = arith.divf %140, %141 : vector<8x32xf32>
    %143 = vector.extract_strided_slice %136 {offsets = [0, 32], sizes = [8, 32], strides = [1, 1]} : vector<8x128xf32> to vector<8x32xf32>
    %144 = arith.negf %143 : vector<8x32xf32>
    %145 = math.exp %144 : vector<8x32xf32>
    %cst_33 = arith.constant 1.000000e+00 : f32
    %146 = vector.broadcast %cst_33 : f32 to vector<8x32xf32>
    %147 = arith.addf %146, %145 : vector<8x32xf32>
    %148 = arith.divf %146, %147 : vector<8x32xf32>
    %149 = vector.extract_strided_slice %136 {offsets = [0, 64], sizes = [8, 32], strides = [1, 1]} : vector<8x128xf32> to vector<8x32xf32>
    %150 = math.tanh %149 : vector<8x32xf32>
    %151 = vector.extract_strided_slice %136 {offsets = [0, 96], sizes = [8, 32], strides = [1, 1]} : vector<8x128xf32> to vector<8x32xf32>
    %152 = arith.negf %151 : vector<8x32xf32>
    %153 = math.exp %152 : vector<8x32xf32>
    %cst_34 = arith.constant 1.000000e+00 : f32
    %154 = vector.broadcast %cst_34 : f32 to vector<8x32xf32>
    %155 = arith.addf %154, %153 : vector<8x32xf32>
    %156 = arith.divf %154, %155 : vector<8x32xf32>
    %157 = arith.mulf %148, %129 : vector<8x32xf32>
    %158 = arith.mulf %142, %150 : vector<8x32xf32>
    %159 = arith.addf %157, %158 : vector<8x32xf32>
    %160 = math.tanh %159 : vector<8x32xf32>
    %161 = arith.mulf %156, %160 : vector<8x32xf32>
    %162 = arith.truncf %161 : vector<8x32xf32> to vector<8x32xbf16>
    %163 = vector.extract_strided_slice %6 {offsets = [40, 0], sizes = [8, 128], strides = [1, 1]} : vector<64x128xf32> to vector<8x128xf32>
    %164 = arith.truncf %161 : vector<8x32xf32> to vector<8x32xbf16>
    %cst_35 = arith.constant dense<0.000000e+00> : vector<8x128xf32>
    %165 = tpu.matmul %164, %8, %cst_35 {dimension_numbers = #tpu.dot_dimension_numbers<[1], [0], [0], [1], [0, 0, 1, 1], [], []>} : vector<8x32xbf16>, vector<32x128xbf16>, vector<8x128xf32> -> vector<8x128xf32>
    %166 = arith.addf %163, %165 : vector<8x128xf32>
    %167 = vector.extract_strided_slice %166 {offsets = [0, 0], sizes = [8, 32], strides = [1, 1]} : vector<8x128xf32> to vector<8x32xf32>
    %168 = arith.negf %167 : vector<8x32xf32>
    %169 = math.exp %168 : vector<8x32xf32>
    %cst_36 = arith.constant 1.000000e+00 : f32
    %170 = vector.broadcast %cst_36 : f32 to vector<8x32xf32>
    %171 = arith.addf %170, %169 : vector<8x32xf32>
    %172 = arith.divf %170, %171 : vector<8x32xf32>
    %173 = vector.extract_strided_slice %166 {offsets = [0, 32], sizes = [8, 32], strides = [1, 1]} : vector<8x128xf32> to vector<8x32xf32>
    %174 = arith.negf %173 : vector<8x32xf32>
    %175 = math.exp %174 : vector<8x32xf32>
    %cst_37 = arith.constant 1.000000e+00 : f32
    %176 = vector.broadcast %cst_37 : f32 to vector<8x32xf32>
    %177 = arith.addf %176, %175 : vector<8x32xf32>
    %178 = arith.divf %176, %177 : vector<8x32xf32>
    %179 = vector.extract_strided_slice %166 {offsets = [0, 64], sizes = [8, 32], strides = [1, 1]} : vector<8x128xf32> to vector<8x32xf32>
    %180 = math.tanh %179 : vector<8x32xf32>
    %181 = vector.extract_strided_slice %166 {offsets = [0, 96], sizes = [8, 32], strides = [1, 1]} : vector<8x128xf32> to vector<8x32xf32>
    %182 = arith.negf %181 : vector<8x32xf32>
    %183 = math.exp %182 : vector<8x32xf32>
    %cst_38 = arith.constant 1.000000e+00 : f32
    %184 = vector.broadcast %cst_38 : f32 to vector<8x32xf32>
    %185 = arith.addf %184, %183 : vector<8x32xf32>
    %186 = arith.divf %184, %185 : vector<8x32xf32>
    %187 = arith.mulf %178, %159 : vector<8x32xf32>
    %188 = arith.mulf %172, %180 : vector<8x32xf32>
    %189 = arith.addf %187, %188 : vector<8x32xf32>
    %190 = math.tanh %189 : vector<8x32xf32>
    %191 = arith.mulf %186, %190 : vector<8x32xf32>
    %192 = arith.truncf %191 : vector<8x32xf32> to vector<8x32xbf16>
    %193 = vector.extract_strided_slice %6 {offsets = [48, 0], sizes = [8, 128], strides = [1, 1]} : vector<64x128xf32> to vector<8x128xf32>
    %194 = arith.truncf %191 : vector<8x32xf32> to vector<8x32xbf16>
    %cst_39 = arith.constant dense<0.000000e+00> : vector<8x128xf32>
    %195 = tpu.matmul %194, %8, %cst_39 {dimension_numbers = #tpu.dot_dimension_numbers<[1], [0], [0], [1], [0, 0, 1, 1], [], []>} : vector<8x32xbf16>, vector<32x128xbf16>, vector<8x128xf32> -> vector<8x128xf32>
    %196 = arith.addf %193, %195 : vector<8x128xf32>
    %197 = vector.extract_strided_slice %196 {offsets = [0, 0], sizes = [8, 32], strides = [1, 1]} : vector<8x128xf32> to vector<8x32xf32>
    %198 = arith.negf %197 : vector<8x32xf32>
    %199 = math.exp %198 : vector<8x32xf32>
    %cst_40 = arith.constant 1.000000e+00 : f32
    %200 = vector.broadcast %cst_40 : f32 to vector<8x32xf32>
    %201 = arith.addf %200, %199 : vector<8x32xf32>
    %202 = arith.divf %200, %201 : vector<8x32xf32>
    %203 = vector.extract_strided_slice %196 {offsets = [0, 32], sizes = [8, 32], strides = [1, 1]} : vector<8x128xf32> to vector<8x32xf32>
    %204 = arith.negf %203 : vector<8x32xf32>
    %205 = math.exp %204 : vector<8x32xf32>
    %cst_41 = arith.constant 1.000000e+00 : f32
    %206 = vector.broadcast %cst_41 : f32 to vector<8x32xf32>
    %207 = arith.addf %206, %205 : vector<8x32xf32>
    %208 = arith.divf %206, %207 : vector<8x32xf32>
    %209 = vector.extract_strided_slice %196 {offsets = [0, 64], sizes = [8, 32], strides = [1, 1]} : vector<8x128xf32> to vector<8x32xf32>
    %210 = math.tanh %209 : vector<8x32xf32>
    %211 = vector.extract_strided_slice %196 {offsets = [0, 96], sizes = [8, 32], strides = [1, 1]} : vector<8x128xf32> to vector<8x32xf32>
    %212 = arith.negf %211 : vector<8x32xf32>
    %213 = math.exp %212 : vector<8x32xf32>
    %cst_42 = arith.constant 1.000000e+00 : f32
    %214 = vector.broadcast %cst_42 : f32 to vector<8x32xf32>
    %215 = arith.addf %214, %213 : vector<8x32xf32>
    %216 = arith.divf %214, %215 : vector<8x32xf32>
    %217 = arith.mulf %208, %189 : vector<8x32xf32>
    %218 = arith.mulf %202, %210 : vector<8x32xf32>
    %219 = arith.addf %217, %218 : vector<8x32xf32>
    %220 = math.tanh %219 : vector<8x32xf32>
    %221 = arith.mulf %216, %220 : vector<8x32xf32>
    %222 = arith.truncf %221 : vector<8x32xf32> to vector<8x32xbf16>
    %223 = vector.extract_strided_slice %6 {offsets = [56, 0], sizes = [8, 128], strides = [1, 1]} : vector<64x128xf32> to vector<8x128xf32>
    %224 = arith.truncf %221 : vector<8x32xf32> to vector<8x32xbf16>
    %cst_43 = arith.constant dense<0.000000e+00> : vector<8x128xf32>
    %225 = tpu.matmul %224, %8, %cst_43 {dimension_numbers = #tpu.dot_dimension_numbers<[1], [0], [0], [1], [0, 0, 1, 1], [], []>} : vector<8x32xbf16>, vector<32x128xbf16>, vector<8x128xf32> -> vector<8x128xf32>
    %226 = arith.addf %223, %225 : vector<8x128xf32>
    %227 = vector.extract_strided_slice %226 {offsets = [0, 0], sizes = [8, 32], strides = [1, 1]} : vector<8x128xf32> to vector<8x32xf32>
    %228 = arith.negf %227 : vector<8x32xf32>
    %229 = math.exp %228 : vector<8x32xf32>
    %cst_44 = arith.constant 1.000000e+00 : f32
    %230 = vector.broadcast %cst_44 : f32 to vector<8x32xf32>
    %231 = arith.addf %230, %229 : vector<8x32xf32>
    %232 = arith.divf %230, %231 : vector<8x32xf32>
    %233 = vector.extract_strided_slice %226 {offsets = [0, 32], sizes = [8, 32], strides = [1, 1]} : vector<8x128xf32> to vector<8x32xf32>
    %234 = arith.negf %233 : vector<8x32xf32>
    %235 = math.exp %234 : vector<8x32xf32>
    %cst_45 = arith.constant 1.000000e+00 : f32
    %236 = vector.broadcast %cst_45 : f32 to vector<8x32xf32>
    %237 = arith.addf %236, %235 : vector<8x32xf32>
    %238 = arith.divf %236, %237 : vector<8x32xf32>
    %239 = vector.extract_strided_slice %226 {offsets = [0, 64], sizes = [8, 32], strides = [1, 1]} : vector<8x128xf32> to vector<8x32xf32>
    %240 = math.tanh %239 : vector<8x32xf32>
    %241 = vector.extract_strided_slice %226 {offsets = [0, 96], sizes = [8, 32], strides = [1, 1]} : vector<8x128xf32> to vector<8x32xf32>
    %242 = arith.negf %241 : vector<8x32xf32>
    %243 = math.exp %242 : vector<8x32xf32>
    %cst_46 = arith.constant 1.000000e+00 : f32
    %244 = vector.broadcast %cst_46 : f32 to vector<8x32xf32>
    %245 = arith.addf %244, %243 : vector<8x32xf32>
    %246 = arith.divf %244, %245 : vector<8x32xf32>
    %247 = arith.mulf %238, %219 : vector<8x32xf32>
    %248 = arith.mulf %232, %240 : vector<8x32xf32>
    %249 = arith.addf %247, %248 : vector<8x32xf32>
    %250 = math.tanh %249 : vector<8x32xf32>
    %251 = arith.mulf %246, %250 : vector<8x32xf32>
    %252 = arith.truncf %251 : vector<8x32xf32> to vector<8x32xbf16>
    %c0_47 = arith.constant 0 : index
    %c0_48 = arith.constant 0 : index
    %c0_49 = arith.constant 0 : index
    %253 = vector.load %arg18[%c0_47, %c0_48, %c0_49] : memref<3x8x32xf32, #tpu.memory_space<vmem>>, vector<1x8x32xf32>
    %254 = vector.shape_cast %253 : vector<1x8x32xf32> to vector<8x32xf32>
    %255 = vector.shape_cast %251 : vector<8x32xf32> to vector<1x8x32xf32>
    tpu.vector_store %arg18[%c0_47, %c0_48, %c0_49], %255 {strides = array<i32>} : memref<3x8x32xf32, #tpu.memory_space<vmem>>, vector<1x8x32xf32>,
    %c0_50 = arith.constant 0 : index
    %c0_51 = arith.constant 0 : index
    %c0_52 = arith.constant 0 : index
    %256 = vector.load %arg19[%c0_50, %c0_51, %c0_52] : memref<3x8x32xf32, #tpu.memory_space<vmem>>, vector<1x8x32xf32>
    %257 = vector.shape_cast %256 : vector<1x8x32xf32> to vector<8x32xf32>
    %258 = vector.shape_cast %249 : vector<8x32xf32> to vector<1x8x32xf32>
    tpu.vector_store %arg19[%c0_50, %c0_51, %c0_52], %258 {strides = array<i32>} : memref<3x8x32xf32, #tpu.memory_space<vmem>>, vector<1x8x32xf32>,
    %259 = tpu.concatenate %42, %72, %102, %132, %162, %192, %222, %252 in 0 : vector<8x32xbf16>, vector<8x32xbf16>, vector<8x32xbf16>, vector<8x32xbf16>, vector<8x32xbf16>, vector<8x32xbf16>, vector<8x32xbf16>, vector<8x32xbf16> -> vector<64x32xbf16>
    %c0_53 = arith.constant 0 : index
    %c0_54 = arith.constant 0 : index
    %c0_55 = arith.constant 0 : index
    %260 = vector.load %arg5[%c0_53, %c0_54, %c0_55] : memref<2x32x128xbf16, #tpu.memory_space<vmem>>, vector<1x32x128xbf16>
    %261 = vector.shape_cast %260 : vector<1x32x128xbf16> to vector<32x128xbf16>
    %cst_56 = arith.constant dense<0.000000e+00> : vector<64x128xf32>
    %262 = tpu.matmul %259, %261, %cst_56 {dimension_numbers = #tpu.dot_dimension_numbers<[1], [0], [0], [1], [0, 0, 1, 1], [], []>} : vector<64x32xbf16>, vector<32x128xbf16>, vector<64x128xf32> -> vector<64x128xf32>
    %c1 = arith.constant 1 : index
    %c0_57 = arith.constant 0 : index
    %c0_58 = arith.constant 0 : index
    %263 = vector.load %arg7[%c1, %c0_57, %c0_58] : memref<3x1x128xf32, #tpu.memory_space<vmem>>, vector<1x1x128xf32>
    %264 = vector.shape_cast %263 : vector<1x1x128xf32> to vector<1x128xf32>
    %265 = vector.broadcast %264 : vector<1x128xf32> to vector<64x128xf32>
    %266 = arith.addf %262, %265 : vector<64x128xf32>
    %c1_59 = arith.constant 1 : index
    %c0_60 = arith.constant 0 : index
    %c0_61 = arith.constant 0 : index
    %267 = vector.load %arg6[%c1_59, %c0_60, %c0_61] : memref<3x32x128xbf16, #tpu.memory_space<vmem>>, vector<1x32x128xbf16>
    %268 = vector.shape_cast %267 : vector<1x32x128xbf16> to vector<32x128xbf16>
    %c1_62 = arith.constant 1 : index
    %c0_63 = arith.constant 0 : index
    %c0_64 = arith.constant 0 : index
    %269 = vector.load %arg2[%c1_62, %c0_63, %c0_64] : memref<3x8x32xf32, #tpu.memory_space<vmem>>, vector<1x8x32xf32>
    %270 = vector.shape_cast %269 : vector<1x8x32xf32> to vector<8x32xf32>
    %c1_65 = arith.constant 1 : index
    %c0_66 = arith.constant 0 : index
    %c0_67 = arith.constant 0 : index
    %271 = vector.load %arg3[%c1_65, %c0_66, %c0_67] : memref<3x8x32xf32, #tpu.memory_space<vmem>>, vector<1x8x32xf32>
    %272 = vector.shape_cast %271 : vector<1x8x32xf32> to vector<8x32xf32>
    %273 = vector.extract_strided_slice %266 {offsets = [0, 0], sizes = [8, 128], strides = [1, 1]} : vector<64x128xf32> to vector<8x128xf32>
    %274 = arith.truncf %270 : vector<8x32xf32> to vector<8x32xbf16>
    %cst_68 = arith.constant dense<0.000000e+00> : vector<8x128xf32>
    %275 = tpu.matmul %274, %268, %cst_68 {dimension_numbers = #tpu.dot_dimension_numbers<[1], [0], [0], [1], [0, 0, 1, 1], [], []>} : vector<8x32xbf16>, vector<32x128xbf16>, vector<8x128xf32> -> vector<8x128xf32>
    %276 = arith.addf %273, %275 : vector<8x128xf32>
    %277 = vector.extract_strided_slice %276 {offsets = [0, 0], sizes = [8, 32], strides = [1, 1]} : vector<8x128xf32> to vector<8x32xf32>
    %278 = arith.negf %277 : vector<8x32xf32>
    %279 = math.exp %278 : vector<8x32xf32>
    %cst_69 = arith.constant 1.000000e+00 : f32
    %280 = vector.broadcast %cst_69 : f32 to vector<8x32xf32>
    %281 = arith.addf %280, %279 : vector<8x32xf32>
    %282 = arith.divf %280, %281 : vector<8x32xf32>
    %283 = vector.extract_strided_slice %276 {offsets = [0, 32], sizes = [8, 32], strides = [1, 1]} : vector<8x128xf32> to vector<8x32xf32>
    %284 = arith.negf %283 : vector<8x32xf32>
    %285 = math.exp %284 : vector<8x32xf32>
    %cst_70 = arith.constant 1.000000e+00 : f32
    %286 = vector.broadcast %cst_70 : f32 to vector<8x32xf32>
    %287 = arith.addf %286, %285 : vector<8x32xf32>
    %288 = arith.divf %286, %287 : vector<8x32xf32>
    %289 = vector.extract_strided_slice %276 {offsets = [0, 64], sizes = [8, 32], strides = [1, 1]} : vector<8x128xf32> to vector<8x32xf32>
    %290 = math.tanh %289 : vector<8x32xf32>
    %291 = vector.extract_strided_slice %276 {offsets = [0, 96], sizes = [8, 32], strides = [1, 1]} : vector<8x128xf32> to vector<8x32xf32>
    %292 = arith.negf %291 : vector<8x32xf32>
    %293 = math.exp %292 : vector<8x32xf32>
    %cst_71 = arith.constant 1.000000e+00 : f32
    %294 = vector.broadcast %cst_71 : f32 to vector<8x32xf32>
    %295 = arith.addf %294, %293 : vector<8x32xf32>
    %296 = arith.divf %294, %295 : vector<8x32xf32>
    %297 = arith.mulf %288, %272 : vector<8x32xf32>
    %298 = arith.mulf %282, %290 : vector<8x32xf32>
    %299 = arith.addf %297, %298 : vector<8x32xf32>
    %300 = math.tanh %299 : vector<8x32xf32>
    %301 = arith.mulf %296, %300 : vector<8x32xf32>
    %302 = arith.truncf %301 : vector<8x32xf32> to vector<8x32xbf16>
    %303 = vector.extract_strided_slice %266 {offsets = [8, 0], sizes = [8, 128], strides = [1, 1]} : vector<64x128xf32> to vector<8x128xf32>
    %304 = arith.truncf %301 : vector<8x32xf32> to vector<8x32xbf16>
    %cst_72 = arith.constant dense<0.000000e+00> : vector<8x128xf32>
    %305 = tpu.matmul %304, %268, %cst_72 {dimension_numbers = #tpu.dot_dimension_numbers<[1], [0], [0], [1], [0, 0, 1, 1], [], []>} : vector<8x32xbf16>, vector<32x128xbf16>, vector<8x128xf32> -> vector<8x128xf32>
    %306 = arith.addf %303, %305 : vector<8x128xf32>
    %307 = vector.extract_strided_slice %306 {offsets = [0, 0], sizes = [8, 32], strides = [1, 1]} : vector<8x128xf32> to vector<8x32xf32>
    %308 = arith.negf %307 : vector<8x32xf32>
    %309 = math.exp %308 : vector<8x32xf32>
    %cst_73 = arith.constant 1.000000e+00 : f32
    %310 = vector.broadcast %cst_73 : f32 to vector<8x32xf32>
    %311 = arith.addf %310, %309 : vector<8x32xf32>
    %312 = arith.divf %310, %311 : vector<8x32xf32>
    %313 = vector.extract_strided_slice %306 {offsets = [0, 32], sizes = [8, 32], strides = [1, 1]} : vector<8x128xf32> to vector<8x32xf32>
    %314 = arith.negf %313 : vector<8x32xf32>
    %315 = math.exp %314 : vector<8x32xf32>
    %cst_74 = arith.constant 1.000000e+00 : f32
    %316 = vector.broadcast %cst_74 : f32 to vector<8x32xf32>
    %317 = arith.addf %316, %315 : vector<8x32xf32>
    %318 = arith.divf %316, %317 : vector<8x32xf32>
    %319 = vector.extract_strided_slice %306 {offsets = [0, 64], sizes = [8, 32], strides = [1, 1]} : vector<8x128xf32> to vector<8x32xf32>
    %320 = math.tanh %319 : vector<8x32xf32>
    %321 = vector.extract_strided_slice %306 {offsets = [0, 96], sizes = [8, 32], strides = [1, 1]} : vector<8x128xf32> to vector<8x32xf32>
    %322 = arith.negf %321 : vector<8x32xf32>
    %323 = math.exp %322 : vector<8x32xf32>
    %cst_75 = arith.constant 1.000000e+00 : f32
    %324 = vector.broadcast %cst_75 : f32 to vector<8x32xf32>
    %325 = arith.addf %324, %323 : vector<8x32xf32>
    %326 = arith.divf %324, %325 : vector<8x32xf32>
    %327 = arith.mulf %318, %299 : vector<8x32xf32>
    %328 = arith.mulf %312, %320 : vector<8x32xf32>
    %329 = arith.addf %327, %328 : vector<8x32xf32>
    %330 = math.tanh %329 : vector<8x32xf32>
    %331 = arith.mulf %326, %330 : vector<8x32xf32>
    %332 = arith.truncf %331 : vector<8x32xf32> to vector<8x32xbf16>
    %333 = vector.extract_strided_slice %266 {offsets = [16, 0], sizes = [8, 128], strides = [1, 1]} : vector<64x128xf32> to vector<8x128xf32>
    %334 = arith.truncf %331 : vector<8x32xf32> to vector<8x32xbf16>
    %cst_76 = arith.constant dense<0.000000e+00> : vector<8x128xf32>
    %335 = tpu.matmul %334, %268, %cst_76 {dimension_numbers = #tpu.dot_dimension_numbers<[1], [0], [0], [1], [0, 0, 1, 1], [], []>} : vector<8x32xbf16>, vector<32x128xbf16>, vector<8x128xf32> -> vector<8x128xf32>
    %336 = arith.addf %333, %335 : vector<8x128xf32>
    %337 = vector.extract_strided_slice %336 {offsets = [0, 0], sizes = [8, 32], strides = [1, 1]} : vector<8x128xf32> to vector<8x32xf32>
    %338 = arith.negf %337 : vector<8x32xf32>
    %339 = math.exp %338 : vector<8x32xf32>
    %cst_77 = arith.constant 1.000000e+00 : f32
    %340 = vector.broadcast %cst_77 : f32 to vector<8x32xf32>
    %341 = arith.addf %340, %339 : vector<8x32xf32>
    %342 = arith.divf %340, %341 : vector<8x32xf32>
    %343 = vector.extract_strided_slice %336 {offsets = [0, 32], sizes = [8, 32], strides = [1, 1]} : vector<8x128xf32> to vector<8x32xf32>
    %344 = arith.negf %343 : vector<8x32xf32>
    %345 = math.exp %344 : vector<8x32xf32>
    %cst_78 = arith.constant 1.000000e+00 : f32
    %346 = vector.broadcast %cst_78 : f32 to vector<8x32xf32>
    %347 = arith.addf %346, %345 : vector<8x32xf32>
    %348 = arith.divf %346, %347 : vector<8x32xf32>
    %349 = vector.extract_strided_slice %336 {offsets = [0, 64], sizes = [8, 32], strides = [1, 1]} : vector<8x128xf32> to vector<8x32xf32>
    %350 = math.tanh %349 : vector<8x32xf32>
    %351 = vector.extract_strided_slice %336 {offsets = [0, 96], sizes = [8, 32], strides = [1, 1]} : vector<8x128xf32> to vector<8x32xf32>
    %352 = arith.negf %351 : vector<8x32xf32>
    %353 = math.exp %352 : vector<8x32xf32>
    %cst_79 = arith.constant 1.000000e+00 : f32
    %354 = vector.broadcast %cst_79 : f32 to vector<8x32xf32>
    %355 = arith.addf %354, %353 : vector<8x32xf32>
    %356 = arith.divf %354, %355 : vector<8x32xf32>
    %357 = arith.mulf %348, %329 : vector<8x32xf32>
    %358 = arith.mulf %342, %350 : vector<8x32xf32>
    %359 = arith.addf %357, %358 : vector<8x32xf32>
    %360 = math.tanh %359 : vector<8x32xf32>
    %361 = arith.mulf %356, %360 : vector<8x32xf32>
    %362 = arith.truncf %361 : vector<8x32xf32> to vector<8x32xbf16>
    %363 = vector.extract_strided_slice %266 {offsets = [24, 0], sizes = [8, 128], strides = [1, 1]} : vector<64x128xf32> to vector<8x128xf32>
    %364 = arith.truncf %361 : vector<8x32xf32> to vector<8x32xbf16>
    %cst_80 = arith.constant dense<0.000000e+00> : vector<8x128xf32>
    %365 = tpu.matmul %364, %268, %cst_80 {dimension_numbers = #tpu.dot_dimension_numbers<[1], [0], [0], [1], [0, 0, 1, 1], [], []>} : vector<8x32xbf16>, vector<32x128xbf16>, vector<8x128xf32> -> vector<8x128xf32>
    %366 = arith.addf %363, %365 : vector<8x128xf32>
    %367 = vector.extract_strided_slice %366 {offsets = [0, 0], sizes = [8, 32], strides = [1, 1]} : vector<8x128xf32> to vector<8x32xf32>
    %368 = arith.negf %367 : vector<8x32xf32>
    %369 = math.exp %368 : vector<8x32xf32>
    %cst_81 = arith.constant 1.000000e+00 : f32
    %370 = vector.broadcast %cst_81 : f32 to vector<8x32xf32>
    %371 = arith.addf %370, %369 : vector<8x32xf32>
    %372 = arith.divf %370, %371 : vector<8x32xf32>
    %373 = vector.extract_strided_slice %366 {offsets = [0, 32], sizes = [8, 32], strides = [1, 1]} : vector<8x128xf32> to vector<8x32xf32>
    %374 = arith.negf %373 : vector<8x32xf32>
    %375 = math.exp %374 : vector<8x32xf32>
    %cst_82 = arith.constant 1.000000e+00 : f32
    %376 = vector.broadcast %cst_82 : f32 to vector<8x32xf32>
    %377 = arith.addf %376, %375 : vector<8x32xf32>
    %378 = arith.divf %376, %377 : vector<8x32xf32>
    %379 = vector.extract_strided_slice %366 {offsets = [0, 64], sizes = [8, 32], strides = [1, 1]} : vector<8x128xf32> to vector<8x32xf32>
    %380 = math.tanh %379 : vector<8x32xf32>
    %381 = vector.extract_strided_slice %366 {offsets = [0, 96], sizes = [8, 32], strides = [1, 1]} : vector<8x128xf32> to vector<8x32xf32>
    %382 = arith.negf %381 : vector<8x32xf32>
    %383 = math.exp %382 : vector<8x32xf32>
    %cst_83 = arith.constant 1.000000e+00 : f32
    %384 = vector.broadcast %cst_83 : f32 to vector<8x32xf32>
    %385 = arith.addf %384, %383 : vector<8x32xf32>
    %386 = arith.divf %384, %385 : vector<8x32xf32>
    %387 = arith.mulf %378, %359 : vector<8x32xf32>
    %388 = arith.mulf %372, %380 : vector<8x32xf32>
    %389 = arith.addf %387, %388 : vector<8x32xf32>
    %390 = math.tanh %389 : vector<8x32xf32>
    %391 = arith.mulf %386, %390 : vector<8x32xf32>
    %392 = arith.truncf %391 : vector<8x32xf32> to vector<8x32xbf16>
    %393 = vector.extract_strided_slice %266 {offsets = [32, 0], sizes = [8, 128], strides = [1, 1]} : vector<64x128xf32> to vector<8x128xf32>
    %394 = arith.truncf %391 : vector<8x32xf32> to vector<8x32xbf16>
    %cst_84 = arith.constant dense<0.000000e+00> : vector<8x128xf32>
    %395 = tpu.matmul %394, %268, %cst_84 {dimension_numbers = #tpu.dot_dimension_numbers<[1], [0], [0], [1], [0, 0, 1, 1], [], []>} : vector<8x32xbf16>, vector<32x128xbf16>, vector<8x128xf32> -> vector<8x128xf32>
    %396 = arith.addf %393, %395 : vector<8x128xf32>
    %397 = vector.extract_strided_slice %396 {offsets = [0, 0], sizes = [8, 32], strides = [1, 1]} : vector<8x128xf32> to vector<8x32xf32>
    %398 = arith.negf %397 : vector<8x32xf32>
    %399 = math.exp %398 : vector<8x32xf32>
    %cst_85 = arith.constant 1.000000e+00 : f32
    %400 = vector.broadcast %cst_85 : f32 to vector<8x32xf32>
    %401 = arith.addf %400, %399 : vector<8x32xf32>
    %402 = arith.divf %400, %401 : vector<8x32xf32>
    %403 = vector.extract_strided_slice %396 {offsets = [0, 32], sizes = [8, 32], strides = [1, 1]} : vector<8x128xf32> to vector<8x32xf32>
    %404 = arith.negf %403 : vector<8x32xf32>
    %405 = math.exp %404 : vector<8x32xf32>
    %cst_86 = arith.constant 1.000000e+00 : f32
    %406 = vector.broadcast %cst_86 : f32 to vector<8x32xf32>
    %407 = arith.addf %406, %405 : vector<8x32xf32>
    %408 = arith.divf %406, %407 : vector<8x32xf32>
    %409 = vector.extract_strided_slice %396 {offsets = [0, 64], sizes = [8, 32], strides = [1, 1]} : vector<8x128xf32> to vector<8x32xf32>
    %410 = math.tanh %409 : vector<8x32xf32>
    %411 = vector.extract_strided_slice %396 {offsets = [0, 96], sizes = [8, 32], strides = [1, 1]} : vector<8x128xf32> to vector<8x32xf32>
    %412 = arith.negf %411 : vector<8x32xf32>
    %413 = math.exp %412 : vector<8x32xf32>
    %cst_87 = arith.constant 1.000000e+00 : f32
    %414 = vector.broadcast %cst_87 : f32 to vector<8x32xf32>
    %415 = arith.addf %414, %413 : vector<8x32xf32>
    %416 = arith.divf %414, %415 : vector<8x32xf32>
    %417 = arith.mulf %408, %389 : vector<8x32xf32>
    %418 = arith.mulf %402, %410 : vector<8x32xf32>
    %419 = arith.addf %417, %418 : vector<8x32xf32>
    %420 = math.tanh %419 : vector<8x32xf32>
    %421 = arith.mulf %416, %420 : vector<8x32xf32>
    %422 = arith.truncf %421 : vector<8x32xf32> to vector<8x32xbf16>
    %423 = vector.extract_strided_slice %266 {offsets = [40, 0], sizes = [8, 128], strides = [1, 1]} : vector<64x128xf32> to vector<8x128xf32>
    %424 = arith.truncf %421 : vector<8x32xf32> to vector<8x32xbf16>
    %cst_88 = arith.constant dense<0.000000e+00> : vector<8x128xf32>
    %425 = tpu.matmul %424, %268, %cst_88 {dimension_numbers = #tpu.dot_dimension_numbers<[1], [0], [0], [1], [0, 0, 1, 1], [], []>} : vector<8x32xbf16>, vector<32x128xbf16>, vector<8x128xf32> -> vector<8x128xf32>
    %426 = arith.addf %423, %425 : vector<8x128xf32>
    %427 = vector.extract_strided_slice %426 {offsets = [0, 0], sizes = [8, 32], strides = [1, 1]} : vector<8x128xf32> to vector<8x32xf32>
    %428 = arith.negf %427 : vector<8x32xf32>
    %429 = math.exp %428 : vector<8x32xf32>
    %cst_89 = arith.constant 1.000000e+00 : f32
    %430 = vector.broadcast %cst_89 : f32 to vector<8x32xf32>
    %431 = arith.addf %430, %429 : vector<8x32xf32>
    %432 = arith.divf %430, %431 : vector<8x32xf32>
    %433 = vector.extract_strided_slice %426 {offsets = [0, 32], sizes = [8, 32], strides = [1, 1]} : vector<8x128xf32> to vector<8x32xf32>
    %434 = arith.negf %433 : vector<8x32xf32>
    %435 = math.exp %434 : vector<8x32xf32>
    %cst_90 = arith.constant 1.000000e+00 : f32
    %436 = vector.broadcast %cst_90 : f32 to vector<8x32xf32>
    %437 = arith.addf %436, %435 : vector<8x32xf32>
    %438 = arith.divf %436, %437 : vector<8x32xf32>
    %439 = vector.extract_strided_slice %426 {offsets = [0, 64], sizes = [8, 32], strides = [1, 1]} : vector<8x128xf32> to vector<8x32xf32>
    %440 = math.tanh %439 : vector<8x32xf32>
    %441 = vector.extract_strided_slice %426 {offsets = [0, 96], sizes = [8, 32], strides = [1, 1]} : vector<8x128xf32> to vector<8x32xf32>
    %442 = arith.negf %441 : vector<8x32xf32>
    %443 = math.exp %442 : vector<8x32xf32>
    %cst_91 = arith.constant 1.000000e+00 : f32
    %444 = vector.broadcast %cst_91 : f32 to vector<8x32xf32>
    %445 = arith.addf %444, %443 : vector<8x32xf32>
    %446 = arith.divf %444, %445 : vector<8x32xf32>
    %447 = arith.mulf %438, %419 : vector<8x32xf32>
    %448 = arith.mulf %432, %440 : vector<8x32xf32>
    %449 = arith.addf %447, %448 : vector<8x32xf32>
    %450 = math.tanh %449 : vector<8x32xf32>
    %451 = arith.mulf %446, %450 : vector<8x32xf32>
    %452 = arith.truncf %451 : vector<8x32xf32> to vector<8x32xbf16>
    %453 = vector.extract_strided_slice %266 {offsets = [48, 0], sizes = [8, 128], strides = [1, 1]} : vector<64x128xf32> to vector<8x128xf32>
    %454 = arith.truncf %451 : vector<8x32xf32> to vector<8x32xbf16>
    %cst_92 = arith.constant dense<0.000000e+00> : vector<8x128xf32>
    %455 = tpu.matmul %454, %268, %cst_92 {dimension_numbers = #tpu.dot_dimension_numbers<[1], [0], [0], [1], [0, 0, 1, 1], [], []>} : vector<8x32xbf16>, vector<32x128xbf16>, vector<8x128xf32> -> vector<8x128xf32>
    %456 = arith.addf %453, %455 : vector<8x128xf32>
    %457 = vector.extract_strided_slice %456 {offsets = [0, 0], sizes = [8, 32], strides = [1, 1]} : vector<8x128xf32> to vector<8x32xf32>
    %458 = arith.negf %457 : vector<8x32xf32>
    %459 = math.exp %458 : vector<8x32xf32>
    %cst_93 = arith.constant 1.000000e+00 : f32
    %460 = vector.broadcast %cst_93 : f32 to vector<8x32xf32>
    %461 = arith.addf %460, %459 : vector<8x32xf32>
    %462 = arith.divf %460, %461 : vector<8x32xf32>
    %463 = vector.extract_strided_slice %456 {offsets = [0, 32], sizes = [8, 32], strides = [1, 1]} : vector<8x128xf32> to vector<8x32xf32>
    %464 = arith.negf %463 : vector<8x32xf32>
    %465 = math.exp %464 : vector<8x32xf32>
    %cst_94 = arith.constant 1.000000e+00 : f32
    %466 = vector.broadcast %cst_94 : f32 to vector<8x32xf32>
    %467 = arith.addf %466, %465 : vector<8x32xf32>
    %468 = arith.divf %466, %467 : vector<8x32xf32>
    %469 = vector.extract_strided_slice %456 {offsets = [0, 64], sizes = [8, 32], strides = [1, 1]} : vector<8x128xf32> to vector<8x32xf32>
    %470 = math.tanh %469 : vector<8x32xf32>
    %471 = vector.extract_strided_slice %456 {offsets = [0, 96], sizes = [8, 32], strides = [1, 1]} : vector<8x128xf32> to vector<8x32xf32>
    %472 = arith.negf %471 : vector<8x32xf32>
    %473 = math.exp %472 : vector<8x32xf32>
    %cst_95 = arith.constant 1.000000e+00 : f32
    %474 = vector.broadcast %cst_95 : f32 to vector<8x32xf32>
    %475 = arith.addf %474, %473 : vector<8x32xf32>
    %476 = arith.divf %474, %475 : vector<8x32xf32>
    %477 = arith.mulf %468, %449 : vector<8x32xf32>
    %478 = arith.mulf %462, %470 : vector<8x32xf32>
    %479 = arith.addf %477, %478 : vector<8x32xf32>
    %480 = math.tanh %479 : vector<8x32xf32>
    %481 = arith.mulf %476, %480 : vector<8x32xf32>
    %482 = arith.truncf %481 : vector<8x32xf32> to vector<8x32xbf16>
    %483 = vector.extract_strided_slice %266 {offsets = [56, 0], sizes = [8, 128], strides = [1, 1]} : vector<64x128xf32> to vector<8x128xf32>
    %484 = arith.truncf %481 : vector<8x32xf32> to vector<8x32xbf16>
    %cst_96 = arith.constant dense<0.000000e+00> : vector<8x128xf32>
    %485 = tpu.matmul %484, %268, %cst_96 {dimension_numbers = #tpu.dot_dimension_numbers<[1], [0], [0], [1], [0, 0, 1, 1], [], []>} : vector<8x32xbf16>, vector<32x128xbf16>, vector<8x128xf32> -> vector<8x128xf32>
    %486 = arith.addf %483, %485 : vector<8x128xf32>
    %487 = vector.extract_strided_slice %486 {offsets = [0, 0], sizes = [8, 32], strides = [1, 1]} : vector<8x128xf32> to vector<8x32xf32>
    %488 = arith.negf %487 : vector<8x32xf32>
    %489 = math.exp %488 : vector<8x32xf32>
    %cst_97 = arith.constant 1.000000e+00 : f32
    %490 = vector.broadcast %cst_97 : f32 to vector<8x32xf32>
    %491 = arith.addf %490, %489 : vector<8x32xf32>
    %492 = arith.divf %490, %491 : vector<8x32xf32>
    %493 = vector.extract_strided_slice %486 {offsets = [0, 32], sizes = [8, 32], strides = [1, 1]} : vector<8x128xf32> to vector<8x32xf32>
    %494 = arith.negf %493 : vector<8x32xf32>
    %495 = math.exp %494 : vector<8x32xf32>
    %cst_98 = arith.constant 1.000000e+00 : f32
    %496 = vector.broadcast %cst_98 : f32 to vector<8x32xf32>
    %497 = arith.addf %496, %495 : vector<8x32xf32>
    %498 = arith.divf %496, %497 : vector<8x32xf32>
    %499 = vector.extract_strided_slice %486 {offsets = [0, 64], sizes = [8, 32], strides = [1, 1]} : vector<8x128xf32> to vector<8x32xf32>
    %500 = math.tanh %499 : vector<8x32xf32>
    %501 = vector.extract_strided_slice %486 {offsets = [0, 96], sizes = [8, 32], strides = [1, 1]} : vector<8x128xf32> to vector<8x32xf32>
    %502 = arith.negf %501 : vector<8x32xf32>
    %503 = math.exp %502 : vector<8x32xf32>
    %cst_99 = arith.constant 1.000000e+00 : f32
    %504 = vector.broadcast %cst_99 : f32 to vector<8x32xf32>
    %505 = arith.addf %504, %503 : vector<8x32xf32>
    %506 = arith.divf %504, %505 : vector<8x32xf32>
    %507 = arith.mulf %498, %479 : vector<8x32xf32>
    %508 = arith.mulf %492, %500 : vector<8x32xf32>
    %509 = arith.addf %507, %508 : vector<8x32xf32>
    %510 = math.tanh %509 : vector<8x32xf32>
    %511 = arith.mulf %506, %510 : vector<8x32xf32>
    %512 = arith.truncf %511 : vector<8x32xf32> to vector<8x32xbf16>
    %c1_100 = arith.constant 1 : index
    %c0_101 = arith.constant 0 : index
    %c0_102 = arith.constant 0 : index
    %513 = vector.load %arg18[%c1_100, %c0_101, %c0_102] : memref<3x8x32xf32, #tpu.memory_space<vmem>>, vector<1x8x32xf32>
    %514 = vector.shape_cast %513 : vector<1x8x32xf32> to vector<8x32xf32>
    %515 = vector.shape_cast %511 : vector<8x32xf32> to vector<1x8x32xf32>
    tpu.vector_store %arg18[%c1_100, %c0_101, %c0_102], %515 {strides = array<i32>} : memref<3x8x32xf32, #tpu.memory_space<vmem>>, vector<1x8x32xf32>,
    %c1_103 = arith.constant 1 : index
    %c0_104 = arith.constant 0 : index
    %c0_105 = arith.constant 0 : index
    %516 = vector.load %arg19[%c1_103, %c0_104, %c0_105] : memref<3x8x32xf32, #tpu.memory_space<vmem>>, vector<1x8x32xf32>
    %517 = vector.shape_cast %516 : vector<1x8x32xf32> to vector<8x32xf32>
    %518 = vector.shape_cast %509 : vector<8x32xf32> to vector<1x8x32xf32>
    tpu.vector_store %arg19[%c1_103, %c0_104, %c0_105], %518 {strides = array<i32>} : memref<3x8x32xf32, #tpu.memory_space<vmem>>, vector<1x8x32xf32>,
    %519 = tpu.concatenate %302, %332, %362, %392, %422, %452, %482, %512 in 0 : vector<8x32xbf16>, vector<8x32xbf16>, vector<8x32xbf16>, vector<8x32xbf16>, vector<8x32xbf16>, vector<8x32xbf16>, vector<8x32xbf16>, vector<8x32xbf16> -> vector<64x32xbf16>
    %c1_106 = arith.constant 1 : index
    %c0_107 = arith.constant 0 : index
    %c0_108 = arith.constant 0 : index
    %520 = vector.load %arg5[%c1_106, %c0_107, %c0_108] : memref<2x32x128xbf16, #tpu.memory_space<vmem>>, vector<1x32x128xbf16>
    %521 = vector.shape_cast %520 : vector<1x32x128xbf16> to vector<32x128xbf16>
    %cst_109 = arith.constant dense<0.000000e+00> : vector<64x128xf32>
    %522 = tpu.matmul %519, %521, %cst_109 {dimension_numbers = #tpu.dot_dimension_numbers<[1], [0], [0], [1], [0, 0, 1, 1], [], []>} : vector<64x32xbf16>, vector<32x128xbf16>, vector<64x128xf32> -> vector<64x128xf32>
    %c2 = arith.constant 2 : index
    %c0_110 = arith.constant 0 : index
    %c0_111 = arith.constant 0 : index
    %523 = vector.load %arg7[%c2, %c0_110, %c0_111] : memref<3x1x128xf32, #tpu.memory_space<vmem>>, vector<1x1x128xf32>
    %524 = vector.shape_cast %523 : vector<1x1x128xf32> to vector<1x128xf32>
    %525 = vector.broadcast %524 : vector<1x128xf32> to vector<64x128xf32>
    %526 = arith.addf %522, %525 : vector<64x128xf32>
    %c2_112 = arith.constant 2 : index
    %c0_113 = arith.constant 0 : index
    %c0_114 = arith.constant 0 : index
    %527 = vector.load %arg6[%c2_112, %c0_113, %c0_114] : memref<3x32x128xbf16, #tpu.memory_space<vmem>>, vector<1x32x128xbf16>
    %528 = vector.shape_cast %527 : vector<1x32x128xbf16> to vector<32x128xbf16>
    %c2_115 = arith.constant 2 : index
    %c0_116 = arith.constant 0 : index
    %c0_117 = arith.constant 0 : index
    %529 = vector.load %arg2[%c2_115, %c0_116, %c0_117] : memref<3x8x32xf32, #tpu.memory_space<vmem>>, vector<1x8x32xf32>
    %530 = vector.shape_cast %529 : vector<1x8x32xf32> to vector<8x32xf32>
    %c2_118 = arith.constant 2 : index
    %c0_119 = arith.constant 0 : index
    %c0_120 = arith.constant 0 : index
    %531 = vector.load %arg3[%c2_118, %c0_119, %c0_120] : memref<3x8x32xf32, #tpu.memory_space<vmem>>, vector<1x8x32xf32>
    %532 = vector.shape_cast %531 : vector<1x8x32xf32> to vector<8x32xf32>
    %533 = vector.extract_strided_slice %526 {offsets = [0, 0], sizes = [8, 128], strides = [1, 1]} : vector<64x128xf32> to vector<8x128xf32>
    %534 = arith.truncf %530 : vector<8x32xf32> to vector<8x32xbf16>
    %cst_121 = arith.constant dense<0.000000e+00> : vector<8x128xf32>
    %535 = tpu.matmul %534, %528, %cst_121 {dimension_numbers = #tpu.dot_dimension_numbers<[1], [0], [0], [1], [0, 0, 1, 1], [], []>} : vector<8x32xbf16>, vector<32x128xbf16>, vector<8x128xf32> -> vector<8x128xf32>
    %536 = arith.addf %533, %535 : vector<8x128xf32>
    %537 = vector.extract_strided_slice %536 {offsets = [0, 0], sizes = [8, 32], strides = [1, 1]} : vector<8x128xf32> to vector<8x32xf32>
    %538 = arith.negf %537 : vector<8x32xf32>
    %539 = math.exp %538 : vector<8x32xf32>
    %cst_122 = arith.constant 1.000000e+00 : f32
    %540 = vector.broadcast %cst_122 : f32 to vector<8x32xf32>
    %541 = arith.addf %540, %539 : vector<8x32xf32>
    %542 = arith.divf %540, %541 : vector<8x32xf32>
    %543 = vector.extract_strided_slice %536 {offsets = [0, 32], sizes = [8, 32], strides = [1, 1]} : vector<8x128xf32> to vector<8x32xf32>
    %544 = arith.negf %543 : vector<8x32xf32>
    %545 = math.exp %544 : vector<8x32xf32>
    %cst_123 = arith.constant 1.000000e+00 : f32
    %546 = vector.broadcast %cst_123 : f32 to vector<8x32xf32>
    %547 = arith.addf %546, %545 : vector<8x32xf32>
    %548 = arith.divf %546, %547 : vector<8x32xf32>
    %549 = vector.extract_strided_slice %536 {offsets = [0, 64], sizes = [8, 32], strides = [1, 1]} : vector<8x128xf32> to vector<8x32xf32>
    %550 = math.tanh %549 : vector<8x32xf32>
    %551 = vector.extract_strided_slice %536 {offsets = [0, 96], sizes = [8, 32], strides = [1, 1]} : vector<8x128xf32> to vector<8x32xf32>
    %552 = arith.negf %551 : vector<8x32xf32>
    %553 = math.exp %552 : vector<8x32xf32>
    %cst_124 = arith.constant 1.000000e+00 : f32
    %554 = vector.broadcast %cst_124 : f32 to vector<8x32xf32>
    %555 = arith.addf %554, %553 : vector<8x32xf32>
    %556 = arith.divf %554, %555 : vector<8x32xf32>
    %557 = arith.mulf %548, %532 : vector<8x32xf32>
    %558 = arith.mulf %542, %550 : vector<8x32xf32>
    %559 = arith.addf %557, %558 : vector<8x32xf32>
    %560 = math.tanh %559 : vector<8x32xf32>
    %561 = arith.mulf %556, %560 : vector<8x32xf32>
    %562 = arith.truncf %561 : vector<8x32xf32> to vector<8x32xbf16>
    %563 = vector.extract_strided_slice %526 {offsets = [8, 0], sizes = [8, 128], strides = [1, 1]} : vector<64x128xf32> to vector<8x128xf32>
    %564 = arith.truncf %561 : vector<8x32xf32> to vector<8x32xbf16>
    %cst_125 = arith.constant dense<0.000000e+00> : vector<8x128xf32>
    %565 = tpu.matmul %564, %528, %cst_125 {dimension_numbers = #tpu.dot_dimension_numbers<[1], [0], [0], [1], [0, 0, 1, 1], [], []>} : vector<8x32xbf16>, vector<32x128xbf16>, vector<8x128xf32> -> vector<8x128xf32>
    %566 = arith.addf %563, %565 : vector<8x128xf32>
    %567 = vector.extract_strided_slice %566 {offsets = [0, 0], sizes = [8, 32], strides = [1, 1]} : vector<8x128xf32> to vector<8x32xf32>
    %568 = arith.negf %567 : vector<8x32xf32>
    %569 = math.exp %568 : vector<8x32xf32>
    %cst_126 = arith.constant 1.000000e+00 : f32
    %570 = vector.broadcast %cst_126 : f32 to vector<8x32xf32>
    %571 = arith.addf %570, %569 : vector<8x32xf32>
    %572 = arith.divf %570, %571 : vector<8x32xf32>
    %573 = vector.extract_strided_slice %566 {offsets = [0, 32], sizes = [8, 32], strides = [1, 1]} : vector<8x128xf32> to vector<8x32xf32>
    %574 = arith.negf %573 : vector<8x32xf32>
    %575 = math.exp %574 : vector<8x32xf32>
    %cst_127 = arith.constant 1.000000e+00 : f32
    %576 = vector.broadcast %cst_127 : f32 to vector<8x32xf32>
    %577 = arith.addf %576, %575 : vector<8x32xf32>
    %578 = arith.divf %576, %577 : vector<8x32xf32>
    %579 = vector.extract_strided_slice %566 {offsets = [0, 64], sizes = [8, 32], strides = [1, 1]} : vector<8x128xf32> to vector<8x32xf32>
    %580 = math.tanh %579 : vector<8x32xf32>
    %581 = vector.extract_strided_slice %566 {offsets = [0, 96], sizes = [8, 32], strides = [1, 1]} : vector<8x128xf32> to vector<8x32xf32>
    %582 = arith.negf %581 : vector<8x32xf32>
    %583 = math.exp %582 : vector<8x32xf32>
    %cst_128 = arith.constant 1.000000e+00 : f32
    %584 = vector.broadcast %cst_128 : f32 to vector<8x32xf32>
    %585 = arith.addf %584, %583 : vector<8x32xf32>
    %586 = arith.divf %584, %585 : vector<8x32xf32>
    %587 = arith.mulf %578, %559 : vector<8x32xf32>
    %588 = arith.mulf %572, %580 : vector<8x32xf32>
    %589 = arith.addf %587, %588 : vector<8x32xf32>
    %590 = math.tanh %589 : vector<8x32xf32>
    %591 = arith.mulf %586, %590 : vector<8x32xf32>
    %592 = arith.truncf %591 : vector<8x32xf32> to vector<8x32xbf16>
    %593 = vector.extract_strided_slice %526 {offsets = [16, 0], sizes = [8, 128], strides = [1, 1]} : vector<64x128xf32> to vector<8x128xf32>
    %594 = arith.truncf %591 : vector<8x32xf32> to vector<8x32xbf16>
    %cst_129 = arith.constant dense<0.000000e+00> : vector<8x128xf32>
    %595 = tpu.matmul %594, %528, %cst_129 {dimension_numbers = #tpu.dot_dimension_numbers<[1], [0], [0], [1], [0, 0, 1, 1], [], []>} : vector<8x32xbf16>, vector<32x128xbf16>, vector<8x128xf32> -> vector<8x128xf32>
    %596 = arith.addf %593, %595 : vector<8x128xf32>
    %597 = vector.extract_strided_slice %596 {offsets = [0, 0], sizes = [8, 32], strides = [1, 1]} : vector<8x128xf32> to vector<8x32xf32>
    %598 = arith.negf %597 : vector<8x32xf32>
    %599 = math.exp %598 : vector<8x32xf32>
    %cst_130 = arith.constant 1.000000e+00 : f32
    %600 = vector.broadcast %cst_130 : f32 to vector<8x32xf32>
    %601 = arith.addf %600, %599 : vector<8x32xf32>
    %602 = arith.divf %600, %601 : vector<8x32xf32>
    %603 = vector.extract_strided_slice %596 {offsets = [0, 32], sizes = [8, 32], strides = [1, 1]} : vector<8x128xf32> to vector<8x32xf32>
    %604 = arith.negf %603 : vector<8x32xf32>
    %605 = math.exp %604 : vector<8x32xf32>
    %cst_131 = arith.constant 1.000000e+00 : f32
    %606 = vector.broadcast %cst_131 : f32 to vector<8x32xf32>
    %607 = arith.addf %606, %605 : vector<8x32xf32>
    %608 = arith.divf %606, %607 : vector<8x32xf32>
    %609 = vector.extract_strided_slice %596 {offsets = [0, 64], sizes = [8, 32], strides = [1, 1]} : vector<8x128xf32> to vector<8x32xf32>
    %610 = math.tanh %609 : vector<8x32xf32>
    %611 = vector.extract_strided_slice %596 {offsets = [0, 96], sizes = [8, 32], strides = [1, 1]} : vector<8x128xf32> to vector<8x32xf32>
    %612 = arith.negf %611 : vector<8x32xf32>
    %613 = math.exp %612 : vector<8x32xf32>
    %cst_132 = arith.constant 1.000000e+00 : f32
    %614 = vector.broadcast %cst_132 : f32 to vector<8x32xf32>
    %615 = arith.addf %614, %613 : vector<8x32xf32>
    %616 = arith.divf %614, %615 : vector<8x32xf32>
    %617 = arith.mulf %608, %589 : vector<8x32xf32>
    %618 = arith.mulf %602, %610 : vector<8x32xf32>
    %619 = arith.addf %617, %618 : vector<8x32xf32>
    %620 = math.tanh %619 : vector<8x32xf32>
    %621 = arith.mulf %616, %620 : vector<8x32xf32>
    %622 = arith.truncf %621 : vector<8x32xf32> to vector<8x32xbf16>
    %623 = vector.extract_strided_slice %526 {offsets = [24, 0], sizes = [8, 128], strides = [1, 1]} : vector<64x128xf32> to vector<8x128xf32>
    %624 = arith.truncf %621 : vector<8x32xf32> to vector<8x32xbf16>
    %cst_133 = arith.constant dense<0.000000e+00> : vector<8x128xf32>
    %625 = tpu.matmul %624, %528, %cst_133 {dimension_numbers = #tpu.dot_dimension_numbers<[1], [0], [0], [1], [0, 0, 1, 1], [], []>} : vector<8x32xbf16>, vector<32x128xbf16>, vector<8x128xf32> -> vector<8x128xf32>
    %626 = arith.addf %623, %625 : vector<8x128xf32>
    %627 = vector.extract_strided_slice %626 {offsets = [0, 0], sizes = [8, 32], strides = [1, 1]} : vector<8x128xf32> to vector<8x32xf32>
    %628 = arith.negf %627 : vector<8x32xf32>
    %629 = math.exp %628 : vector<8x32xf32>
    %cst_134 = arith.constant 1.000000e+00 : f32
    %630 = vector.broadcast %cst_134 : f32 to vector<8x32xf32>
    %631 = arith.addf %630, %629 : vector<8x32xf32>
    %632 = arith.divf %630, %631 : vector<8x32xf32>
    %633 = vector.extract_strided_slice %626 {offsets = [0, 32], sizes = [8, 32], strides = [1, 1]} : vector<8x128xf32> to vector<8x32xf32>
    %634 = arith.negf %633 : vector<8x32xf32>
    %635 = math.exp %634 : vector<8x32xf32>
    %cst_135 = arith.constant 1.000000e+00 : f32
    %636 = vector.broadcast %cst_135 : f32 to vector<8x32xf32>
    %637 = arith.addf %636, %635 : vector<8x32xf32>
    %638 = arith.divf %636, %637 : vector<8x32xf32>
    %639 = vector.extract_strided_slice %626 {offsets = [0, 64], sizes = [8, 32], strides = [1, 1]} : vector<8x128xf32> to vector<8x32xf32>
    %640 = math.tanh %639 : vector<8x32xf32>
    %641 = vector.extract_strided_slice %626 {offsets = [0, 96], sizes = [8, 32], strides = [1, 1]} : vector<8x128xf32> to vector<8x32xf32>
    %642 = arith.negf %641 : vector<8x32xf32>
    %643 = math.exp %642 : vector<8x32xf32>
    %cst_136 = arith.constant 1.000000e+00 : f32
    %644 = vector.broadcast %cst_136 : f32 to vector<8x32xf32>
    %645 = arith.addf %644, %643 : vector<8x32xf32>
    %646 = arith.divf %644, %645 : vector<8x32xf32>
    %647 = arith.mulf %638, %619 : vector<8x32xf32>
    %648 = arith.mulf %632, %640 : vector<8x32xf32>
    %649 = arith.addf %647, %648 : vector<8x32xf32>
    %650 = math.tanh %649 : vector<8x32xf32>
    %651 = arith.mulf %646, %650 : vector<8x32xf32>
    %652 = arith.truncf %651 : vector<8x32xf32> to vector<8x32xbf16>
    %653 = vector.extract_strided_slice %526 {offsets = [32, 0], sizes = [8, 128], strides = [1, 1]} : vector<64x128xf32> to vector<8x128xf32>
    %654 = arith.truncf %651 : vector<8x32xf32> to vector<8x32xbf16>
    %cst_137 = arith.constant dense<0.000000e+00> : vector<8x128xf32>
    %655 = tpu.matmul %654, %528, %cst_137 {dimension_numbers = #tpu.dot_dimension_numbers<[1], [0], [0], [1], [0, 0, 1, 1], [], []>} : vector<8x32xbf16>, vector<32x128xbf16>, vector<8x128xf32> -> vector<8x128xf32>
    %656 = arith.addf %653, %655 : vector<8x128xf32>
    %657 = vector.extract_strided_slice %656 {offsets = [0, 0], sizes = [8, 32], strides = [1, 1]} : vector<8x128xf32> to vector<8x32xf32>
    %658 = arith.negf %657 : vector<8x32xf32>
    %659 = math.exp %658 : vector<8x32xf32>
    %cst_138 = arith.constant 1.000000e+00 : f32
    %660 = vector.broadcast %cst_138 : f32 to vector<8x32xf32>
    %661 = arith.addf %660, %659 : vector<8x32xf32>
    %662 = arith.divf %660, %661 : vector<8x32xf32>
    %663 = vector.extract_strided_slice %656 {offsets = [0, 32], sizes = [8, 32], strides = [1, 1]} : vector<8x128xf32> to vector<8x32xf32>
    %664 = arith.negf %663 : vector<8x32xf32>
    %665 = math.exp %664 : vector<8x32xf32>
    %cst_139 = arith.constant 1.000000e+00 : f32
    %666 = vector.broadcast %cst_139 : f32 to vector<8x32xf32>
    %667 = arith.addf %666, %665 : vector<8x32xf32>
    %668 = arith.divf %666, %667 : vector<8x32xf32>
    %669 = vector.extract_strided_slice %656 {offsets = [0, 64], sizes = [8, 32], strides = [1, 1]} : vector<8x128xf32> to vector<8x32xf32>
    %670 = math.tanh %669 : vector<8x32xf32>
    %671 = vector.extract_strided_slice %656 {offsets = [0, 96], sizes = [8, 32], strides = [1, 1]} : vector<8x128xf32> to vector<8x32xf32>
    %672 = arith.negf %671 : vector<8x32xf32>
    %673 = math.exp %672 : vector<8x32xf32>
    %cst_140 = arith.constant 1.000000e+00 : f32
    %674 = vector.broadcast %cst_140 : f32 to vector<8x32xf32>
    %675 = arith.addf %674, %673 : vector<8x32xf32>
    %676 = arith.divf %674, %675 : vector<8x32xf32>
    %677 = arith.mulf %668, %649 : vector<8x32xf32>
    %678 = arith.mulf %662, %670 : vector<8x32xf32>
    %679 = arith.addf %677, %678 : vector<8x32xf32>
    %680 = math.tanh %679 : vector<8x32xf32>
    %681 = arith.mulf %676, %680 : vector<8x32xf32>
    %682 = arith.truncf %681 : vector<8x32xf32> to vector<8x32xbf16>
    %683 = vector.extract_strided_slice %526 {offsets = [40, 0], sizes = [8, 128], strides = [1, 1]} : vector<64x128xf32> to vector<8x128xf32>
    %684 = arith.truncf %681 : vector<8x32xf32> to vector<8x32xbf16>
    %cst_141 = arith.constant dense<0.000000e+00> : vector<8x128xf32>
    %685 = tpu.matmul %684, %528, %cst_141 {dimension_numbers = #tpu.dot_dimension_numbers<[1], [0], [0], [1], [0, 0, 1, 1], [], []>} : vector<8x32xbf16>, vector<32x128xbf16>, vector<8x128xf32> -> vector<8x128xf32>
    %686 = arith.addf %683, %685 : vector<8x128xf32>
    %687 = vector.extract_strided_slice %686 {offsets = [0, 0], sizes = [8, 32], strides = [1, 1]} : vector<8x128xf32> to vector<8x32xf32>
    %688 = arith.negf %687 : vector<8x32xf32>
    %689 = math.exp %688 : vector<8x32xf32>
    %cst_142 = arith.constant 1.000000e+00 : f32
    %690 = vector.broadcast %cst_142 : f32 to vector<8x32xf32>
    %691 = arith.addf %690, %689 : vector<8x32xf32>
    %692 = arith.divf %690, %691 : vector<8x32xf32>
    %693 = vector.extract_strided_slice %686 {offsets = [0, 32], sizes = [8, 32], strides = [1, 1]} : vector<8x128xf32> to vector<8x32xf32>
    %694 = arith.negf %693 : vector<8x32xf32>
    %695 = math.exp %694 : vector<8x32xf32>
    %cst_143 = arith.constant 1.000000e+00 : f32
    %696 = vector.broadcast %cst_143 : f32 to vector<8x32xf32>
    %697 = arith.addf %696, %695 : vector<8x32xf32>
    %698 = arith.divf %696, %697 : vector<8x32xf32>
    %699 = vector.extract_strided_slice %686 {offsets = [0, 64], sizes = [8, 32], strides = [1, 1]} : vector<8x128xf32> to vector<8x32xf32>
    %700 = math.tanh %699 : vector<8x32xf32>
    %701 = vector.extract_strided_slice %686 {offsets = [0, 96], sizes = [8, 32], strides = [1, 1]} : vector<8x128xf32> to vector<8x32xf32>
    %702 = arith.negf %701 : vector<8x32xf32>
    %703 = math.exp %702 : vector<8x32xf32>
    %cst_144 = arith.constant 1.000000e+00 : f32
    %704 = vector.broadcast %cst_144 : f32 to vector<8x32xf32>
    %705 = arith.addf %704, %703 : vector<8x32xf32>
    %706 = arith.divf %704, %705 : vector<8x32xf32>
    %707 = arith.mulf %698, %679 : vector<8x32xf32>
    %708 = arith.mulf %692, %700 : vector<8x32xf32>
    %709 = arith.addf %707, %708 : vector<8x32xf32>
    %710 = math.tanh %709 : vector<8x32xf32>
    %711 = arith.mulf %706, %710 : vector<8x32xf32>
    %712 = arith.truncf %711 : vector<8x32xf32> to vector<8x32xbf16>
    %713 = vector.extract_strided_slice %526 {offsets = [48, 0], sizes = [8, 128], strides = [1, 1]} : vector<64x128xf32> to vector<8x128xf32>
    %714 = arith.truncf %711 : vector<8x32xf32> to vector<8x32xbf16>
    %cst_145 = arith.constant dense<0.000000e+00> : vector<8x128xf32>
    %715 = tpu.matmul %714, %528, %cst_145 {dimension_numbers = #tpu.dot_dimension_numbers<[1], [0], [0], [1], [0, 0, 1, 1], [], []>} : vector<8x32xbf16>, vector<32x128xbf16>, vector<8x128xf32> -> vector<8x128xf32>
    %716 = arith.addf %713, %715 : vector<8x128xf32>
    %717 = vector.extract_strided_slice %716 {offsets = [0, 0], sizes = [8, 32], strides = [1, 1]} : vector<8x128xf32> to vector<8x32xf32>
    %718 = arith.negf %717 : vector<8x32xf32>
    %719 = math.exp %718 : vector<8x32xf32>
    %cst_146 = arith.constant 1.000000e+00 : f32
    %720 = vector.broadcast %cst_146 : f32 to vector<8x32xf32>
    %721 = arith.addf %720, %719 : vector<8x32xf32>
    %722 = arith.divf %720, %721 : vector<8x32xf32>
    %723 = vector.extract_strided_slice %716 {offsets = [0, 32], sizes = [8, 32], strides = [1, 1]} : vector<8x128xf32> to vector<8x32xf32>
    %724 = arith.negf %723 : vector<8x32xf32>
    %725 = math.exp %724 : vector<8x32xf32>
    %cst_147 = arith.constant 1.000000e+00 : f32
    %726 = vector.broadcast %cst_147 : f32 to vector<8x32xf32>
    %727 = arith.addf %726, %725 : vector<8x32xf32>
    %728 = arith.divf %726, %727 : vector<8x32xf32>
    %729 = vector.extract_strided_slice %716 {offsets = [0, 64], sizes = [8, 32], strides = [1, 1]} : vector<8x128xf32> to vector<8x32xf32>
    %730 = math.tanh %729 : vector<8x32xf32>
    %731 = vector.extract_strided_slice %716 {offsets = [0, 96], sizes = [8, 32], strides = [1, 1]} : vector<8x128xf32> to vector<8x32xf32>
    %732 = arith.negf %731 : vector<8x32xf32>
    %733 = math.exp %732 : vector<8x32xf32>
    %cst_148 = arith.constant 1.000000e+00 : f32
    %734 = vector.broadcast %cst_148 : f32 to vector<8x32xf32>
    %735 = arith.addf %734, %733 : vector<8x32xf32>
    %736 = arith.divf %734, %735 : vector<8x32xf32>
    %737 = arith.mulf %728, %709 : vector<8x32xf32>
    %738 = arith.mulf %722, %730 : vector<8x32xf32>
    %739 = arith.addf %737, %738 : vector<8x32xf32>
    %740 = math.tanh %739 : vector<8x32xf32>
    %741 = arith.mulf %736, %740 : vector<8x32xf32>
    %742 = arith.truncf %741 : vector<8x32xf32> to vector<8x32xbf16>
    %743 = vector.extract_strided_slice %526 {offsets = [56, 0], sizes = [8, 128], strides = [1, 1]} : vector<64x128xf32> to vector<8x128xf32>
    %744 = arith.truncf %741 : vector<8x32xf32> to vector<8x32xbf16>
    %cst_149 = arith.constant dense<0.000000e+00> : vector<8x128xf32>
    %745 = tpu.matmul %744, %528, %cst_149 {dimension_numbers = #tpu.dot_dimension_numbers<[1], [0], [0], [1], [0, 0, 1, 1], [], []>} : vector<8x32xbf16>, vector<32x128xbf16>, vector<8x128xf32> -> vector<8x128xf32>
    %746 = arith.addf %743, %745 : vector<8x128xf32>
    %747 = vector.extract_strided_slice %746 {offsets = [0, 0], sizes = [8, 32], strides = [1, 1]} : vector<8x128xf32> to vector<8x32xf32>
    %748 = arith.negf %747 : vector<8x32xf32>
    %749 = math.exp %748 : vector<8x32xf32>
    %cst_150 = arith.constant 1.000000e+00 : f32
    %750 = vector.broadcast %cst_150 : f32 to vector<8x32xf32>
    %751 = arith.addf %750, %749 : vector<8x32xf32>
    %752 = arith.divf %750, %751 : vector<8x32xf32>
    %753 = vector.extract_strided_slice %746 {offsets = [0, 32], sizes = [8, 32], strides = [1, 1]} : vector<8x128xf32> to vector<8x32xf32>
    %754 = arith.negf %753 : vector<8x32xf32>
    %755 = math.exp %754 : vector<8x32xf32>
    %cst_151 = arith.constant 1.000000e+00 : f32
    %756 = vector.broadcast %cst_151 : f32 to vector<8x32xf32>
    %757 = arith.addf %756, %755 : vector<8x32xf32>
    %758 = arith.divf %756, %757 : vector<8x32xf32>
    %759 = vector.extract_strided_slice %746 {offsets = [0, 64], sizes = [8, 32], strides = [1, 1]} : vector<8x128xf32> to vector<8x32xf32>
    %760 = math.tanh %759 : vector<8x32xf32>
    %761 = vector.extract_strided_slice %746 {offsets = [0, 96], sizes = [8, 32], strides = [1, 1]} : vector<8x128xf32> to vector<8x32xf32>
    %762 = arith.negf %761 : vector<8x32xf32>
    %763 = math.exp %762 : vector<8x32xf32>
    %cst_152 = arith.constant 1.000000e+00 : f32
    %764 = vector.broadcast %cst_152 : f32 to vector<8x32xf32>
    %765 = arith.addf %764, %763 : vector<8x32xf32>
    %766 = arith.divf %764, %765 : vector<8x32xf32>
    %767 = arith.mulf %758, %739 : vector<8x32xf32>
    %768 = arith.mulf %752, %760 : vector<8x32xf32>
    %769 = arith.addf %767, %768 : vector<8x32xf32>
    %770 = math.tanh %769 : vector<8x32xf32>
    %771 = arith.mulf %766, %770 : vector<8x32xf32>
    %772 = arith.truncf %771 : vector<8x32xf32> to vector<8x32xbf16>
    %c2_153 = arith.constant 2 : index
    %c0_154 = arith.constant 0 : index
    %c0_155 = arith.constant 0 : index
    %773 = vector.load %arg18[%c2_153, %c0_154, %c0_155] : memref<3x8x32xf32, #tpu.memory_space<vmem>>, vector<1x8x32xf32>
    %774 = vector.shape_cast %773 : vector<1x8x32xf32> to vector<8x32xf32>
    %775 = vector.shape_cast %771 : vector<8x32xf32> to vector<1x8x32xf32>
    tpu.vector_store %arg18[%c2_153, %c0_154, %c0_155], %775 {strides = array<i32>} : memref<3x8x32xf32, #tpu.memory_space<vmem>>, vector<1x8x32xf32>,
    %c2_156 = arith.constant 2 : index
    %c0_157 = arith.constant 0 : index
    %c0_158 = arith.constant 0 : index
    %776 = vector.load %arg19[%c2_156, %c0_157, %c0_158] : memref<3x8x32xf32, #tpu.memory_space<vmem>>, vector<1x8x32xf32>
    %777 = vector.shape_cast %776 : vector<1x8x32xf32> to vector<8x32xf32>
    %778 = vector.shape_cast %769 : vector<8x32xf32> to vector<1x8x32xf32>
    tpu.vector_store %arg19[%c2_156, %c0_157, %c0_158], %778 {strides = array<i32>} : memref<3x8x32xf32, #tpu.memory_space<vmem>>, vector<1x8x32xf32>,
    %779 = tpu.concatenate %562, %592, %622, %652, %682, %712, %742, %772 in 0 : vector<8x32xbf16>, vector<8x32xbf16>, vector<8x32xbf16>, vector<8x32xbf16>, vector<8x32xbf16>, vector<8x32xbf16>, vector<8x32xbf16>, vector<8x32xbf16> -> vector<64x32xbf16>
    %c0_159 = arith.constant 0 : index
    %c0_160 = arith.constant 0 : index
    %780 = vector.load %arg8[%c0_159, %c0_160] : memref<32x16xbf16, #tpu.memory_space<vmem>>, vector<32x16xbf16>
    %cst_161 = arith.constant dense<0.000000e+00> : vector<64x16xf32>
    %781 = tpu.matmul %779, %780, %cst_161 {dimension_numbers = #tpu.dot_dimension_numbers<[1], [0], [0], [1], [0, 0, 1, 1], [], []>} : vector<64x32xbf16>, vector<32x16xbf16>, vector<64x16xf32> -> vector<64x16xf32>
    %c0_162 = arith.constant 0 : index
    %c0_163 = arith.constant 0 : index
    %782 = vector.load %arg9[%c0_162, %c0_163] : memref<1x16xf32, #tpu.memory_space<vmem>>, vector<1x16xf32>
    %783 = vector.broadcast %782 : vector<1x16xf32> to vector<64x16xf32>
    %784 = arith.addf %781, %783 : vector<64x16xf32>
    %785 = arith.negf %784 : vector<64x16xf32>
    %786 = math.exp %785 : vector<64x16xf32>
    %cst_164 = arith.constant 1.000000e+00 : f32
    %787 = vector.broadcast %cst_164 : f32 to vector<64x16xf32>
    %788 = arith.addf %787, %786 : vector<64x16xf32>
    %789 = arith.divf %787, %788 : vector<64x16xf32>
    %c0_165 = arith.constant 0 : index
    %c0_166 = arith.constant 0 : index
    %790 = vector.load %arg10[%c0_165, %c0_166] : memref<32x16xbf16, #tpu.memory_space<vmem>>, vector<32x16xbf16>
    %cst_167 = arith.constant dense<0.000000e+00> : vector<64x16xf32>
    %791 = tpu.matmul %779, %790, %cst_167 {dimension_numbers = #tpu.dot_dimension_numbers<[1], [0], [0], [1], [0, 0, 1, 1], [], []>} : vector<64x32xbf16>, vector<32x16xbf16>, vector<64x16xf32> -> vector<64x16xf32>
    %c0_168 = arith.constant 0 : index
    %c0_169 = arith.constant 0 : index
    %792 = vector.load %arg11[%c0_168, %c0_169] : memref<1x16xf32, #tpu.memory_space<vmem>>, vector<1x16xf32>
    %793 = vector.broadcast %792 : vector<1x16xf32> to vector<64x16xf32>
    %794 = arith.addf %791, %793 : vector<64x16xf32>
    %795 = arith.negf %794 : vector<64x16xf32>
    %796 = math.exp %795 : vector<64x16xf32>
    %cst_170 = arith.constant 1.000000e+00 : f32
    %797 = vector.broadcast %cst_170 : f32 to vector<64x16xf32>
    %798 = arith.addf %797, %796 : vector<64x16xf32>
    %799 = arith.divf %797, %798 : vector<64x16xf32>
    %800 = arith.truncf %789 : vector<64x16xf32> to vector<64x16xbf16>
    %c0_171 = arith.constant 0 : index
    %c0_172 = arith.constant 0 : index
    %801 = vector.load %arg12[%c0_171, %c0_172] : memref<16x128xbf16, #tpu.memory_space<vmem>>, vector<16x128xbf16>
    %cst_173 = arith.constant dense<0.000000e+00> : vector<64x128xf32>
    %802 = tpu.matmul %800, %801, %cst_173 {dimension_numbers = #tpu.dot_dimension_numbers<[1], [0], [0], [1], [0, 0, 1, 1], [], []>} : vector<64x16xbf16>, vector<16x128xbf16>, vector<64x128xf32> -> vector<64x128xf32>
    %c0_174 = arith.constant 0 : index
    %c0_175 = arith.constant 0 : index
    %803 = vector.load %arg13[%c0_174, %c0_175] : memref<1x128xf32, #tpu.memory_space<vmem>>, vector<1x128xf32>
    %804 = vector.broadcast %803 : vector<1x128xf32> to vector<64x128xf32>
    %805 = arith.addf %802, %804 : vector<64x128xf32>
    %c0_176 = arith.constant 0 : index
    %c0_177 = arith.constant 0 : index
    %806 = vector.load %arg16[%c0_176, %c0_177] : memref<64x128xf32, #tpu.memory_space<vmem>>, vector<64x128xf32>
    tpu.vector_store %arg16[%c0_176, %c0_177], %805 {strides = array<i32>} : memref<64x128xf32, #tpu.memory_space<vmem>>, vector<64x128xf32>,
    %807 = arith.truncf %799 : vector<64x16xf32> to vector<64x16xbf16>
    %c0_178 = arith.constant 0 : index
    %c0_179 = arith.constant 0 : index
    %808 = vector.load %arg14[%c0_178, %c0_179] : memref<16x128xbf16, #tpu.memory_space<vmem>>, vector<16x128xbf16>
    %cst_180 = arith.constant dense<0.000000e+00> : vector<64x128xf32>
    %809 = tpu.matmul %807, %808, %cst_180 {dimension_numbers = #tpu.dot_dimension_numbers<[1], [0], [0], [1], [0, 0, 1, 1], [], []>} : vector<64x16xbf16>, vector<16x128xbf16>, vector<64x128xf32> -> vector<64x128xf32>
    %c0_181 = arith.constant 0 : index
    %c0_182 = arith.constant 0 : index
    %810 = vector.load %arg15[%c0_181, %c0_182] : memref<1x128xf32, #tpu.memory_space<vmem>>, vector<1x128xf32>
    %811 = vector.broadcast %810 : vector<1x128xf32> to vector<64x128xf32>
    %812 = arith.addf %809, %811 : vector<64x128xf32>
    %c0_183 = arith.constant 0 : index
    %c0_184 = arith.constant 0 : index
    %813 = vector.load %arg17[%c0_183, %c0_184] : memref<64x128xf32, #tpu.memory_space<vmem>>, vector<64x128xf32>
    tpu.vector_store %arg17[%c0_183, %c0_184], %812 {strides = array<i32>} : memref<64x128xf32, #tpu.memory_space<vmem>>, vector<64x128xf32>,
    return
  }
  func.func @transform_0(%arg0: i32) -> (i32, i32) {
    %c0_i32 = arith.constant 0 : i32
    %c0_i32_0 = arith.constant 0 : i32
    %c0_i32_1 = arith.constant 0 : i32
    return %c0_i32, %c0_i32_0 : i32, i32
  }
  func.func @transform_1(%arg0: i32) -> (i32, i32, i32) {
    %c0_i32 = arith.constant 0 : i32
    %c0_i32_0 = arith.constant 0 : i32
    %c0_i32_1 = arith.constant 0 : i32
    %c0_i32_2 = arith.constant 0 : i32
    return %c0_i32, %c0_i32_0, %c0_i32_1 : i32, i32, i32
  }
  func.func @transform_2(%arg0: i32) -> (i32, i32, i32) {
    %c0_i32 = arith.constant 0 : i32
    %c0_i32_0 = arith.constant 0 : i32
    %c0_i32_1 = arith.constant 0 : i32
    %c0_i32_2 = arith.constant 0 : i32
    return %c0_i32, %c0_i32_0, %c0_i32_1 : i32, i32, i32
  }
  func.func @transform_3(%arg0: i32) -> (i32, i32) {
    %c0_i32 = arith.constant 0 : i32
    %c0_i32_0 = arith.constant 0 : i32
    %c0_i32_1 = arith.constant 0 : i32
    return %c0_i32, %c0_i32_0 : i32, i32
  }
  func.func @transform_4(%arg0: i32) -> (i32, i32, i32) {
    %c0_i32 = arith.constant 0 : i32
    %c0_i32_0 = arith.constant 0 : i32
    %c0_i32_1 = arith.constant 0 : i32
    %c0_i32_2 = arith.constant 0 : i32
    return %c0_i32, %c0_i32_0, %c0_i32_1 : i32, i32, i32
  }
  func.func @transform_5(%arg0: i32) -> (i32, i32, i32) {
    %c0_i32 = arith.constant 0 : i32
    %c0_i32_0 = arith.constant 0 : i32
    %c0_i32_1 = arith.constant 0 : i32
    %c0_i32_2 = arith.constant 0 : i32
    return %c0_i32, %c0_i32_0, %c0_i32_1 : i32, i32, i32
  }
  func.func @transform_6(%arg0: i32) -> (i32, i32, i32) {
    %c0_i32 = arith.constant 0 : i32
    %c0_i32_0 = arith.constant 0 : i32
    %c0_i32_1 = arith.constant 0 : i32
    %c0_i32_2 = arith.constant 0 : i32
    return %c0_i32, %c0_i32_0, %c0_i32_1 : i32, i32, i32
  }
  func.func @transform_7(%arg0: i32) -> (i32, i32) {
    %c0_i32 = arith.constant 0 : i32
    %c0_i32_0 = arith.constant 0 : i32
    %c0_i32_1 = arith.constant 0 : i32
    return %c0_i32, %c0_i32_0 : i32, i32
  }
  func.func @transform_8(%arg0: i32) -> (i32, i32) {
    %c0_i32 = arith.constant 0 : i32
    %c0_i32_0 = arith.constant 0 : i32
    %c0_i32_1 = arith.constant 0 : i32
    return %c0_i32, %c0_i32_0 : i32, i32
  }
  func.func @transform_9(%arg0: i32) -> (i32, i32) {
    %c0_i32 = arith.constant 0 : i32
    %c0_i32_0 = arith.constant 0 : i32
    %c0_i32_1 = arith.constant 0 : i32
    return %c0_i32, %c0_i32_0 : i32, i32
  }
  func.func @transform_10(%arg0: i32) -> (i32, i32) {
    %c0_i32 = arith.constant 0 : i32
    %c0_i32_0 = arith.constant 0 : i32
    %c0_i32_1 = arith.constant 0 : i32
    return %c0_i32, %c0_i32_0 : i32, i32
  }
  func.func @transform_11(%arg0: i32) -> (i32, i32) {
    %c0_i32 = arith.constant 0 : i32
    %c0_i32_0 = arith.constant 0 : i32
    %c0_i32_1 = arith.constant 0 : i32
    return %c0_i32, %c0_i32_0 : i32, i32
  }
  func.func @transform_12(%arg0: i32) -> (i32, i32) {
    %c0_i32 = arith.constant 0 : i32
    %c0_i32_0 = arith.constant 0 : i32
    %c0_i32_1 = arith.constant 0 : i32
    return %c0_i32, %c0_i32_0 : i32, i32
  }
  func.func @transform_13(%arg0: i32) -> (i32, i32) {
    %c0_i32 = arith.constant 0 : i32
    %c0_i32_0 = arith.constant 0 : i32
    %c0_i32_1 = arith.constant 0 : i32
    return %c0_i32, %c0_i32_0 : i32, i32
  }
  func.func @transform_14(%arg0: i32) -> (i32, i32) {
    %c0_i32 = arith.constant 0 : i32
    %c0_i32_0 = arith.constant 0 : i32
    %c0_i32_1 = arith.constant 0 : i32
    return %c0_i32, %c0_i32_0 : i32, i32
  }
  func.func @transform_15(%arg0: i32) -> (i32, i32) {
    %c0_i32 = arith.constant 0 : i32
    %c0_i32_0 = arith.constant 0 : i32
    %c0_i32_1 = arith.constant 0 : i32
    return %c0_i32, %c0_i32_0 : i32, i32
  }
  func.func @transform_16(%arg0: i32) -> (i32, i32) {
    %c0_i32 = arith.constant 0 : i32
    %c0_i32_0 = arith.constant 0 : i32
    %c0_i32_1 = arith.constant 0 : i32
    return %c0_i32, %c0_i32_0 : i32, i32
  }
  func.func @transform_17(%arg0: i32) -> (i32, i32, i32) {
    %c0_i32 = arith.constant 0 : i32
    %c0_i32_0 = arith.constant 0 : i32
    %c0_i32_1 = arith.constant 0 : i32
    %c0_i32_2 = arith.constant 0 : i32
    return %c0_i32, %c0_i32_0, %c0_i32_1 : i32, i32, i32
  }
  func.func @transform_18(%arg0: i32) -> (i32, i32, i32) {
    %c0_i32 = arith.constant 0 : i32
    %c0_i32_0 = arith.constant 0 : i32
    %c0_i32_1 = arith.constant 0 : i32
    %c0_i32_2 = arith.constant 0 : i32
    return %c0_i32, %c0_i32_0, %c0_i32_1 : i32, i32, i32
  }
}

</mosaic_0001>

<bundles_post_ra>
// kernel: tpu_custom_call.1
= control target key start
LH: loop header
LB: loop body
LE: loop exit
PB: predicated region body
PF: predicated region fallthrough
CT: control target
= control target key end

     0   :  { %s4786_s0 = inlined_call_operand.vmem [shape: bf16[64,48], index: 0, kind: input, shape index: {}]   ;;  %s4787_s1 = inlined_call_operand.vmem [shape: f32[3,8,32], index: 1, kind: input, shape index: {}]   ;;  %s4788_s2 = inlined_call_operand.hbm [shape: f32[3,8,32], index: 2, kind: input, shape index: {}]   ;;  %s4789_s3 = inlined_call_operand.hbm [shape: bf16[48,128], index: 3, kind: input, shape index: {}]   ;;  %s4790_s4 = inlined_call_operand.vmem [shape: bf16[2,32,128], index: 4, kind: input, shape index: {}]   ;;  %s4791_s5 = inlined_call_operand.vmem [shape: bf16[3,32,128], index: 5, kind: input, shape index: {}]   ;;  %s4792_s6 = inlined_call_operand.hbm [shape: f32[3,1,128], index: 6, kind: input, shape index: {}]   ;;  %s4793_s7 = inlined_call_operand.vmem [shape: bf16[32,16], index: 7, kind: input, shape index: {}]   ;;  %s4794_s8 = inlined_call_operand.hbm [shape: f32[1,16], index: 8, kind: input, shape index: {}]   ;;  %s4795_s9 = inlined_call_operand.vmem [shape: bf16[32,16], index: 9, kind: input, shape index: {}]   ;;  %s4796_s10 = inlined_call_operand.vmem [shape: f32[1,16], index: 10, kind: input, shape index: {}]   ;;  %s4797_s11 = inlined_call_operand.hbm [shape: bf16[16,128], index: 11, kind: input, shape index: {}]   ;;  %s4798_s12 = inlined_call_operand.vmem [shape: f32[1,128], index: 12, kind: input, shape index: {}]   ;;  %s4799_s13 = inlined_call_operand.hbm [shape: bf16[16,128], index: 13, kind: input, shape index: {}]   ;;  %s4800_s14 = inlined_call_operand.vmem [shape: f32[1,128], index: 14, kind: input, shape index: {}]   ;;  %s4801_s15 = inlined_call_operand.hbm [shape: f32[64,128], index: 15, kind: output, shape index: {0}]   ;;  %s4802_s16 = inlined_call_operand.hbm [shape: f32[64,128], index: 16, kind: output, shape index: {1}]   ;;  %s4803_s17 = inlined_call_operand.hbm [shape: f32[3,8,32], index: 17, kind: output, shape index: {2}]   ;;  %s4804_s18 = inlined_call_operand.hbm [shape: f32[3,8,32], index: 18, kind: output, shape index: {3}]  }
   0x1   :  { %4807 = sst [smem:[#allocation26_spill]] %s4786_s0 }
   0x2   :  { %4808 = sst [smem:[#allocation27_spill]] %s4787_s1 }
   0x3   :  { %4809 = sst [smem:[#allocation28_spill]] %s4788_s2 }
   0x4   :  { %24 = vsyncpa [#allocation3], 0 }
   0x5   :  { %25 = vsyncpa [#allocation6], 0 }
   0x6   :  { %26 = vsyncpa [#allocation9], 0 }
   0x7   :  { %27 = vsyncpa [#allocation12], 0 }
   0x8   :  { %28 = vsyncpa [#allocation4], 0 }
   0x9   :  { %29 = vsyncpa [#allocation15], 0 }
   0xa   :  { %30 = vsyncpa [#allocation18], 0  ;;  %s3991_s27 = smov [#allocation5]  }
   0xb   :  { %s52_s28 = sshll.u32 %s3991_s27, 4  ;;  %s53_s28 = int_to_ptr.vmem [resolvable:$true] %s52_s28 }
   0xc   :  { %s3785_s29 = scalar_lea.vmem %s53_s28, 384  ;;  %p3790_p1 = scmp.lt.s32.totalorder %s53_s28, %s53_s28 }
   0xd   :  { %p3786_p0 = scmp.ne.s32.totalorder %s53_s28, %s3785_s29  ;;  %p3791_p2 = scmp.lt.s32.totalorder %s3785_s29, %s3785_s29 }
   0xf   :  { %p3792_p3 = por %p3791_p2, %p3790_p1 }
  0x11   :  { %p3793_p4 = pnand %p3792_p3, %p3786_p0 }
  0x13   :  { %3796 = shalt.err (!%p3793_p4)
}
  0x14   :  { %s3992_s30 = smov 64   ;;  %s3993_s0 = smov 4  }
  0x15   :  { %58 = dma.hbm_to_vmem [thread:$0]  %s4789_s3, 384, %s53_s28, [#allocation6], %s3992_s30, %s3992_s30, %s3993_s0  }
  0x16   :  { %s3994_s20 = smov [#allocation8]   ;;  %s3995_s22 = smov [#allocation2]  }
  0x17   :  { %s83_s21 = sshll.u32 %s3994_s20, 4  ;;  %s40_s2 = sshll.u32 %s3995_s22, 4  ;;  %s84_s21 = int_to_ptr.vmem [resolvable:$true] %s83_s21  ;;  %s41_s2 = int_to_ptr.vmem [resolvable:$true] %s40_s2 }
  0x18   :  { %s3805_s23 = scalar_lea.vmem %s84_s21, 16  ;;  %s3809_s24 = scalar_lea.vmem %s84_s21, 32 }
  0x19   :  { %p3806_p5 = scmp.ne.s32.totalorder %s84_s21, %s3805_s23  ;;  %p3810_p6 = scmp.lt.s32.totalorder %s84_s21, %s84_s21 }
  0x1a   :  { %p3811_p7 = scmp.lt.s32.totalorder %s3809_s24, %s3805_s23 }
  0x1c   :  { %p3812_p8 = por %p3811_p7, %p3810_p6 }
  0x1e   :  { %p3813_p9 = pnand %p3812_p8, %p3806_p5 }
  0x20   :  { %3816 = shalt.err (!%p3813_p9)
}
  0x21   :  { %86 = dma.hbm_to_vmem [thread:$0]  %s4794_s8, 16, %s84_s21, [#allocation9]  }
  0x22   :  { %s3825_s27 = scalar_lea.vmem %s41_s2, 384  ;;  %p3830_p11 = scmp.lt.s32.totalorder %s41_s2, %s41_s2 }
  0x23   :  { %p3826_p10 = scmp.ne.s32.totalorder %s41_s2, %s3825_s27  ;;  %p3831_p12 = scmp.lt.s32.totalorder %s3825_s27, %s3825_s27 }
  0x25   :  { %p3832_p13 = por %p3831_p12, %p3830_p11 }
  0x27   :  { %p3833_p0 = pnand %p3832_p13, %p3826_p10 }
  0x29   :  { %3836 = shalt.err (!%p3833_p0)
}
  0x2a   :  { %s3996_s3 = smov 128   ;;  %s3997_s28 = smov 8  }
  0x2b   :  { %s4810_s1 = sld [smem:[#allocation28_spill]]  ;;  %s3998_s20 = smov [#allocation7]  }
  0x2c   :  { %s68_s22 = sshll.u32 %s3998_s20, 4  ;;  %s69_s22 = int_to_ptr.vmem [resolvable:$true] %s68_s22 }
  0x2d   :  { %s3845_s8 = scalar_lea.vmem %s69_s22, 48  ;;  %s3849_s21 = scalar_lea.vmem %s69_s22, 64 }
  0x2e   :  { %p3846_p1 = scmp.ne.s32.totalorder %s69_s22, %s3845_s8  ;;  %p3850_p2 = scmp.lt.s32.totalorder %s69_s22, %s69_s22 }
  0x2f   :  { %p3851_p3 = scmp.lt.s32.totalorder %s3849_s21, %s3845_s8 }
  0x31   :  { %46 = dma.hbm_to_vmem [thread:$0]  %s4810_s1, 384, %s41_s2, [#allocation3], %s3996_s3, %s3996_s3, %s3997_s28  }
  0x32   :  { %p3852_p4 = por %p3851_p3, %p3850_p2 }
  0x34   :  { %p3853_p5 = pnand %p3852_p4, %p3846_p1 }
  0x36   :  { %3856 = shalt.err (!%p3853_p5)
}
  0x37   :  { %s3999_s23 = smov 16   ;;  %s4000_s24 = smov 1  }
  0x38   :  { %74 = dma.hbm_to_vmem [thread:$0]  %s4792_s6, 48, %s69_s22, [#allocation6], %s3999_s23, %s3999_s23, %s4000_s24  }
  0x39   :  { %s4001_s27 = smov [#allocation10]   ;;  %s4002_s2 = smov [#allocation11]  }
  0x3a   :  { %s96_s29 = sshll.u32 %s4001_s27, 4  ;;  %s110_s19 = sshll.u32 %s4002_s2, 4  ;;  %s97_s29 = int_to_ptr.vmem [resolvable:$true] %s96_s29  ;;  %s111_s19 = int_to_ptr.vmem [resolvable:$true] %s110_s19 }
  0x3b   :  { %s3865_s1 = scalar_lea.vmem %s97_s29, 128  ;;  %p3870_p7 = scmp.lt.s32.totalorder %s97_s29, %s97_s29 }
  0x3c   :  { %p3866_p6 = scmp.ne.s32.totalorder %s97_s29, %s3865_s1  ;;  %p3871_p8 = scmp.lt.s32.totalorder %s3865_s1, %s3865_s1 }
  0x3e   :  { %p3872_p9 = por %p3871_p8, %p3870_p7 }
  0x40   :  { %p3873_p10 = pnand %p3872_p9, %p3866_p6 }
  0x42   :  { %3876 = shalt.err (!%p3873_p10)
}
  0x43   :  { %102 = dma.hbm_to_vmem [thread:$0]  %s4797_s11, 128, %s97_s29, [#allocation9], %s3992_s30, %s3992_s30, %s3993_s0  }
  0x44   :  { %s3885_s6 = scalar_lea.vmem %s111_s19, 128  ;;  %p3890_p12 = scmp.lt.s32.totalorder %s111_s19, %s111_s19 }
  0x45   :  { %p3886_p11 = scmp.ne.s32.totalorder %s111_s19, %s3885_s6  ;;  %p3891_p13 = scmp.lt.s32.totalorder %s3885_s6, %s3885_s6 }
  0x47   :  { %p3892_p0 = por %p3891_p13, %p3890_p12 }
  0x49   :  { %p3893_p1 = pnand %p3892_p0, %p3886_p11 }
  0x4b   :  { %3896 = shalt.err (!%p3893_p1)
}
  0x4c   :  { %116 = dma.hbm_to_vmem [thread:$0]  %s4799_s13, 128, %s111_s19, [#allocation12], %s3992_s30, %s3992_s30, %s3993_s0  }
  0x4d   :  { %3977 = dma.done.wait [#allocation3], 384  }
  0x4e   :  { %3978 = vsyncadd [#allocation3], 4294966912 }
  0x4f   :  { %3979 = dma.done.wait [#allocation6], 432  }
  0x50   :  { %3980 = vsyncadd [#allocation6], 4294966864 }
  0x51   :  { %3981 = dma.done.wait [#allocation9], 144  }
  0x52   :  { %3982 = vsyncadd [#allocation9], 4294967152 }
  0x53   :  { %3983 = dma.done.wait [#allocation12], 128  }
  0x54   :  { %3984 = vsyncadd [#allocation12], 4294967168  ;;  %v4003_v0 = vmov 0.0   ;;  %vm4004_vm0 = vmmov 0   ;;  %v3498_v1 = vld [vmem:[#allocation5 + $0x10] sm:$0xff]   ;;  %v3500_v3 = vld [vmem:[#allocation5 + $0x8] sm:$0xff]  }
  0x55   :  { %3218 = vmatprep.subr.bf16.mxu1 %v4003_v0  ;;  %3222 = vmatprep.mubr.msk.bf16.mxu1 %vm4004_vm0, %v4003_v0  ;;  %v4142_v2 = vld [vmem:[%s4791_s5 + $0x8] sm:$0xff]   ;;  %v4148_v4 = vld [vmem:[%s4791_s5] sm:$0xff]   ;;  %v3502_v5 = vld [vmem:[#allocation5] sm:$0xff]   ;;  %s4811_s26 = sld [smem:[#allocation27_spill]]  ;;  %vm197_vm1 = vcmask 392192   ;;  %vm294_vm2 = vcmask 261120  }
  0x56   :  { %3204 = vmatprep.subr.bf16.mxu0 %v3498_v1  ;;  %3219 = vmatpush3.bf16.msra.mxu1 %v4142_v2  ;;  %s4812_s2 = sld [smem:[#allocation26_spill]]  ;;  %v4178_v14 = vld [vmem:[#allocation7] ss:$0 sm:$0xff]  ;;  %v280_v20 = vld [vmem:[#allocation2] sm:$0xff]  ;;  %s4005_s20 = smov 32   ;;  %vm887_vm3 = vcmask 1043456  }
  0x57   :  { %3205 = vmatpush3.bf16.msra.mxu0 %v3498_v1  ;;  %3220 = vmatprep.subr.bf16.mxu1 %v4003_v0  ;;  %vm2698_vm4 = vcmask 130048   ;;  %s4007_s6 = smov [#allocation17]  }
  0x58   :  { %3206 = vmatprep.subr.bf16.mxu0 %v3500_v3  ;;  %s2929_s22 = sshll.u32 %s4007_s6, 4  ;;  %s2930_s22 = int_to_ptr.vmem [resolvable:$true] %s2929_s22 }
  0x59   :  { %p3902_p3 = scmp.lt.s32.totalorder %s2930_s22, %s2930_s22 }
  0x5a   :  { %3221 = vmatpush3.bf16.msra.mxu1 %v4148_v4 }
  0x5b   :  { %v279_v6 = vld [vmem:[%s4811_s26] sm:$0xff]  ;;  %3207 = vmatpush3.bf16.msra.mxu0 %v3500_v3  ;;  %3226 = vmatprep.subr.bf16.mxu1 %v4003_v0 }
  0x5c   :  { %v281_v7 = vpack.c.bf16 %v279_v6, %v279_v6  ;;  %v3503_v8 = vld [vmem:[%s4812_s2] sm:$0xff]   ;;  %3208 = vmatprep.subr.bf16.mxu0 %v3502_v5  ;;  %v3504_v9 = vld [vmem:[%s4812_s2 + $0x8] sm:$0xff]  }
  0x5d   :  { %3210 = vmatprep.mubr.msk.bf16.mxu0 %vm197_vm1, %v3503_v8 }
  0x5e   :  { %3223 = vmatmul.mubr.msk.bf16.vlgmr.msra.gmra.mxu1 %vm294_vm2, %v281_v7 }
  0x5f   :  { %3209 = vmatpush3.bf16.msra.mxu0 %v3502_v5  ;;  %3227 = vmatpush3.bf16.msra.mxu1 %v4142_v2 }
  0x60   :  { %3228 = vmatprep.subr.bf16.mxu1 %v4003_v0  ;;  %3230 = vmatprep.mubr.msk.bf16.mxu1 %vm4004_vm0, %v4003_v0 }
  0x61   :  { %3242 = vmatprep.subr.bf16.mxu0 %v4003_v0 }
  0x62   :  { %3211 = vmatmul.mubr.msk.bf16.vlgmr.msra.gmra.mxu0 %vm197_vm1, %v3504_v9 }
  0x63   :  { %3229 = vmatpush3.bf16.msra.mxu1 %v4148_v4  ;;  %3243 = vmatpush3.bf16.msra.mxu0 %v4142_v2 }
  0x64   :  { %3234 = vmatprep.subr.bf16.mxu1 %v4003_v0  ;;  %3244 = vmatprep.subr.bf16.mxu0 %v4003_v0 }
  0x67   :  { %3245 = vmatpush3.bf16.msra.mxu0 %v4148_v4 }
  0x68   :  { %3258 = vmatprep.subr.bf16.mxu0 %v4003_v0 }
 0x11e   :  { %v332_v10 = vpop.f32.mrf.mxu1 }
 0x120   :  { %v3224_v11 = vpop.f32.mrf.mxu1 }
 0x122   :  { %v4176_v12 = vpop.f32.mrf.mxu0  ;;  %v335_v13 = vpop.f32.mrf.mxu1 }
 0x123   :  { %v253_v59 = vadd.f32 %v4176_v12, %v4178_v14 }
 0x124   :  { %v244_v15 = vpop.f32.mrf.mxu0  ;;  %v3225_v16 = vpop.f32.mrf.mxu1 }
 0x125   :  { %v245_v17 = vadd.f32 %v4178_v14, %v244_v15  ;;  %v3505_v15 = vld [vmem:[%s4812_s2 + $0x10] sm:$0xff]   ;;  %v3506_v16 = vld [vmem:[%s4812_s2 + $0x18] sm:$0xff]  }
 0x126   :  { %v4196_v36 = vpop.f32.mrf.mxu0  ;;  %3214 = vmatprep.mubr.msk.bf16.mxu0 %vm197_vm1, %v3505_v15 }
 0x127   :  { %v338_v18 = vadd.f32 %v332_v10, %v245_v17  ;;  %3215 = vmatmul.mubr.msk.bf16.gmra.mxu0 %vm197_vm1, %v3506_v16 }
 0x128   :  { %v247_v37 = vpop.f32.mrf.mxu0  ;;  %3246 = vmatprep.mubr.msk.bf16.mxu0 %vm4004_vm0, %v4003_v0 }
 0x129   :  { %3521 = vtanh.f32 %v338_v18  ;;  %v2970_v21 = vmul.f32 -1.442695, %v338_v18  ;;  %v248_v38 = vadd.f32 %v4178_v14, %v247_v37 }
 0x12b   :  { %3523 = vpow2.f32 %v2970_v21 }
 0x136   :  { %v3522_v19 = vpop.eup %3521 }
 0x137   :  { %352 = vrot.lane.b32.xlu0 %v3522_v19, %s3992_s30 }
 0x138   :  { %v3524_v22 = vpop.eup %3523 }
 0x139   :  { %v342_v23 = vadd.f32 1.0, %v3524_v22 }
 0x13b   :  { %347 = vrot.lane.b32.xlu0 %v280_v20, %s4005_s20  ;;  %3525 = vrcp.f32 %v342_v23 }
 0x148   :  { %v3526_v24 = vpop.eup %3525 }
 0x1a9   :  { %v353_v25 = vpop.permute.xlu0 %352 }
 0x1aa   :  { %v355_v26 = vmul.f32 %v3526_v24, %v353_v25 }
 0x1ac   :  { %357 = vrot.lane.b32.xlu1 %v355_v26, %s4005_s20  ;;  %v256_v26 = vadd.f32 %v4196_v36, %v4178_v14 }
 0x1ad   :  { %v348_v27 = vpop.permute.xlu0 %347 }
 0x1ae   :  { %v350_v28 = vmul.f32 %v3526_v24, %v348_v27 }
 0x1e7   :  { %v4239_v22 = vpop.f32.mrf.mxu0 }
 0x1e9   :  { %v260_v23 = vpop.f32.mrf.mxu0 }
 0x21e   :  { %v358_v29 = vpop.permute.xlu1 %357 }
 0x21f   :  { %v360_v30 = vadd.f32 %v358_v29, %v350_v28 }
 0x221   :  { %3527 = vtanh.f32 %v360_v30 }
 0x22e   :  { %v3528_v31 = vpop.eup %3527 }
 0x22f   :  { %363 = vrot.lane.b32.xlu1 %v3528_v31, %s3992_s30 }
 0x2a1   :  { %v364_v32 = vpop.permute.xlu1 %363 }
 0x2a2   :  { %v366_v33 = vmul.f32 %v3526_v24, %v364_v32  ;;  %v4241_v24 = vpop.f32.mrf.mxu0 }
 0x2a4   :  { %v4185_v34 = vpack.c.bf16 %v366_v33, %v366_v33  ;;  %v4243_v25 = vpop.f32.mrf.mxu0 }
 0x2a6   :  { %369 = vrot.lane.b32.xlu0 %v4185_v34, %s4005_s20 }
 0x318   :  { %v370_v35 = vpop.permute.xlu0 %369 }
 0x319   :  { %3231 = vmatmul.mubr.msk.bf16.vlgmr.msra.gmra.mxu1 %vm294_vm2, %v370_v35 }
 0x31a   :  { %3235 = vmatpush3.bf16.msra.mxu1 %v4142_v2  ;;  %3238 = vmatprep.mubr.msk.bf16.mxu1 %vm4004_vm0, %v4003_v0 }
 0x31b   :  { %3236 = vmatprep.subr.bf16.mxu1 %v4003_v0 }
 0x31e   :  { %3237 = vmatpush3.bf16.msra.mxu1 %v4148_v4 }
 0x31f   :  { %3250 = vmatprep.subr.bf16.mxu1 %v4003_v0 }
 0x3d9   :  { %v408_v39 = vpop.f32.mrf.mxu1 }
 0x3da   :  { %v414_v40 = vadd.f32 %v408_v39, %v248_v38 }
 0x3db   :  { %v3232_v41 = vpop.f32.mrf.mxu1 }
 0x3dc   :  { %3529 = vtanh.f32 %v414_v40  ;;  %v2972_v45 = vmul.f32 -1.442695, %v414_v40 }
 0x3dd   :  { %v411_v42 = vpop.f32.mrf.mxu1 }
 0x3de   :  { %3531 = vpow2.f32 %v2972_v45 }
 0x3df   :  { %v3233_v43 = vpop.f32.mrf.mxu1 }
 0x3e9   :  { %v3530_v44 = vpop.eup %3529 }
 0x3ea   :  { %424 = vrot.lane.b32.xlu1 %v3530_v44, %s3992_s30 }
 0x3eb   :  { %v3532_v46 = vpop.eup %3531 }
 0x3ec   :  { %v418_v47 = vadd.f32 1.0, %v3532_v46 }
 0x3ee   :  { %3533 = vrcp.f32 %v418_v47 }
 0x3fb   :  { %v3534_v48 = vpop.eup %3533 }
 0x3fc   :  { %v422_v51 = vmul.f32 %v3534_v48, %v360_v30 }
 0x45c   :  { %v425_v49 = vpop.permute.xlu1 %424 }
 0x45d   :  { %v427_v50 = vmul.f32 %v3534_v48, %v425_v49 }
 0x45f   :  { %429 = vrot.lane.b32.xlu0 %v427_v50, %s4005_s20 }
 0x4d1   :  { %v430_v52 = vpop.permute.xlu0 %429 }
 0x4d2   :  { %v432_v53 = vadd.f32 %v430_v52, %v422_v51 }
 0x4d4   :  { %3535 = vtanh.f32 %v432_v53 }
 0x4e1   :  { %v3536_v54 = vpop.eup %3535 }
 0x4e2   :  { %435 = vrot.lane.b32.xlu1 %v3536_v54, %s3992_s30 }
 0x554   :  { %v436_v55 = vpop.permute.xlu1 %435 }
 0x555   :  { %v438_v56 = vmul.f32 %v3534_v48, %v436_v55  ;;  %v261_v48 = vadd.f32 %v4178_v14, %v260_v23 }
 0x557   :  { %v4202_v57 = vpack.c.bf16 %v438_v56, %v438_v56 }
 0x559   :  { %441 = vrot.lane.b32.xlu0 %v4202_v57, %s4005_s20 }
 0x5cb   :  { %v442_v58 = vpop.permute.xlu0 %441 }
 0x5cc   :  { %3239 = vmatmul.mubr.msk.bf16.vlgmr.msra.gmra.mxu1 %vm294_vm2, %v442_v58 }
 0x5cd   :  { %3251 = vmatpush3.bf16.msra.mxu1 %v4142_v2  ;;  %3254 = vmatprep.mubr.msk.bf16.mxu1 %vm4004_vm0, %v4003_v0 }
 0x5ce   :  { %3252 = vmatprep.subr.bf16.mxu1 %v4003_v0 }
 0x5d1   :  { %3253 = vmatpush3.bf16.msra.mxu1 %v4148_v4 }
 0x5d2   :  { %3266 = vmatprep.subr.bf16.mxu1 %v4003_v0 }
 0x68c   :  { %v480_v60 = vpop.f32.mrf.mxu1 }
 0x68d   :  { %v486_v61 = vadd.f32 %v480_v60, %v253_v59 }
 0x68e   :  { %v3240_v62 = vpop.f32.mrf.mxu1 }
 0x68f   :  { %3537 = vtanh.f32 %v486_v61  ;;  %v2974_v5 = vmul.f32 -1.442695, %v486_v61 }
 0x690   :  { %v483_v63 = vpop.f32.mrf.mxu1 }
 0x691   :  { %3539 = vpow2.f32 %v2974_v5 }
 0x692   :  { %v3241_v1 = vpop.f32.mrf.mxu1 }
 0x69c   :  { %v3538_v3 = vpop.eup %3537 }
 0x69d   :  { %496 = vrot.lane.b32.xlu1 %v3538_v3, %s3992_s30 }
 0x69e   :  { %v3540_v6 = vpop.eup %3539 }
 0x69f   :  { %v490_v7 = vadd.f32 1.0, %v3540_v6 }
 0x6a1   :  { %3541 = vrcp.f32 %v490_v7 }
 0x6ae   :  { %v3542_v8 = vpop.eup %3541 }
 0x6af   :  { %v494_v11 = vmul.f32 %v3542_v8, %v432_v53 }
 0x70f   :  { %v497_v9 = vpop.permute.xlu1 %496 }
 0x710   :  { %v499_v10 = vmul.f32 %v3542_v8, %v497_v9  ;;  %v264_v9 = vadd.f32 %v4178_v14, %v4243_v25 }
 0x712   :  { %501 = vrot.lane.b32.xlu0 %v499_v10, %s4005_s20 }
 0x784   :  { %v502_v12 = vpop.permute.xlu0 %501 }
 0x785   :  { %v504_v13 = vadd.f32 %v502_v12, %v494_v11 }
 0x787   :  { %3543 = vtanh.f32 %v504_v13 }
 0x794   :  { %v3544_v17 = vpop.eup %3543 }
 0x795   :  { %507 = vrot.lane.b32.xlu1 %v3544_v17, %s3992_s30 }
 0x807   :  { %v508_v18 = vpop.permute.xlu1 %507 }
 0x808   :  { %v510_v19 = vmul.f32 %v3542_v8, %v508_v18 }
 0x80a   :  { %v4228_v20 = vpack.c.bf16 %v510_v19, %v510_v19 }
 0x80c   :  { %513 = vrot.lane.b32.xlu0 %v4228_v20, %s4005_s20 }
 0x87e   :  { %v514_v21 = vpop.permute.xlu0 %513 }
 0x87f   :  { %3247 = vmatmul.mubr.msk.bf16.vlgmr.msra.gmra.mxu0 %vm294_vm2, %v514_v21 }
 0x880   :  { %3259 = vmatpush3.bf16.msra.mxu0 %v4142_v2  ;;  %3262 = vmatprep.mubr.msk.bf16.mxu0 %vm4004_vm0, %v4003_v0 }
 0x881   :  { %3260 = vmatprep.subr.bf16.mxu0 %v4003_v0 }
 0x884   :  { %3261 = vmatpush3.bf16.msra.mxu0 %v4148_v4 }
 0x885   :  { %3274 = vmatprep.subr.bf16.mxu0 %v4003_v0 }
 0x93f   :  { %v552_v27 = vpop.f32.mrf.mxu0 }
 0x940   :  { %v558_v28 = vadd.f32 %v552_v27, %v256_v26 }
 0x941   :  { %v3248_v29 = vpop.f32.mrf.mxu0 }
 0x942   :  { %3545 = vtanh.f32 %v558_v28  ;;  %v2976_v33 = vmul.f32 -1.442695, %v558_v28 }
 0x943   :  { %v555_v30 = vpop.f32.mrf.mxu0 }
 0x944   :  { %3547 = vpow2.f32 %v2976_v33 }
 0x945   :  { %v3249_v31 = vpop.f32.mrf.mxu0 }
 0x94f   :  { %v3546_v32 = vpop.eup %3545 }
 0x950   :  { %568 = vrot.lane.b32.xlu1 %v3546_v32, %s3992_s30  ;;  %v269_v32 = vadd.f32 %v4239_v22, %v4178_v14 }
 0x951   :  { %v3548_v35 = vpop.eup %3547 }
 0x952   :  { %v562_v37 = vadd.f32 1.0, %v3548_v35 }
 0x954   :  { %3549 = vrcp.f32 %v562_v37 }
 0x961   :  { %v3550_v38 = vpop.eup %3549 }
 0x962   :  { %v566_v36 = vmul.f32 %v3550_v38, %v504_v13 }
 0x9c2   :  { %v569_v39 = vpop.permute.xlu1 %568 }
 0x9c3   :  { %v571_v40 = vmul.f32 %v3550_v38, %v569_v39 }
 0x9c5   :  { %573 = vrot.lane.b32.xlu0 %v571_v40, %s4005_s20 }
 0xa37   :  { %v574_v41 = vpop.permute.xlu0 %573 }
 0xa38   :  { %v576_v42 = vadd.f32 %v574_v41, %v566_v36 }
 0xa3a   :  { %3551 = vtanh.f32 %v576_v42 }
 0xa47   :  { %v3552_v43 = vpop.eup %3551 }
 0xa48   :  { %579 = vrot.lane.b32.xlu1 %v3552_v43, %s3992_s30 }
 0xaba   :  { %v580_v44 = vpop.permute.xlu1 %579 }
 0xabb   :  { %v582_v45 = vmul.f32 %v3550_v38, %v580_v44 }
 0xabd   :  { %v4250_v46 = vpack.c.bf16 %v582_v45, %v582_v45 }
 0xabf   :  { %585 = vrot.lane.b32.xlu0 %v4250_v46, %s4005_s20 }
 0xb31   :  { %v586_v47 = vpop.permute.xlu0 %585 }
 0xb32   :  { %3255 = vmatmul.mubr.msk.bf16.vlgmr.msra.gmra.mxu1 %vm294_vm2, %v586_v47 }
 0xb33   :  { %3267 = vmatpush3.bf16.msra.mxu1 %v4142_v2  ;;  %3270 = vmatprep.mubr.msk.bf16.mxu1 %vm4004_vm0, %v4003_v0 }
 0xb34   :  { %3268 = vmatprep.subr.bf16.mxu1 %v4003_v0 }
 0xb37   :  { %3269 = vmatpush3.bf16.msra.mxu1 %v4148_v4 }
 0xbf2   :  { %v624_v49 = vpop.f32.mrf.mxu1 }
 0xbf3   :  { %v630_v50 = vadd.f32 %v624_v49, %v261_v48  ;;  %v3507_v49 = vld [vmem:[%s4790_s4 + $0x8] sm:$0xff]  }
 0xbf4   :  { %v3256_v51 = vpop.f32.mrf.mxu1  ;;  %3282 = vmatprep.subr.bf16.mxu1 %v3507_v49 }
 0xbf5   :  { %3553 = vtanh.f32 %v630_v50  ;;  %v2978_v55 = vmul.f32 -1.442695, %v630_v50  ;;  %v3508_v50 = vld [vmem:[%s4790_s4] sm:$0xff]  }
 0xbf6   :  { %v627_v52 = vpop.f32.mrf.mxu1 }
 0xbf7   :  { %3555 = vpow2.f32 %v2978_v55  ;;  %v882_v52 = vrot.slane %v4202_v57, 4 }
 0xbf8   :  { %v3257_v53 = vpop.f32.mrf.mxu1 }
 0xbf9   :  { %v890_v53 = vsel %vm887_vm3, %v4185_v34, %v882_v52  ;;  %v1021_v34 = vld [vmem:[#allocation2 + $0x8] sm:$0xff] }
 0xc02   :  { %v3554_v54 = vpop.eup %3553 }
 0xc03   :  { %640 = vrot.lane.b32.xlu1 %v3554_v54, %s3992_s30 }
 0xc04   :  { %v3556_v56 = vpop.eup %3555 }
 0xc05   :  { %v634_v58 = vadd.f32 1.0, %v3556_v56 }
 0xc07   :  { %3557 = vrcp.f32 %v634_v58  ;;  %v883_v58 = vrot.slane %v4250_v46, 4 }
 0xc09   :  { %v893_v57 = vsel %vm887_vm3, %v4228_v20, %v883_v58  ;;  %v2996_v20 = vld [vmem:[%s4811_s26 + $0x8] sm:$0xff] }
 0xc14   :  { %v3558_v59 = vpop.eup %3557 }
 0xc15   :  { %v638_v62 = vmul.f32 %v3558_v59, %v576_v42 }
 0xc75   :  { %v641_v60 = vpop.permute.xlu1 %640 }
 0xc76   :  { %v643_v61 = vmul.f32 %v3558_v59, %v641_v60  ;;  %v4317_v60 = vld [vmem:[%s4791_s5 + $0x18] sm:$0xff]  }
 0xc78   :  { %645 = vrot.lane.b32.xlu0 %v643_v61, %s4005_s20  ;;  %v4324_v61 = vld [vmem:[%s4791_s5 + $0x10] sm:$0xff]  }
 0xcea   :  { %v646_v63 = vpop.permute.xlu0 %645 }
 0xceb   :  { %v648_v1 = vadd.f32 %v646_v63, %v638_v62  ;;  %v1022_v63 = vpack.c.bf16 %v2996_v20, %v2996_v20 }
 0xced   :  { %3559 = vtanh.f32 %v648_v1 }
 0xcfa   :  { %v3560_v3 = vpop.eup %3559 }
 0xcfb   :  { %651 = vrot.lane.b32.xlu1 %v3560_v3, %s3992_s30 }
 0xd6d   :  { %v652_v5 = vpop.permute.xlu1 %651 }
 0xd6e   :  { %v654_v6 = vmul.f32 %v3558_v59, %v652_v5 }
 0xd70   :  { %v4264_v7 = vpack.c.bf16 %v654_v6, %v654_v6 }
 0xd72   :  { %657 = vrot.lane.b32.xlu0 %v4264_v7, %s4005_s20 }
 0xde4   :  { %v658_v8 = vpop.permute.xlu0 %657 }
 0xde5   :  { %3263 = vmatmul.mubr.msk.bf16.vlgmr.msra.gmra.mxu0 %vm294_vm2, %v658_v8 }
 0xde6   :  { %3275 = vmatpush3.bf16.msra.mxu0 %v4142_v2  ;;  %3278 = vmatprep.mubr.msk.bf16.mxu0 %vm4004_vm0, %v4003_v0 }
 0xde7   :  { %3276 = vmatprep.subr.bf16.mxu0 %v4003_v0 }
 0xdea   :  { %3277 = vmatpush3.bf16.msra.mxu0 %v4148_v4 }
 0xdeb   :  { %3294 = vmatprep.subr.bf16.mxu0 %v4003_v0 }
 0xea5   :  { %v696_v10 = vpop.f32.mrf.mxu0 }
 0xea6   :  { %v702_v11 = vadd.f32 %v696_v10, %v264_v9  ;;  %v4350_v10 = vld [vmem:[#allocation7 + $0x1] ss:$0 sm:$0xff] }
 0xea7   :  { %v3264_v12 = vpop.f32.mrf.mxu0 }
 0xea8   :  { %3561 = vtanh.f32 %v702_v11  ;;  %v2980_v2 = vmul.f32 -1.442695, %v702_v11 }
 0xea9   :  { %v699_v13 = vpop.f32.mrf.mxu0 }
 0xeaa   :  { %3563 = vpow2.f32 %v2980_v2 }
 0xeab   :  { %v3265_v15 = vpop.f32.mrf.mxu0 }
 0xeb5   :  { %v3562_v16 = vpop.eup %3561 }
 0xeb6   :  { %712 = vrot.lane.b32.xlu1 %v3562_v16, %s3992_s30 }
 0xeb7   :  { %v3564_v17 = vpop.eup %3563 }
 0xeb8   :  { %v706_v18 = vadd.f32 1.0, %v3564_v17 }
 0xeba   :  { %3565 = vrcp.f32 %v706_v18 }
 0xec7   :  { %v3566_v4 = vpop.eup %3565 }
 0xec8   :  { %v710_v23 = vmul.f32 %v3566_v4, %v648_v1  ;;  %v272_v1 = vadd.f32 %v4241_v24, %v4178_v14 }
 0xf28   :  { %v713_v19 = vpop.permute.xlu1 %712 }
 0xf29   :  { %v715_v21 = vmul.f32 %v3566_v4, %v713_v19 }
 0xf2b   :  { %717 = vrot.lane.b32.xlu0 %v715_v21, %s4005_s20 }
 0xf9d   :  { %v718_v25 = vpop.permute.xlu0 %717 }
 0xf9e   :  { %v720_v26 = vadd.f32 %v718_v25, %v710_v23 }
 0xfa0   :  { %3567 = vtanh.f32 %v720_v26 }
 0xfad   :  { %v3568_v27 = vpop.eup %3567 }
 0xfae   :  { %723 = vrot.lane.b32.xlu1 %v3568_v27, %s3992_s30 }
0x1020   :  { %v724_v28 = vpop.permute.xlu1 %723 }
0x1021   :  { %v726_v29 = vmul.f32 %v3566_v4, %v724_v28 }
0x1023   :  { %v4280_v30 = vpack.c.bf16 %v726_v29, %v726_v29 }
0x1025   :  { %729 = vrot.lane.b32.xlu0 %v4280_v30, %s4005_s20 }
0x1097   :  { %v730_v31 = vpop.permute.xlu0 %729 }
0x1098   :  { %3271 = vmatmul.mubr.msk.bf16.vlgmr.msra.gmra.mxu1 %vm294_vm2, %v730_v31 }
0x1099   :  { %3283 = vmatpush3.bf16.msra.mxu1 %v3507_v49  ;;  %v884_v49 = vrot.slane %v4280_v30, 4 }
0x109a   :  { %3284 = vmatprep.subr.bf16.mxu1 %v3508_v50 }
0x109d   :  { %3285 = vmatpush3.bf16.msra.mxu1 %v3508_v50 }
0x109e   :  { %3310 = vmatprep.subr.bf16.mxu1 %v4003_v0 }
0x1158   :  { %v768_v33 = vpop.f32.mrf.mxu1 }
0x1159   :  { %v774_v35 = vadd.f32 %v768_v33, %v269_v32 }
0x115a   :  { %v3272_v37 = vpop.f32.mrf.mxu1 }
0x115b   :  { %3569 = vtanh.f32 %v774_v35  ;;  %v2982_v36 = vmul.f32 -1.442695, %v774_v35 }
0x115c   :  { %v771_v38 = vpop.f32.mrf.mxu1 }
0x115d   :  { %3571 = vpow2.f32 %v2982_v36 }
0x115e   :  { %v3273_v39 = vpop.f32.mrf.mxu1 }
0x1168   :  { %v3570_v40 = vpop.eup %3569 }
0x1169   :  { %784 = vrot.lane.b32.xlu1 %v3570_v40, %s3992_s30 }
0x116a   :  { %v3572_v41 = vpop.eup %3571 }
0x116b   :  { %v778_v42 = vadd.f32 1.0, %v3572_v41 }
0x116d   :  { %3573 = vrcp.f32 %v778_v42 }
0x117a   :  { %v3574_v43 = vpop.eup %3573 }
0x117b   :  { %v782_v22 = vmul.f32 %v3574_v43, %v720_v26 }
0x11db   :  { %v785_v44 = vpop.permute.xlu1 %784 }
0x11dc   :  { %v787_v45 = vmul.f32 %v3574_v43, %v785_v44 }
0x11de   :  { %789 = vrot.lane.b32.xlu0 %v787_v45, %s4005_s20 }
0x1250   :  { %v790_v47 = vpop.permute.xlu0 %789 }
0x1251   :  { %v4289_v48 = vadd.f32 %v790_v47, %v782_v22 }
0x1253   :  { %3575 = vtanh.f32 %v4289_v48 }
0x1260   :  { %v3576_v51 = vpop.eup %3575 }
0x1261   :  { %795 = vrot.lane.b32.xlu1 %v3576_v51, %s3992_s30 }
0x1265   :  { %916 = vrot.lane.b32.xlu1 %v890_v53, %s4005_s20 }
0x12d3   :  { %v796_v54 = vpop.permute.xlu1 %795 }
0x12d4   :  { %v798_v55 = vmul.f32 %v3574_v43, %v796_v54 }
0x12d6   :  { %v4304_v56 = vpack.c.bf16 %v798_v55, %v798_v55 }
0x12d7   :  { %v917_v59 = vpop.permute.xlu1 %916 }
0x12d8   :  { %801 = vrot.lane.b32.xlu0 %v4304_v56, %s4005_s20  ;;  %3286 = vmatprep.mubr.msk.bf16.mxu1 %vm294_vm2, %v917_v59 }
0x12dc   :  { %918 = vrot.lane.b32.xlu0 %v893_v57, %s4005_s20 }
0x12e0   :  { %1087 = vrot.lane.b32.xlu0 %v1021_v34, %s4005_s20 }
0x134a   :  { %v802_v46 = vpop.permute.xlu0 %801 }
0x134b   :  { %3279 = vmatmul.mubr.msk.bf16.vlgmr.msra.gmra.mxu0 %vm294_vm2, %v802_v46 }
0x134c   :  { %3295 = vmatpush3.bf16.msra.mxu0 %v4317_v60  ;;  %3298 = vmatprep.mubr.msk.bf16.mxu0 %vm4004_vm0, %v4003_v0 }
0x134d   :  { %3296 = vmatprep.subr.bf16.mxu0 %v4003_v0 }
0x134e   :  { %v919_v62 = vpop.permute.xlu0 %918 }
0x134f   :  { %3287 = vmatmul.mubr.msk.bf16.vlgmr.msra.gmra.mxu1 %vm294_vm2, %v919_v62 }
0x1350   :  { %3297 = vmatpush3.bf16.msra.mxu0 %v4324_v61  ;;  %3311 = vmatpush3.bf16.msra.mxu1 %v4317_v60 }
0x1351   :  { %3302 = vmatprep.subr.bf16.mxu0 %v4003_v0  ;;  %3312 = vmatprep.subr.bf16.mxu1 %v4003_v0 }
0x1352   :  { %v1088_v26 = vpop.permute.xlu0 %1087 }
0x1353   :  { %3299 = vmatmul.mubr.msk.bf16.vlgmr.msra.gmra.mxu0 %vm294_vm2, %v1022_v63 }
0x1354   :  { %3303 = vmatpush3.bf16.msra.mxu0 %v4317_v60  ;;  %3306 = vmatprep.mubr.msk.bf16.mxu0 %vm4004_vm0, %v4003_v0 }
0x1355   :  { %3304 = vmatprep.subr.bf16.mxu0 %v4003_v0  ;;  %3313 = vmatpush3.bf16.msra.mxu1 %v4324_v61 }
0x1356   :  { %3326 = vmatprep.subr.bf16.mxu1 %v4003_v0 }
0x1358   :  { %3305 = vmatpush3.bf16.msra.mxu0 %v4324_v61 }
0x1359   :  { %3318 = vmatprep.subr.bf16.mxu0 %v4003_v0 }
0x140b   :  { %v840_v3 = vpop.f32.mrf.mxu0 }
0x140c   :  { %v846_v5 = vadd.f32 %v840_v3, %v272_v1 }
0x140d   :  { %v3280_v6 = vpop.f32.mrf.mxu0 }
0x140e   :  { %v2984_v33 = vmul.f32 -1.442695, %v846_v5 }
0x140f   :  { %v843_v8 = vpop.f32.mrf.mxu0  ;;  %v4348_v9 = vpop.f32.mrf.mxu1 }
0x1411   :  { %v3281_v11 = vpop.f32.mrf.mxu0  ;;  %v982_v12 = vpop.f32.mrf.mxu1 }
0x1412   :  { %v983_v13 = vadd.f32 %v4350_v10, %v982_v12 }
0x1413   :  { %v1072_v15 = vpop.f32.mrf.mxu0  ;;  %v4379_v52 = vpop.f32.mrf.mxu1 }
0x1414   :  { %v1078_v16 = vadd.f32 %v1072_v15, %v983_v13 }
0x1415   :  { %v3300_v2 = vpop.f32.mrf.mxu0  ;;  %v985_v53 = vpop.f32.mrf.mxu1 }
0x1416   :  { %3577 = vtanh.f32 %v1078_v16  ;;  %v3000_v14 = vmul.f32 -1.442695, %v1078_v16  ;;  %v986_v54 = vadd.f32 %v4350_v10, %v985_v53 }
0x1417   :  { %v1075_v17 = vpop.f32.mrf.mxu0 }
0x1418   :  { %3579 = vpow2.f32 %v3000_v14 }
0x1419   :  { %v3301_v18 = vpop.f32.mrf.mxu0 }
0x1423   :  { %v3578_v4 = vpop.eup %3577 }
0x1424   :  { %1092 = vrot.lane.b32.xlu1 %v3578_v4, %s3992_s30 }
0x1425   :  { %v3580_v24 = vpop.eup %3579 }
0x1426   :  { %v1082_v19 = vadd.f32 1.0, %v3580_v24 }
0x1428   :  { %3581 = vrcp.f32 %v1082_v19 }
0x1435   :  { %v3582_v21 = vpop.eup %3581 }
0x1436   :  { %v1090_v27 = vmul.f32 %v3582_v21, %v1088_v26 }
0x1496   :  { %v1093_v23 = vpop.permute.xlu1 %1092 }
0x1497   :  { %v1095_v25 = vmul.f32 %v3582_v21, %v1093_v23 }
0x1499   :  { %1097 = vrot.lane.b32.xlu1 %v1095_v25, %s4005_s20 }
0x150b   :  { %v1098_v28 = vpop.permute.xlu1 %1097 }
0x150c   :  { %v1100_v29 = vadd.f32 %v1098_v28, %v1090_v27 }
0x150e   :  { %3583 = vtanh.f32 %v1100_v29 }
0x150f   :  { %3585 = vtanh.f32 %v846_v5 }
0x1510   :  { %3587 = vpow2.f32 %v2984_v33 }
0x151b   :  { %v3584_v31 = vpop.eup %3583 }
0x151c   :  { %1103 = vrot.lane.b32.xlu0 %v3584_v31, %s3992_s30  ;;  %v3586_v32 = vpop.eup %3585 }
0x151d   :  { %v3588_v35 = vpop.eup %3587 }
0x151e   :  { %v850_v37 = vadd.f32 1.0, %v3588_v35 }
0x1520   :  { %856 = vrot.lane.b32.xlu0 %v3586_v32, %s3992_s30  ;;  %3589 = vrcp.f32 %v850_v37 }
0x152d   :  { %v3590_v36 = vpop.eup %3589 }
0x152e   :  { %v854_v44 = vmul.f32 %v3590_v36, %v4289_v48  ;;  %v896_v48 = vsel %vm887_vm3, %v4264_v7, %v884_v49 }
0x158e   :  { %v1104_v38 = vpop.permute.xlu0 %1103 }
0x158f   :  { %v1106_v39 = vmul.f32 %v3582_v21, %v1104_v38  ;;  %v991_v21 = vadd.f32 %v4348_v9, %v4350_v10 }
0x1591   :  { %v4357_v40 = vpack.c.bf16 %v1106_v39, %v1106_v39 }
0x1592   :  { %v857_v41 = vpop.permute.xlu0 %856 }
0x1593   :  { %v859_v42 = vmul.f32 %v3590_v36, %v857_v41  ;;  %1109 = vrot.lane.b32.xlu1 %v4357_v40, %s4005_s20 }
0x1595   :  { %861 = vrot.lane.b32.xlu0 %v859_v42, %s4005_s20 }
0x1605   :  { %v1110_v43 = vpop.permute.xlu1 %1109 }
0x1606   :  { %3307 = vmatmul.mubr.msk.bf16.vlgmr.msra.gmra.mxu0 %vm294_vm2, %v1110_v43 }
0x1607   :  { %v862_v45 = vpop.permute.xlu0 %861  ;;  %3319 = vmatpush3.bf16.msra.mxu0 %v4317_v60  ;;  %3322 = vmatprep.mubr.msk.bf16.mxu0 %vm4004_vm0, %v4003_v0 }
0x1608   :  { %v4367_v22 = vadd.f32 %v862_v45, %v854_v44  ;;  %3320 = vmatprep.subr.bf16.mxu0 %v4003_v0 }
0x160a   :  { %3591 = vtanh.f32 %v4367_v22 }
0x160b   :  { %3321 = vmatpush3.bf16.msra.mxu0 %v4324_v61 }
0x160c   :  { %3334 = vmatprep.subr.bf16.mxu0 %v4003_v0 }
0x1617   :  { %v3592_v47 = vpop.eup %3591 }
0x1618   :  { %867 = vrot.lane.b32.xlu0 %v3592_v47, %s3992_s30  ;;  %v994_v47 = vadd.f32 %v4379_v52, %v4350_v10 }
0x161c   :  { %920 = vrot.lane.b32.xlu0 %v896_v48, %s4005_s20 }
0x168a   :  { %v868_v50 = vpop.permute.xlu0 %867 }
0x168b   :  { %v4384_v8 = vmul.f32 %v3590_v36, %v868_v50 }
0x168d   :  { %v871_v11 = vpack.c.bf16 %v4384_v8, %v4384_v8 }
0x168e   :  { %v921_v51 = vpop.permute.xlu0 %920 }
0x168f   :  { %3290 = vmatprep.mubr.msk.bf16.mxu1 %vm294_vm2, %v921_v51  ;;  %v886_v13 = vrot.slane %v871_v11, 4 }
0x1691   :  { %v899_v15 = vsel %vm887_vm3, %v4304_v56, %v886_v13 }
0x16c6   :  { %v1148_v55 = vpop.f32.mrf.mxu0 }
0x16c7   :  { %v1154_v58 = vadd.f32 %v1148_v55, %v986_v54 }
0x16c8   :  { %v3308_v59 = vpop.f32.mrf.mxu0 }
0x16c9   :  { %3593 = vtanh.f32 %v1154_v58  ;;  %v3002_v7 = vmul.f32 -1.442695, %v1154_v58 }
0x16ca   :  { %v1151_v30 = vpop.f32.mrf.mxu0 }
0x16cb   :  { %3595 = vpow2.f32 %v3002_v7 }
0x16cc   :  { %v3309_v57 = vpop.f32.mrf.mxu0 }
0x16d6   :  { %v3594_v34 = vpop.eup %3593 }
0x16d7   :  { %1164 = vrot.lane.b32.xlu1 %v3594_v34, %s3992_s30 }
0x16d8   :  { %v3596_v46 = vpop.eup %3595 }
0x16d9   :  { %v1158_v20 = vadd.f32 1.0, %v3596_v46 }
0x16db   :  { %3597 = vrcp.f32 %v1158_v20 }
0x16e8   :  { %v3598_v62 = vpop.eup %3597 }
0x16e9   :  { %v1162_v3 = vmul.f32 %v3598_v62, %v1100_v29 }
0x1749   :  { %v1165_v63 = vpop.permute.xlu1 %1164 }
0x174a   :  { %v1167_v1 = vmul.f32 %v3598_v62, %v1165_v63 }
0x174c   :  { %1169 = vrot.lane.b32.xlu1 %v1167_v1, %s4005_s20 }
0x17be   :  { %v1170_v5 = vpop.permute.xlu1 %1169 }
0x17bf   :  { %v1172_v6 = vadd.f32 %v1170_v5, %v1162_v3 }
0x17c1   :  { %3599 = vtanh.f32 %v1172_v6 }
0x17ce   :  { %v3600_v12 = vpop.eup %3599 }
0x17cf   :  { %1175 = vrot.lane.b32.xlu1 %v3600_v12, %s3992_s30 }
0x17d3   :  { %922 = vrot.lane.b32.xlu1 %v899_v15, %s4005_s20 }
0x1841   :  { %v1176_v16 = vpop.permute.xlu1 %1175 }
0x1842   :  { %v1178_v2 = vmul.f32 %v3598_v62, %v1176_v16 }
0x1844   :  { %v4392_v17 = vpack.c.bf16 %v1178_v2, %v1178_v2 }
0x1845   :  { %v923_v18 = vpop.permute.xlu1 %922 }
0x1846   :  { %1181 = vrot.lane.b32.xlu0 %v4392_v17, %s4005_s20  ;;  %3291 = vmatmul.mubr.msk.bf16.gmra.mxu1 %vm294_vm2, %v923_v18 }
0x1847   :  { %3314 = vmatprep.mubr.msk.bf16.mxu1 %vm4004_vm0, %v4003_v0 }
0x18b8   :  { %v1182_v4 = vpop.permute.xlu0 %1181 }
0x18b9   :  { %3315 = vmatmul.mubr.msk.bf16.vlgmr.msra.gmra.mxu1 %vm294_vm2, %v1182_v4 }
0x18ba   :  { %3327 = vmatpush3.bf16.msra.mxu1 %v4317_v60  ;;  %3330 = vmatprep.mubr.msk.bf16.mxu1 %vm4004_vm0, %v4003_v0 }
0x18bb   :  { %3328 = vmatprep.subr.bf16.mxu1 %v4003_v0 }
0x18be   :  { %3329 = vmatpush3.bf16.msra.mxu1 %v4324_v61 }
0x18bf   :  { %3342 = vmatprep.subr.bf16.mxu1 %v4003_v0 }
0x1906   :  { %v4406_v56 = vpop.f32.mrf.mxu1 }
0x1908   :  { %v4408_v14 = vpop.f32.mrf.mxu1 }
0x1909   :  { %v999_v5 = vadd.f32 %v4350_v10, %v4408_v14 }
0x190a   :  { %v4410_v24 = vpop.f32.mrf.mxu1 }
0x190c   :  { %v4412_v19 = vpop.f32.mrf.mxu1 }
0x1979   :  { %v1220_v23 = vpop.f32.mrf.mxu1 }
0x197a   :  { %v1226_v25 = vadd.f32 %v1220_v23, %v991_v21 }
0x197b   :  { %v3316_v26 = vpop.f32.mrf.mxu1 }
0x197c   :  { %3601 = vtanh.f32 %v1226_v25  ;;  %v3004_v31 = vmul.f32 -1.442695, %v1226_v25 }
0x197d   :  { %v1223_v27 = vpop.f32.mrf.mxu1 }
0x197e   :  { %3603 = vpow2.f32 %v3004_v31 }
0x197f   :  { %v3317_v28 = vpop.f32.mrf.mxu1 }
0x1989   :  { %v3602_v29 = vpop.eup %3601 }
0x198a   :  { %1236 = vrot.lane.b32.xlu1 %v3602_v29, %s3992_s30 }
0x198b   :  { %v3604_v32 = vpop.eup %3603 }
0x198c   :  { %v1230_v33 = vadd.f32 1.0, %v3604_v32 }
0x198e   :  { %3605 = vrcp.f32 %v1230_v33 }
0x199b   :  { %v3606_v35 = vpop.eup %3605 }
0x199c   :  { %v1234_v9 = vmul.f32 %v3606_v35, %v1172_v6 }
0x19fc   :  { %v1237_v37 = vpop.permute.xlu1 %1236 }
0x19fd   :  { %v1239_v38 = vmul.f32 %v3606_v35, %v1237_v37 }
0x19ff   :  { %1241 = vrot.lane.b32.xlu0 %v1239_v38, %s4005_s20 }
0x1a71   :  { %v1242_v39 = vpop.permute.xlu0 %1241 }
0x1a72   :  { %v1244_v36 = vadd.f32 %v1242_v39, %v1234_v9 }
0x1a74   :  { %3607 = vtanh.f32 %v1244_v36 }
0x1a81   :  { %v3608_v41 = vpop.eup %3607 }
0x1a82   :  { %1247 = vrot.lane.b32.xlu1 %v3608_v41, %s3992_s30 }
0x1af4   :  { %v1248_v42 = vpop.permute.xlu1 %1247 }
0x1af5   :  { %v1250_v43 = vmul.f32 %v3606_v35, %v1248_v42  ;;  %v1002_v35 = vadd.f32 %v4350_v10, %v4412_v19 }
0x1af7   :  { %v4419_v44 = vpack.c.bf16 %v1250_v43, %v1250_v43 }
0x1af9   :  { %1253 = vrot.lane.b32.xlu0 %v4419_v44, %s4005_s20 }
0x1b6b   :  { %v1254_v45 = vpop.permute.xlu0 %1253 }
0x1b6c   :  { %3323 = vmatmul.mubr.msk.bf16.vlgmr.msra.gmra.mxu0 %vm294_vm2, %v1254_v45 }
0x1b6d   :  { %3335 = vmatpush3.bf16.msra.mxu0 %v4317_v60  ;;  %3338 = vmatprep.mubr.msk.bf16.mxu0 %vm4004_vm0, %v4003_v0 }
0x1b6e   :  { %3336 = vmatprep.subr.bf16.mxu0 %v4003_v0 }
0x1b71   :  { %3337 = vmatpush3.bf16.msra.mxu0 %v4324_v61 }
0x1b72   :  { %3350 = vmatprep.subr.bf16.mxu0 %v4003_v0 }
0x1c2c   :  { %v1292_v49 = vpop.f32.mrf.mxu0 }
0x1c2d   :  { %v1298_v48 = vadd.f32 %v1292_v49, %v994_v47 }
0x1c2e   :  { %v3324_v50 = vpop.f32.mrf.mxu0 }
0x1c2f   :  { %3609 = vtanh.f32 %v1298_v48  ;;  %v3006_v55 = vmul.f32 -1.442695, %v1298_v48 }
0x1c30   :  { %v1295_v51 = vpop.f32.mrf.mxu0 }
0x1c31   :  { %3611 = vpow2.f32 %v3006_v55 }
0x1c32   :  { %v3325_v53 = vpop.f32.mrf.mxu0 }
0x1c3c   :  { %v3610_v54 = vpop.eup %3609 }
0x1c3d   :  { %1308 = vrot.lane.b32.xlu1 %v3610_v54, %s3992_s30 }
0x1c3e   :  { %v3612_v58 = vpop.eup %3611 }
0x1c3f   :  { %v1302_v59 = vadd.f32 1.0, %v3612_v58  ;;  %v1007_v58 = vadd.f32 %v4406_v56, %v4350_v10 }
0x1c41   :  { %3613 = vrcp.f32 %v1302_v59 }
0x1c4e   :  { %v3614_v30 = vpop.eup %3613 }
0x1c4f   :  { %v1306_v52 = vmul.f32 %v3614_v30, %v1244_v36 }
0x1caf   :  { %v1309_v57 = vpop.permute.xlu1 %1308 }
0x1cb0   :  { %v1311_v34 = vmul.f32 %v3614_v30, %v1309_v57 }
0x1cb2   :  { %1313 = vrot.lane.b32.xlu0 %v1311_v34, %s4005_s20 }
0x1d24   :  { %v1314_v7 = vpop.permute.xlu0 %1313 }
0x1d25   :  { %v1316_v46 = vadd.f32 %v1314_v7, %v1306_v52 }
0x1d27   :  { %3615 = vtanh.f32 %v1316_v46 }
0x1d34   :  { %v3616_v20 = vpop.eup %3615 }
0x1d35   :  { %1319 = vrot.lane.b32.xlu1 %v3616_v20, %s3992_s30 }
0x1da7   :  { %v1320_v62 = vpop.permute.xlu1 %1319 }
0x1da8   :  { %v1322_v63 = vmul.f32 %v3614_v30, %v1320_v62 }
0x1daa   :  { %v4435_v1 = vpack.c.bf16 %v1322_v63, %v1322_v63 }
0x1dac   :  { %1325 = vrot.lane.b32.xlu0 %v4435_v1, %s4005_s20 }
0x1e1e   :  { %v1326_v3 = vpop.permute.xlu0 %1325 }
0x1e1f   :  { %3331 = vmatmul.mubr.msk.bf16.vlgmr.msra.gmra.mxu1 %vm294_vm2, %v1326_v3 }
0x1e20   :  { %3343 = vmatpush3.bf16.msra.mxu1 %v4317_v60  ;;  %3346 = vmatprep.mubr.msk.bf16.mxu1 %vm4004_vm0, %v4003_v0 }
0x1e21   :  { %3344 = vmatprep.subr.bf16.mxu1 %v4003_v0 }
0x1e24   :  { %3345 = vmatpush3.bf16.msra.mxu1 %v4324_v61 }
0x1edf   :  { %v1364_v6 = vpop.f32.mrf.mxu1 }
0x1ee0   :  { %v1370_v11 = vadd.f32 %v1364_v6, %v999_v5 }
0x1ee1   :  { %v3332_v12 = vpop.f32.mrf.mxu1 }
0x1ee2   :  { %3617 = vtanh.f32 %v1370_v11  ;;  %v3008_v2 = vmul.f32 -1.442695, %v1370_v11  ;;  %v3511_v12 = vld [vmem:[%s4790_s4 + $0x18] sm:$0xff]  }
0x1ee3   :  { %v1367_v13 = vpop.f32.mrf.mxu1  ;;  %3358 = vmatprep.subr.bf16.mxu1 %v3511_v12 }
0x1ee4   :  { %3619 = vpow2.f32 %v3008_v2  ;;  %v3512_v13 = vld [vmem:[%s4790_s4 + $0x10] sm:$0xff]  }
0x1ee5   :  { %v3333_v15 = vpop.f32.mrf.mxu1 }
0x1eef   :  { %v3618_v16 = vpop.eup %3617 }
0x1ef0   :  { %1380 = vrot.lane.b32.xlu1 %v3618_v16, %s3992_s30  ;;  %v1624_v16 = vrot.slane %v4392_v17, 4 }
0x1ef1   :  { %v3620_v18 = vpop.eup %3619 }
0x1ef2   :  { %v1374_v4 = vadd.f32 1.0, %v3620_v18  ;;  %v1631_v2 = vsel %vm887_vm3, %v4357_v40, %v1624_v16  ;;  %v1763_v40 = vld [vmem:[#allocation2 + $0x10] sm:$0xff] }
0x1ef4   :  { %3621 = vrcp.f32 %v1374_v4 }
0x1f01   :  { %v3622_v21 = vpop.eup %3621 }
0x1f02   :  { %v1378_v14 = vmul.f32 %v3622_v21, %v1316_v46 }
0x1f62   :  { %v1381_v23 = vpop.permute.xlu1 %1380 }
0x1f63   :  { %v1383_v25 = vmul.f32 %v3622_v21, %v1381_v23  ;;  %v1625_v23 = vrot.slane %v4435_v1, 4 }
0x1f65   :  { %1385 = vrot.lane.b32.xlu0 %v1383_v25, %s4005_s20  ;;  %v1634_v17 = vsel %vm887_vm3, %v4419_v44, %v1625_v23  ;;  %v3030_v44 = vld [vmem:[%s4811_s26 + $0x10] sm:$0xff] }
0x1fd7   :  { %v1386_v26 = vpop.permute.xlu0 %1385 }
0x1fd8   :  { %v1388_v27 = vadd.f32 %v1386_v26, %v1378_v14  ;;  %v4503_v14 = vld [vmem:[%s4791_s5 + $0x28] sm:$0xff]   ;;  %v4510_v26 = vld [vmem:[%s4791_s5 + $0x20] sm:$0xff]  }
0x1fda   :  { %3623 = vtanh.f32 %v1388_v27 }
0x1fe7   :  { %v3624_v28 = vpop.eup %3623 }
0x1fe8   :  { %1391 = vrot.lane.b32.xlu1 %v3624_v28, %s3992_s30  ;;  %v1764_v28 = vpack.c.bf16 %v3030_v44, %v3030_v44 }
0x205a   :  { %v1392_v29 = vpop.permute.xlu1 %1391 }
0x205b   :  { %v1394_v31 = vmul.f32 %v3622_v21, %v1392_v29  ;;  %v1010_v29 = vadd.f32 %v4410_v24, %v4350_v10 }
0x205d   :  { %v4450_v32 = vpack.c.bf16 %v1394_v31, %v1394_v31 }
0x205f   :  { %1397 = vrot.lane.b32.xlu0 %v4450_v32, %s4005_s20 }
0x20d1   :  { %v1398_v33 = vpop.permute.xlu0 %1397 }
0x20d2   :  { %3339 = vmatmul.mubr.msk.bf16.vlgmr.msra.gmra.mxu0 %vm294_vm2, %v1398_v33 }
0x20d3   :  { %3351 = vmatpush3.bf16.msra.mxu0 %v4317_v60  ;;  %3354 = vmatprep.mubr.msk.bf16.mxu0 %vm4004_vm0, %v4003_v0 }
0x20d4   :  { %3352 = vmatprep.subr.bf16.mxu0 %v4003_v0 }
0x20d7   :  { %3353 = vmatpush3.bf16.msra.mxu0 %v4324_v61 }
0x20d8   :  { %3370 = vmatprep.subr.bf16.mxu0 %v4003_v0 }
0x2192   :  { %v1436_v37 = vpop.f32.mrf.mxu0 }
0x2193   :  { %v1442_v38 = vadd.f32 %v1436_v37, %v1002_v35 }
0x2194   :  { %v3340_v9 = vpop.f32.mrf.mxu0 }
0x2195   :  { %3625 = vtanh.f32 %v1442_v38  ;;  %v3010_v60 = vmul.f32 -1.442695, %v1442_v38  ;;  %v4536_v9 = vld [vmem:[#allocation7 + $0x2] ss:$0 sm:$0xff] }
0x2196   :  { %v1439_v39 = vpop.f32.mrf.mxu0 }
0x2197   :  { %3627 = vpow2.f32 %v3010_v60 }
0x2198   :  { %v3341_v36 = vpop.f32.mrf.mxu0 }
0x21a2   :  { %v3626_v41 = vpop.eup %3625 }
0x21a3   :  { %1452 = vrot.lane.b32.xlu1 %v3626_v41, %s3992_s30 }
0x21a4   :  { %v3628_v42 = vpop.eup %3627 }
0x21a5   :  { %v1446_v43 = vadd.f32 1.0, %v3628_v42 }
0x21a7   :  { %3629 = vrcp.f32 %v1446_v43 }
0x21b4   :  { %v3630_v61 = vpop.eup %3629 }
0x21b5   :  { %v1450_v19 = vmul.f32 %v3630_v61, %v1388_v27 }
0x2215   :  { %v1453_v45 = vpop.permute.xlu1 %1452 }
0x2216   :  { %v1455_v47 = vmul.f32 %v3630_v61, %v1453_v45 }
0x2218   :  { %1457 = vrot.lane.b32.xlu0 %v1455_v47, %s4005_s20 }
0x228a   :  { %v1458_v49 = vpop.permute.xlu0 %1457 }
0x228b   :  { %v1460_v48 = vadd.f32 %v1458_v49, %v1450_v19 }
0x228d   :  { %3631 = vtanh.f32 %v1460_v48 }
0x229a   :  { %v3632_v50 = vpop.eup %3631 }
0x229b   :  { %1463 = vrot.lane.b32.xlu1 %v3632_v50, %s3992_s30 }
0x230d   :  { %v1464_v51 = vpop.permute.xlu1 %1463 }
0x230e   :  { %v1466_v53 = vmul.f32 %v3630_v61, %v1464_v51 }
0x2310   :  { %v4466_v54 = vpack.c.bf16 %v1466_v53, %v1466_v53 }
0x2312   :  { %1469 = vrot.lane.b32.xlu0 %v4466_v54, %s4005_s20 }
0x2384   :  { %v1470_v55 = vpop.permute.xlu0 %1469 }
0x2385   :  { %3347 = vmatmul.mubr.msk.bf16.vlgmr.msra.gmra.mxu1 %vm294_vm2, %v1470_v55 }
0x2386   :  { %3359 = vmatpush3.bf16.msra.mxu1 %v3511_v12 }
0x2387   :  { %3360 = vmatprep.subr.bf16.mxu1 %v3512_v13 }
0x238a   :  { %3361 = vmatpush3.bf16.msra.mxu1 %v3512_v13 }
0x238b   :  { %3386 = vmatprep.subr.bf16.mxu1 %v4003_v0 }
0x2445   :  { %v1508_v59 = vpop.f32.mrf.mxu1 }
0x2446   :  { %v1514_v30 = vadd.f32 %v1508_v59, %v1007_v58 }
0x2447   :  { %v3348_v57 = vpop.f32.mrf.mxu1 }
0x2448   :  { %3633 = vtanh.f32 %v1514_v30  ;;  %v3012_v46 = vmul.f32 -1.442695, %v1514_v30 }
0x2449   :  { %v1511_v34 = vpop.f32.mrf.mxu1 }
0x244a   :  { %3635 = vpow2.f32 %v3012_v46 }
0x244b   :  { %v3349_v52 = vpop.f32.mrf.mxu1 }
0x2455   :  { %v3634_v7 = vpop.eup %3633 }
0x2456   :  { %1524 = vrot.lane.b32.xlu1 %v3634_v7, %s3992_s30 }
0x2457   :  { %v3636_v20 = vpop.eup %3635 }
0x2458   :  { %v1518_v62 = vadd.f32 1.0, %v3636_v20 }
0x245a   :  { %3637 = vrcp.f32 %v1518_v62 }
0x2467   :  { %v3638_v63 = vpop.eup %3637 }
0x2468   :  { %v1522_v56 = vmul.f32 %v3638_v63, %v1460_v48 }
0x24c8   :  { %v1525_v3 = vpop.permute.xlu1 %1524 }
0x24c9   :  { %v1527_v5 = vmul.f32 %v3638_v63, %v1525_v3 }
0x24cb   :  { %1529 = vrot.lane.b32.xlu0 %v1527_v5, %s4005_s20 }
0x253d   :  { %v1530_v6 = vpop.permute.xlu0 %1529 }
0x253e   :  { %v4475_v11 = vadd.f32 %v1530_v6, %v1522_v56 }
0x2540   :  { %3639 = vtanh.f32 %v4475_v11 }
0x254d   :  { %v3640_v15 = vpop.eup %3639 }
0x254e   :  { %1535 = vrot.lane.b32.xlu1 %v3640_v15, %s3992_s30  ;;  %v1626_v15 = vrot.slane %v4466_v54, 4 }
0x2552   :  { %1658 = vrot.lane.b32.xlu1 %v1631_v2, %s4005_s20 }
0x25c0   :  { %v1536_v18 = vpop.permute.xlu1 %1535 }
0x25c1   :  { %v1538_v4 = vmul.f32 %v3638_v63, %v1536_v18 }
0x25c3   :  { %v4490_v21 = vpack.c.bf16 %v1538_v4, %v1538_v4 }
0x25c4   :  { %v1659_v25 = vpop.permute.xlu1 %1658 }
0x25c5   :  { %1541 = vrot.lane.b32.xlu0 %v4490_v21, %s4005_s20  ;;  %3362 = vmatprep.mubr.msk.bf16.mxu1 %vm294_vm2, %v1659_v25 }
0x25c9   :  { %1660 = vrot.lane.b32.xlu0 %v1634_v17, %s4005_s20 }
0x25cd   :  { %1829 = vrot.lane.b32.xlu0 %v1763_v40, %s4005_s20 }
0x2637   :  { %v1542_v1 = vpop.permute.xlu0 %1541 }
0x2638   :  { %3355 = vmatmul.mubr.msk.bf16.vlgmr.msra.gmra.mxu0 %vm294_vm2, %v1542_v1 }
0x2639   :  { %3371 = vmatpush3.bf16.msra.mxu0 %v4503_v14  ;;  %3374 = vmatprep.mubr.msk.bf16.mxu0 %vm4004_vm0, %v4003_v0 }
0x263a   :  { %3372 = vmatprep.subr.bf16.mxu0 %v4003_v0 }
0x263b   :  { %v1661_v27 = vpop.permute.xlu0 %1660 }
0x263c   :  { %3363 = vmatmul.mubr.msk.bf16.vlgmr.msra.gmra.mxu1 %vm294_vm2, %v1661_v27 }
0x263d   :  { %3373 = vmatpush3.bf16.msra.mxu0 %v4510_v26  ;;  %3387 = vmatpush3.bf16.msra.mxu1 %v4503_v14 }
0x263e   :  { %3378 = vmatprep.subr.bf16.mxu0 %v4003_v0  ;;  %3388 = vmatprep.subr.bf16.mxu1 %v4003_v0 }
0x263f   :  { %v1830_v51 = vpop.permute.xlu0 %1829 }
0x2640   :  { %3375 = vmatmul.mubr.msk.bf16.vlgmr.msra.gmra.mxu0 %vm294_vm2, %v1764_v28 }
0x2641   :  { %3379 = vmatpush3.bf16.msra.mxu0 %v4503_v14  ;;  %3382 = vmatprep.mubr.msk.bf16.mxu0 %vm4004_vm0, %v4003_v0 }
0x2642   :  { %3380 = vmatprep.subr.bf16.mxu0 %v4003_v0  ;;  %3389 = vmatpush3.bf16.msra.mxu1 %v4510_v26 }
0x2643   :  { %3402 = vmatprep.subr.bf16.mxu1 %v4003_v0 }
0x2645   :  { %3381 = vmatpush3.bf16.msra.mxu0 %v4510_v26 }
0x2646   :  { %3394 = vmatprep.subr.bf16.mxu0 %v4003_v0 }
0x26f8   :  { %v1580_v31 = vpop.f32.mrf.mxu0 }
0x26f9   :  { %v1586_v33 = vadd.f32 %v1580_v31, %v1010_v29 }
0x26fa   :  { %v3356_v35 = vpop.f32.mrf.mxu0 }
0x26fb   :  { %v3014_v57 = vmul.f32 -1.442695, %v1586_v33 }
0x26fc   :  { %v1583_v37 = vpop.f32.mrf.mxu0  ;;  %v4534_v38 = vpop.f32.mrf.mxu1 }
0x26fe   :  { %v3357_v39 = vpop.f32.mrf.mxu0  ;;  %v1724_v36 = vpop.f32.mrf.mxu1 }
0x26ff   :  { %v1725_v41 = vadd.f32 %v4536_v9, %v1724_v36 }
0x2700   :  { %v1814_v60 = vpop.f32.mrf.mxu0  ;;  %v4565_v18 = vpop.f32.mrf.mxu1 }
0x2701   :  { %v1820_v42 = vadd.f32 %v1814_v60, %v1725_v41 }
0x2702   :  { %v3376_v43 = vpop.f32.mrf.mxu0  ;;  %v1727_v4 = vpop.f32.mrf.mxu1 }
0x2703   :  { %3641 = vtanh.f32 %v1820_v42  ;;  %v3034_v10 = vmul.f32 -1.442695, %v1820_v42  ;;  %v1728_v23 = vadd.f32 %v4536_v9, %v1727_v4 }
0x2704   :  { %v1817_v61 = vpop.f32.mrf.mxu0 }
0x2705   :  { %3643 = vpow2.f32 %v3034_v10 }
0x2706   :  { %v3377_v45 = vpop.f32.mrf.mxu0 }
0x2710   :  { %v3642_v47 = vpop.eup %3641 }
0x2711   :  { %1834 = vrot.lane.b32.xlu1 %v3642_v47, %s3992_s30 }
0x2712   :  { %v3644_v24 = vpop.eup %3643 }
0x2713   :  { %v1824_v19 = vadd.f32 1.0, %v3644_v24 }
0x2715   :  { %3645 = vrcp.f32 %v1824_v19 }
0x2722   :  { %v3646_v49 = vpop.eup %3645 }
0x2723   :  { %v1832_v53 = vmul.f32 %v3646_v49, %v1830_v51 }
0x2783   :  { %v1835_v48 = vpop.permute.xlu1 %1834 }
0x2784   :  { %v1837_v50 = vmul.f32 %v3646_v49, %v1835_v48 }
0x2786   :  { %1839 = vrot.lane.b32.xlu1 %v1837_v50, %s4005_s20  ;;  %v1733_v50 = vadd.f32 %v4534_v38, %v4536_v9 }
0x27f8   :  { %v1840_v55 = vpop.permute.xlu1 %1839 }
0x27f9   :  { %v1842_v58 = vadd.f32 %v1840_v55, %v1832_v53 }
0x27fb   :  { %3647 = vtanh.f32 %v1842_v58 }
0x27fc   :  { %3649 = vtanh.f32 %v1586_v33 }
0x27fd   :  { %3651 = vpow2.f32 %v3014_v57 }
0x2808   :  { %v3648_v59 = vpop.eup %3647 }
0x2809   :  { %1845 = vrot.lane.b32.xlu0 %v3648_v59, %s3992_s30  ;;  %v3650_v30 = vpop.eup %3649 }
0x280a   :  { %v3652_v34 = vpop.eup %3651 }
0x280b   :  { %v1590_v52 = vadd.f32 1.0, %v3652_v34 }
0x280d   :  { %1596 = vrot.lane.b32.xlu0 %v3650_v30, %s3992_s30  ;;  %3653 = vrcp.f32 %v1590_v52 }
0x281a   :  { %v3654_v62 = vpop.eup %3653 }
0x281b   :  { %v1594_v56 = vmul.f32 %v3654_v62, %v4475_v11  ;;  %v1637_v11 = vsel %vm887_vm3, %v4450_v32, %v1626_v15 }
0x287b   :  { %v1846_v7 = vpop.permute.xlu0 %1845 }
0x287c   :  { %v1848_v46 = vmul.f32 %v3646_v49, %v1846_v7 }
0x287e   :  { %v4543_v20 = vpack.c.bf16 %v1848_v46, %v1848_v46 }
0x287f   :  { %v1597_v63 = vpop.permute.xlu0 %1596 }
0x2880   :  { %v1599_v3 = vmul.f32 %v3654_v62, %v1597_v63  ;;  %1851 = vrot.lane.b32.xlu1 %v4543_v20, %s4005_s20 }
0x2882   :  { %1601 = vrot.lane.b32.xlu0 %v1599_v3, %s4005_s20 }
0x28f2   :  { %v1852_v5 = vpop.permute.xlu1 %1851 }
0x28f3   :  { %3383 = vmatmul.mubr.msk.bf16.vlgmr.msra.gmra.mxu0 %vm294_vm2, %v1852_v5 }
0x28f4   :  { %v1602_v6 = vpop.permute.xlu0 %1601  ;;  %3395 = vmatpush3.bf16.msra.mxu0 %v4503_v14  ;;  %3398 = vmatprep.mubr.msk.bf16.mxu0 %vm4004_vm0, %v4003_v0 }
0x28f5   :  { %v4553_v12 = vadd.f32 %v1602_v6, %v1594_v56  ;;  %3396 = vmatprep.subr.bf16.mxu0 %v4003_v0 }
0x28f7   :  { %3655 = vtanh.f32 %v4553_v12 }
0x28f8   :  { %3397 = vmatpush3.bf16.msra.mxu0 %v4510_v26 }
0x28f9   :  { %3410 = vmatprep.subr.bf16.mxu0 %v4003_v0 }
0x2904   :  { %v3656_v13 = vpop.eup %3655 }
0x2905   :  { %1607 = vrot.lane.b32.xlu0 %v3656_v13, %s3992_s30 }
0x2909   :  { %1662 = vrot.lane.b32.xlu0 %v1637_v11, %s4005_s20  ;;  %v1736_v11 = vadd.f32 %v4565_v18, %v4536_v9 }
0x2977   :  { %v1608_v16 = vpop.permute.xlu0 %1607 }
0x2978   :  { %v4570_v36 = vmul.f32 %v3654_v62, %v1608_v16 }
0x297a   :  { %v1611_v41 = vpack.c.bf16 %v4570_v36, %v4570_v36 }
0x297b   :  { %v1663_v2 = vpop.permute.xlu0 %1662 }
0x297c   :  { %3366 = vmatprep.mubr.msk.bf16.mxu1 %vm294_vm2, %v1663_v2  ;;  %v1628_v42 = vrot.slane %v1611_v41, 4 }
0x297e   :  { %v1640_v43 = vsel %vm887_vm3, %v4490_v21, %v1628_v42 }
0x29b3   :  { %v1890_v25 = vpop.f32.mrf.mxu0 }
0x29b4   :  { %v1896_v17 = vadd.f32 %v1890_v25, %v1728_v23 }
0x29b5   :  { %v3384_v40 = vpop.f32.mrf.mxu0 }
0x29b6   :  { %3657 = vtanh.f32 %v1896_v17  ;;  %v3036_v32 = vmul.f32 -1.442695, %v1896_v17 }
0x29b7   :  { %v1893_v54 = vpop.f32.mrf.mxu0 }
0x29b8   :  { %3659 = vpow2.f32 %v3036_v32 }
0x29b9   :  { %v3385_v1 = vpop.f32.mrf.mxu0 }
0x29c3   :  { %v3658_v44 = vpop.eup %3657 }
0x29c4   :  { %1906 = vrot.lane.b32.xlu1 %v3658_v44, %s3992_s30 }
0x29c5   :  { %v3660_v27 = vpop.eup %3659 }
0x29c6   :  { %v1900_v28 = vadd.f32 1.0, %v3660_v27 }
0x29c8   :  { %3661 = vrcp.f32 %v1900_v28 }
0x29d5   :  { %v3662_v29 = vpop.eup %3661 }
0x29d6   :  { %v1904_v35 = vmul.f32 %v3662_v29, %v1842_v58 }
0x2a36   :  { %v1907_v31 = vpop.permute.xlu1 %1906 }
0x2a37   :  { %v1909_v33 = vmul.f32 %v3662_v29, %v1907_v31 }
0x2a39   :  { %1911 = vrot.lane.b32.xlu1 %v1909_v33, %s4005_s20 }
0x2aab   :  { %v1912_v37 = vpop.permute.xlu1 %1911 }
0x2aac   :  { %v1914_v39 = vadd.f32 %v1912_v37, %v1904_v35 }
0x2aae   :  { %3663 = vtanh.f32 %v1914_v39 }
0x2abb   :  { %v3664_v60 = vpop.eup %3663 }
0x2abc   :  { %1917 = vrot.lane.b32.xlu1 %v3664_v60, %s3992_s30 }
0x2ac0   :  { %1664 = vrot.lane.b32.xlu1 %v1640_v43, %s4005_s20 }
0x2b2e   :  { %v1918_v61 = vpop.permute.xlu1 %1917 }
0x2b2f   :  { %v1920_v45 = vmul.f32 %v3662_v29, %v1918_v61 }
0x2b31   :  { %v4578_v47 = vpack.c.bf16 %v1920_v45, %v1920_v45 }
0x2b32   :  { %v1665_v10 = vpop.permute.xlu1 %1664 }
0x2b33   :  { %1923 = vrot.lane.b32.xlu0 %v4578_v47, %s4005_s20  ;;  %3367 = vmatmul.mubr.msk.bf16.gmra.mxu1 %vm294_vm2, %v1665_v10 }
0x2b34   :  { %3390 = vmatprep.mubr.msk.bf16.mxu1 %vm4004_vm0, %v4003_v0 }
0x2ba5   :  { %v1924_v24 = vpop.permute.xlu0 %1923 }
0x2ba6   :  { %3391 = vmatmul.mubr.msk.bf16.vlgmr.msra.gmra.mxu1 %vm294_vm2, %v1924_v24 }
0x2ba7   :  { %3403 = vmatpush3.bf16.msra.mxu1 %v4503_v14  ;;  %3406 = vmatprep.mubr.msk.bf16.mxu1 %vm4004_vm0, %v4003_v0 }
0x2ba8   :  { %3404 = vmatprep.subr.bf16.mxu1 %v4003_v0 }
0x2bab   :  { %3405 = vmatpush3.bf16.msra.mxu1 %v4510_v26 }
0x2bac   :  { %3418 = vmatprep.subr.bf16.mxu1 %v4003_v0 }
0x2bf3   :  { %v4592_v21 = vpop.f32.mrf.mxu1 }
0x2bf5   :  { %v4594_v19 = vpop.f32.mrf.mxu1 }
0x2bf6   :  { %v1741_v41 = vadd.f32 %v4536_v9, %v4594_v19 }
0x2bf7   :  { %v4596_v49 = vpop.f32.mrf.mxu1 }
0x2bf9   :  { %v4598_v48 = vpop.f32.mrf.mxu1 }
0x2c66   :  { %v1962_v51 = vpop.f32.mrf.mxu1 }
0x2c67   :  { %v1968_v53 = vadd.f32 %v1962_v51, %v1733_v50 }
0x2c68   :  { %v3392_v55 = vpop.f32.mrf.mxu1 }
0x2c69   :  { %3665 = vtanh.f32 %v1968_v53  ;;  %v3038_v57 = vmul.f32 -1.442695, %v1968_v53 }
0x2c6a   :  { %v1965_v58 = vpop.f32.mrf.mxu1 }
0x2c6b   :  { %3667 = vpow2.f32 %v3038_v57 }
0x2c6c   :  { %v3393_v59 = vpop.f32.mrf.mxu1 }
0x2c76   :  { %v3666_v30 = vpop.eup %3665 }
0x2c77   :  { %1978 = vrot.lane.b32.xlu1 %v3666_v30, %s3992_s30 }
0x2c78   :  { %v3668_v34 = vpop.eup %3667 }
0x2c79   :  { %v1972_v52 = vadd.f32 1.0, %v3668_v34 }
0x2c7b   :  { %3669 = vrcp.f32 %v1972_v52 }
0x2c88   :  { %v3670_v7 = vpop.eup %3669 }
0x2c89   :  { %v1976_v38 = vmul.f32 %v3670_v7, %v1914_v39 }
0x2ce9   :  { %v1979_v46 = vpop.permute.xlu1 %1978 }
0x2cea   :  { %v1981_v62 = vmul.f32 %v3670_v7, %v1979_v46 }
0x2cec   :  { %1983 = vrot.lane.b32.xlu0 %v1981_v62, %s4005_s20  ;;  %v1744_v62 = vadd.f32 %v4536_v9, %v4598_v48 }
0x2d5e   :  { %v1984_v63 = vpop.permute.xlu0 %1983 }
0x2d5f   :  { %v1986_v3 = vadd.f32 %v1984_v63, %v1976_v38 }
0x2d61   :  { %3671 = vtanh.f32 %v1986_v3 }
0x2d6e   :  { %v3672_v5 = vpop.eup %3671 }
0x2d6f   :  { %1989 = vrot.lane.b32.xlu1 %v3672_v5, %s3992_s30 }
0x2de1   :  { %v1990_v56 = vpop.permute.xlu1 %1989 }
0x2de2   :  { %v1992_v6 = vmul.f32 %v3670_v7, %v1990_v56 }
0x2de4   :  { %v4605_v13 = vpack.c.bf16 %v1992_v6, %v1992_v6 }
0x2de6   :  { %1995 = vrot.lane.b32.xlu0 %v4605_v13, %s4005_s20 }
0x2e58   :  { %v1996_v15 = vpop.permute.xlu0 %1995 }
0x2e59   :  { %3399 = vmatmul.mubr.msk.bf16.vlgmr.msra.gmra.mxu0 %vm294_vm2, %v1996_v15 }
0x2e5a   :  { %3411 = vmatpush3.bf16.msra.mxu0 %v4503_v14  ;;  %3414 = vmatprep.mubr.msk.bf16.mxu0 %vm4004_vm0, %v4003_v0 }
0x2e5b   :  { %3412 = vmatprep.subr.bf16.mxu0 %v4003_v0 }
0x2e5e   :  { %3413 = vmatpush3.bf16.msra.mxu0 %v4510_v26 }
0x2e5f   :  { %3426 = vmatprep.subr.bf16.mxu0 %v4003_v0 }
0x2f19   :  { %v2034_v16 = vpop.f32.mrf.mxu0 }
0x2f1a   :  { %v2040_v2 = vadd.f32 %v2034_v16, %v1736_v11 }
0x2f1b   :  { %v3400_v4 = vpop.f32.mrf.mxu0 }
0x2f1c   :  { %3673 = vtanh.f32 %v2040_v2  ;;  %v3040_v40 = vmul.f32 -1.442695, %v2040_v2 }
0x2f1d   :  { %v2037_v23 = vpop.f32.mrf.mxu0 }
0x2f1e   :  { %3675 = vpow2.f32 %v3040_v40 }
0x2f1f   :  { %v3401_v25 = vpop.f32.mrf.mxu0 }
0x2f29   :  { %v3674_v17 = vpop.eup %3673 }
0x2f2a   :  { %2050 = vrot.lane.b32.xlu1 %v3674_v17, %s3992_s30 }
0x2f2b   :  { %v3676_v54 = vpop.eup %3675 }
0x2f2c   :  { %v2044_v1 = vadd.f32 1.0, %v3676_v54 }
0x2f2e   :  { %3677 = vrcp.f32 %v2044_v1  ;;  %v1749_v1 = vadd.f32 %v4592_v21, %v4536_v9 }
0x2f3b   :  { %v3678_v44 = vpop.eup %3677 }
0x2f3c   :  { %v2048_v18 = vmul.f32 %v3678_v44, %v1986_v3 }
0x2f9c   :  { %v2051_v32 = vpop.permute.xlu1 %2050 }
0x2f9d   :  { %v2053_v27 = vmul.f32 %v3678_v44, %v2051_v32 }
0x2f9f   :  { %2055 = vrot.lane.b32.xlu0 %v2053_v27, %s4005_s20 }
0x3011   :  { %v2056_v28 = vpop.permute.xlu0 %2055 }
0x3012   :  { %v2058_v29 = vadd.f32 %v2056_v28, %v2048_v18 }
0x3014   :  { %3679 = vtanh.f32 %v2058_v29 }
0x3021   :  { %v3680_v31 = vpop.eup %3679 }
0x3022   :  { %2061 = vrot.lane.b32.xlu1 %v3680_v31, %s3992_s30 }
0x3094   :  { %v2062_v33 = vpop.permute.xlu1 %2061 }
0x3095   :  { %v2064_v35 = vmul.f32 %v3678_v44, %v2062_v33 }
0x3097   :  { %v4621_v37 = vpack.c.bf16 %v2064_v35, %v2064_v35 }
0x3099   :  { %2067 = vrot.lane.b32.xlu0 %v4621_v37, %s4005_s20 }
0x310b   :  { %v2068_v39 = vpop.permute.xlu0 %2067 }
0x310c   :  { %3407 = vmatmul.mubr.msk.bf16.vlgmr.msra.gmra.mxu1 %vm294_vm2, %v2068_v39 }
0x310d   :  { %3419 = vmatpush3.bf16.msra.mxu1 %v4503_v14  ;;  %3422 = vmatprep.mubr.msk.bf16.mxu1 %vm4004_vm0, %v4003_v0 }
0x310e   :  { %3420 = vmatprep.subr.bf16.mxu1 %v4003_v0 }
0x3111   :  { %3421 = vmatpush3.bf16.msra.mxu1 %v4510_v26 }
0x31cc   :  { %v2106_v60 = vpop.f32.mrf.mxu1 }
0x31cd   :  { %v2112_v42 = vadd.f32 %v2106_v60, %v1741_v41 }
0x31ce   :  { %v3408_v43 = vpop.f32.mrf.mxu1 }
0x31cf   :  { %3681 = vtanh.f32 %v2112_v42  ;;  %v3042_v24 = vmul.f32 -1.442695, %v2112_v42 }
0x31d0   :  { %v2109_v61 = vpop.f32.mrf.mxu1 }
0x31d1   :  { %3683 = vpow2.f32 %v3042_v24 }
0x31d2   :  { %v3409_v45 = vpop.f32.mrf.mxu1 }
0x31dc   :  { %v3682_v10 = vpop.eup %3681 }
0x31dd   :  { %2122 = vrot.lane.b32.xlu1 %v3682_v10, %s3992_s30 }
0x31de   :  { %v3684_v50 = vpop.eup %3683 }
0x31df   :  { %v2116_v51 = vadd.f32 1.0, %v3684_v50 }
0x31e1   :  { %3685 = vrcp.f32 %v2116_v51  ;;  %v1752_v51 = vadd.f32 %v4596_v49, %v4536_v9 }
0x31ee   :  { %v3686_v53 = vpop.eup %3685 }
0x31ef   :  { %v2120_v19 = vmul.f32 %v3686_v53, %v2058_v29 }
0x324f   :  { %v2123_v55 = vpop.permute.xlu1 %2122 }
0x3250   :  { %v2125_v58 = vmul.f32 %v3686_v53, %v2123_v55 }
0x3252   :  { %2127 = vrot.lane.b32.xlu0 %v2125_v58, %s4005_s20 }
0x32c4   :  { %v2128_v59 = vpop.permute.xlu0 %2127 }
0x32c5   :  { %v2130_v30 = vadd.f32 %v2128_v59, %v2120_v19 }
0x32c7   :  { %3687 = vtanh.f32 %v2130_v30 }
0x32d4   :  { %v3688_v57 = vpop.eup %3687 }
0x32d5   :  { %2133 = vrot.lane.b32.xlu1 %v3688_v57, %s3992_s30 }
0x3347   :  { %v2134_v34 = vpop.permute.xlu1 %2133 }
0x3348   :  { %v2136_v52 = vmul.f32 %v3686_v53, %v2134_v34 }
0x334a   :  { %v4636_v7 = vpack.c.bf16 %v2136_v52, %v2136_v52 }
0x334c   :  { %2139 = vrot.lane.b32.xlu0 %v4636_v7, %s4005_s20 }
0x33be   :  { %v2140_v46 = vpop.permute.xlu0 %2139 }
0x33bf   :  { %3415 = vmatmul.mubr.msk.bf16.vlgmr.msra.gmra.mxu0 %vm294_vm2, %v2140_v46 }
0x33c0   :  { %3427 = vmatpush3.bf16.msra.mxu0 %v4503_v14  ;;  %3430 = vmatprep.mubr.msk.bf16.mxu0 %vm4004_vm0, %v4003_v0 }
0x33c1   :  { %3428 = vmatprep.subr.bf16.mxu0 %v4003_v0 }
0x33c4   :  { %3429 = vmatpush3.bf16.msra.mxu0 %v4510_v26 }
0x347f   :  { %v2178_v38 = vpop.f32.mrf.mxu0 }
0x3480   :  { %v2184_v63 = vadd.f32 %v2178_v38, %v1744_v62 }
0x3481   :  { %v3416_v3 = vpop.f32.mrf.mxu0 }
0x3482   :  { %3689 = vtanh.f32 %v2184_v63  ;;  %v3044_v14 = vmul.f32 -1.442695, %v2184_v63  ;;  %v2366_v63 = vrot.slane %v4578_v47, 4 }
0x3483   :  { %v2181_v5 = vpop.f32.mrf.mxu0 }
0x3484   :  { %3691 = vpow2.f32 %v3044_v14  ;;  %v2373_v49 = vsel %vm887_vm3, %v4543_v20, %v2366_v63  ;;  %v3515_v5 = vld [vmem:[%s4793_s7 + $0x8] sm:$0xff]   ;;  %v3518_v14 = vld [vmem:[%s4795_s9] sm:$0xff]  }
0x3485   :  { %v3417_v56 = vpop.f32.mrf.mxu0  ;;  %3434 = vmatprep.subr.bf16.mxu1 %v3515_v5 }
0x3486   :  { %v3516_v56 = vld [vmem:[%s4795_s9 + $0x8] sm:$0xff]  }
0x3487   :  { %3446 = vmatprep.subr.bf16.mxu0 %v3516_v56 }
0x348f   :  { %v3690_v6 = vpop.eup %3689 }
0x3490   :  { %2194 = vrot.lane.b32.xlu1 %v3690_v6, %s3992_s30  ;;  %v3517_v6 = vld [vmem:[%s4793_s7] sm:$0xff]   ;;  %s4006_s7 = smov 96  }
0x3491   :  { %v3692_v15 = vpop.eup %3691 }
0x3492   :  { %v2188_v11 = vadd.f32 1.0, %v3692_v15 }
0x3494   :  { %3693 = vrcp.f32 %v2188_v11 }
0x34a1   :  { %v3694_v0 = vpop.eup %3693 }
0x34a2   :  { %v2192_v48 = vmul.f32 %v3694_v0, %v2130_v30 }
0x3502   :  { %v2195_v16 = vpop.permute.xlu1 %2194 }
0x3503   :  { %v2197_v26 = vmul.f32 %v3694_v0, %v2195_v16 }
0x3505   :  { %2199 = vrot.lane.b32.xlu0 %v2197_v26, %s4005_s20 }
0x3577   :  { %v2200_v2 = vpop.permute.xlu0 %2199 }
0x3578   :  { %v2202_v4 = vadd.f32 %v2200_v2, %v2192_v48 }
0x357a   :  { %3695 = vtanh.f32 %v2202_v4 }
0x3587   :  { %v3696_v23 = vpop.eup %3695 }
0x3588   :  { %2205 = vrot.lane.b32.xlu1 %v3696_v23, %s3992_s30 }
0x35fa   :  { %v2206_v25 = vpop.permute.xlu1 %2205 }
0x35fb   :  { %v2208_v17 = vmul.f32 %v3694_v0, %v2206_v25  ;;  %v2367_v0 = vrot.slane %v4621_v37, 4  ;;  %v3519_v37 = vld [vmem:[#allocation10] sm:$0xff]  }
0x35fd   :  { %v2209_v40 = vpack.c.bf16 %v2208_v17, %v2208_v17  ;;  %v2376_v26 = vsel %vm887_vm3, %v4605_v13, %v2367_v0  ;;  %v3520_v17 = vld [vmem:[#allocation11] sm:$0xff]  }
0x35ff   :  { %2211 = vrot.lane.b32.xlu0 %v2209_v40, %s4005_s20  ;;  %v2368_v9 = vrot.slane %v2209_v40, 4 }
0x3601   :  { %v2379_v3 = vsel %vm887_vm3, %v4636_v7, %v2368_v9 }
0x3671   :  { %v2212_v54 = vpop.permute.xlu0 %2211 }
0x3672   :  { %3423 = vmatmul.mubr.msk.bf16.vlgmr.msra.gmra.mxu1 %vm294_vm2, %v2212_v54 }
0x3673   :  { %3435 = vmatpush3.bf16.msra.mxu1 %v3515_v5 }
0x3674   :  { %3436 = vmatprep.subr.bf16.mxu1 %v3517_v6 }
0x3677   :  { %3437 = vmatpush3.bf16.msra.mxu1 %v3517_v6 }
0x3678   :  { %3458 = vmatprep.subr.bf16.mxu1 %v3519_v37 }
0x3732   :  { %v2250_v44 = vpop.f32.mrf.mxu1 }
0x3733   :  { %v2256_v32 = vadd.f32 %v2250_v44, %v1749_v1  ;;  %v4715_v44 = vld [vmem:[#allocation8] ss:$0 sm:$0xff] }
0x3734   :  { %v3424_v27 = vpop.f32.mrf.mxu1 }
0x3735   :  { %3697 = vtanh.f32 %v2256_v32  ;;  %v3046_v31 = vmul.f32 -1.442695, %v2256_v32  ;;  %v4720_v32 = vld [vmem:[%s4796_s10] ss:$0 sm:$0xff] }
0x3736   :  { %v2253_v18 = vpop.f32.mrf.mxu1 }
0x3737   :  { %3699 = vpow2.f32 %v3046_v31 }
0x3738   :  { %v3425_v28 = vpop.f32.mrf.mxu1 }
0x3742   :  { %v3698_v29 = vpop.eup %3697 }
0x3743   :  { %2266 = vrot.lane.b32.xlu1 %v3698_v29, %s3992_s30 }
0x3744   :  { %v3700_v33 = vpop.eup %3699 }
0x3745   :  { %v2260_v35 = vadd.f32 1.0, %v3700_v33 }
0x3747   :  { %3701 = vrcp.f32 %v2260_v35 }
0x3754   :  { %v3702_v39 = vpop.eup %3701 }
0x3755   :  { %v2264_v21 = vmul.f32 %v3702_v39, %v2202_v4 }
0x37b5   :  { %v2267_v41 = vpop.permute.xlu1 %2266 }
0x37b6   :  { %v2269_v60 = vmul.f32 %v3702_v39, %v2267_v41 }
0x37b8   :  { %2271 = vrot.lane.b32.xlu0 %v2269_v60, %s4005_s20 }
0x382a   :  { %v2272_v42 = vpop.permute.xlu0 %2271 }
0x382b   :  { %v2274_v43 = vadd.f32 %v2272_v42, %v2264_v21 }
0x382d   :  { %3703 = vtanh.f32 %v2274_v43 }
0x383a   :  { %v3704_v61 = vpop.eup %3703 }
0x383b   :  { %2277 = vrot.lane.b32.xlu1 %v3704_v61, %s3992_s30 }
0x38ad   :  { %v2278_v45 = vpop.permute.xlu1 %2277 }
0x38ae   :  { %v2280_v10 = vmul.f32 %v3702_v39, %v2278_v45 }
0x38b0   :  { %v4658_v24 = vpack.c.bf16 %v2280_v10, %v2280_v10 }
0x38b2   :  { %2283 = vrot.lane.b32.xlu0 %v4658_v24, %s4005_s20 }
0x3924   :  { %v2284_v50 = vpop.permute.xlu0 %2283 }
0x3925   :  { %3431 = vmatmul.mubr.msk.bf16.vlgmr.msra.gmra.mxu0 %vm294_vm2, %v2284_v50 }
0x3926   :  { %3447 = vmatpush3.bf16.msra.mxu0 %v3516_v56 }
0x3927   :  { %3448 = vmatprep.subr.bf16.mxu0 %v3518_v14 }
0x392a   :  { %3449 = vmatpush3.bf16.msra.mxu0 %v3518_v14 }
0x392b   :  { %3468 = vmatprep.subr.bf16.mxu0 %v3520_v17 }
0x39e5   :  { %v2322_v53 = vpop.f32.mrf.mxu0 }
0x39e6   :  { %v2328_v55 = vadd.f32 %v2322_v53, %v1752_v51 }
0x39e7   :  { %v3432_v58 = vpop.f32.mrf.mxu0 }
0x39e8   :  { %3705 = vtanh.f32 %v2328_v55  ;;  %v3048_v57 = vmul.f32 -1.442695, %v2328_v55 }
0x39e9   :  { %v2325_v19 = vpop.f32.mrf.mxu0 }
0x39ea   :  { %3707 = vpow2.f32 %v3048_v57 }
0x39eb   :  { %v3433_v59 = vpop.f32.mrf.mxu0 }
0x39f5   :  { %v3706_v30 = vpop.eup %3705 }
0x39f6   :  { %2338 = vrot.lane.b32.xlu1 %v3706_v30, %s3992_s30 }
0x39f7   :  { %v3708_v34 = vpop.eup %3707 }
0x39f8   :  { %v2332_v52 = vadd.f32 1.0, %v3708_v34 }
0x39fa   :  { %3709 = vrcp.f32 %v2332_v52 }
0x3a07   :  { %v3710_v46 = vpop.eup %3709 }
0x3a08   :  { %v2336_v20 = vmul.f32 %v3710_v46, %v2274_v43 }
0x3a68   :  { %v2339_v62 = vpop.permute.xlu1 %2338 }
0x3a69   :  { %v2341_v38 = vmul.f32 %v3710_v46, %v2339_v62 }
0x3a6b   :  { %2343 = vrot.lane.b32.xlu0 %v2341_v38, %s4005_s20 }
0x3a6f   :  { %2398 = vrot.lane.b32.xlu0 %v2373_v49, %s4005_s20 }
0x3a73   :  { %2402 = vrot.lane.b32.xlu0 %v2379_v3, %s4005_s20 }
0x3a77   :  { %873 = vrot.lane.b32.xlu0 %v4384_v8, %s4005_s20 }
0x3a7b   :  { %1613 = vrot.lane.b32.xlu0 %v4570_v36, %s4005_s20 }
0x3add   :  { %v2344_v47 = vpop.permute.xlu0 %2343 }
0x3ade   :  { %v2346_v7 = vadd.f32 %v2344_v47, %v2336_v20 }
0x3ae0   :  { %3711 = vtanh.f32 %v2346_v7 }
0x3ae1   :  { %v2399_v15 = vpop.permute.xlu0 %2398 }
0x3ae2   :  { %3438 = vmatprep.mubr.msk.bf16.mxu1 %vm294_vm2, %v2399_v15  ;;  %3450 = vmatprep.mubr.msk.bf16.mxu0 %vm294_vm2, %v2399_v15 }
0x3ae5   :  { %v2403_v8 = vpop.permute.xlu0 %2402 }
0x3ae9   :  { %v874_v36 = vpop.permute.xlu0 %873 }
0x3aea   :  { %876 = vst.msk [vmem:[#allocation16] sm:$0xff] %vm294_vm2, %v874_v36 }
0x3aed   :  { %v3712_v11 = vpop.eup %3711  ;;  %v1614_v16 = vpop.permute.xlu0 %1613 }
0x3aee   :  { %1617 = vst.msk [vmem:[#allocation16 + $0x8] sm:$0xff] %vm294_vm2, %v1614_v16  ;;  %2349 = vrot.lane.b32.xlu1 %v3712_v11, %s3992_s30 }
0x3af2   :  { %2400 = vrot.lane.b32.xlu1 %v2376_v26, %s4005_s20 }
0x3b60   :  { %v2350_v48 = vpop.permute.xlu1 %2349 }
0x3b61   :  { %v2352_v2 = vmul.f32 %v3710_v46, %v2350_v48 }
0x3b63   :  { %v2353_v4 = vpack.c.bf16 %v2352_v2, %v2352_v2  ;;  %2355 = vrot.lane.b32.xlu0 %v2352_v2, %s4005_s20 }
0x3b64   :  { %v2401_v23 = vpop.permute.xlu1 %2400 }
0x3b65   :  { %v2370_v25 = vrot.slane %v2353_v4, 4  ;;  %3439 = vmatmul.mubr.msk.bf16.vlgmr.msra.gmra.mxu1 %vm294_vm2, %v2401_v23  ;;  %3451 = vmatmul.mubr.msk.bf16.vlgmr.msra.gmra.mxu0 %vm294_vm2, %v2401_v23 }
0x3b66   :  { %3442 = vmatprep.mubr.msk.bf16.mxu1 %vm294_vm2, %v2403_v8  ;;  %3454 = vmatprep.mubr.msk.bf16.mxu0 %vm294_vm2, %v2403_v8 }
0x3b67   :  { %v2382_v13 = vsel %vm887_vm3, %v4658_v24, %v2370_v25  ;;  %3459 = vmatpush3.bf16.msra.mxu1 %v3519_v37  ;;  %3469 = vmatpush3.bf16.msra.mxu0 %v3520_v17 }
0x3b68   :  { %2404 = vrot.lane.b32.xlu1 %v2382_v13, %s4005_s20 }
0x3b6c   :  { %878 = vrot.lane.b32.xlu1 %v4367_v22, %s4006_s7 }
0x3b70   :  { %1619 = vrot.lane.b32.xlu1 %v4553_v12, %s4006_s7 }
0x3b74   :  { %2361 = vrot.lane.b32.xlu1 %v2346_v7, %s4006_s7 }
0x3bd5   :  { %v2356_v40 = vpop.permute.xlu0 %2355 }
0x3bd6   :  { %2359 = vst.msk [vmem:[#allocation16 + $0x10] sm:$0xff] %vm294_vm2, %v2356_v40 }
0x3bda   :  { %v2405_v54 = vpop.permute.xlu1 %2404 }
0x3bdb   :  { %3443 = vmatmul.mubr.msk.bf16.gmra.mxu1 %vm294_vm2, %v2405_v54  ;;  %3455 = vmatmul.mubr.msk.bf16.gmra.mxu0 %vm294_vm2, %v2405_v54 }
0x3bde   :  { %v879_v1 = vpop.permute.xlu1 %878 }
0x3bdf   :  { %881 = vst.msk [vmem:[#allocation17] sm:$0xff] %vm294_vm2, %v879_v1 }
0x3be2   :  { %v1620_v22 = vpop.permute.xlu1 %1619 }
0x3be3   :  { %1623 = vst.msk [vmem:[#allocation17 + $0x8] sm:$0xff] %vm294_vm2, %v1620_v22 }
0x3be6   :  { %v2362_v12 = vpop.permute.xlu1 %2361 }
0x3be7   :  { %2365 = vst.msk [vmem:[#allocation17 + $0x10] sm:$0xff] %vm294_vm2, %v2362_v12 }
0x3c25   :  { %v3440_v27 = vpop.f32.mrf.mxu1  ;;  %v3452_v18 = vpop.f32.mrf.mxu0 }
0x3c26   :  { %v2473_v28 = vadd.f32 %v3440_v27, %v4715_v44  ;;  %v2609_v29 = vadd.f32 %v3452_v18, %v4720_v32 }
0x3c27   :  { %v2464_v31 = vpop.f32.mrf.mxu1  ;;  %v2600_v33 = vpop.f32.mrf.mxu0 }
0x3c28   :  { %v3058_v35 = vmul.f32 -1.442695, %v2473_v28  ;;  %v3073_v39 = vmul.f32 -1.442695, %v2609_v29  ;;  %v2465_v41 = vadd.f32 %v4715_v44, %v2464_v31  ;;  %v2601_v60 = vadd.f32 %v4720_v32, %v2600_v33 }
0x3c29   :  { %v3441_v21 = vpop.f32.mrf.mxu1  ;;  %v3453_v42 = vpop.f32.mrf.mxu0 }
0x3c2a   :  { %3713 = vpow2.f32 %v3058_v35  ;;  %v3056_v43 = vmul.f32 -1.442695, %v2465_v41  ;;  %v3071_v61 = vmul.f32 -1.442695, %v2601_v60  ;;  %v2476_v45 = vadd.f32 %v3441_v21, %v4715_v44 }
0x3c2b   :  { %3715 = vpow2.f32 %v3073_v39  ;;  %v2612_v10 = vadd.f32 %v3453_v42, %v4720_v32  ;;  %v2467_v24 = vpop.f32.mrf.mxu1  ;;  %v2603_v50 = vpop.f32.mrf.mxu0 }
0x3c2c   :  { %3717 = vpow2.f32 %v3056_v43  ;;  %v3059_v51 = vmul.f32 -1.442695, %v2476_v45  ;;  %v2468_v53 = vadd.f32 %v4715_v44, %v2467_v24  ;;  %v2604_v55 = vadd.f32 %v4720_v32, %v2603_v50 }
0x3c2d   :  { %3719 = vpow2.f32 %v3071_v61  ;;  %v3074_v58 = vmul.f32 -1.442695, %v2612_v10 }
0x3c2e   :  { %3721 = vpow2.f32 %v3059_v51  ;;  %v3057_v19 = vmul.f32 -1.442695, %v2468_v53  ;;  %v3072_v59 = vmul.f32 -1.442695, %v2604_v55 }
0x3c2f   :  { %3723 = vpow2.f32 %v3074_v58 }
0x3c30   :  { %3725 = vpow2.f32 %v3057_v19 }
0x3c31   :  { %3727 = vpow2.f32 %v3072_v59 }
0x3c37   :  { %v3714_v30 = vpop.eup %3713 }
0x3c38   :  { %v3716_v57 = vpop.eup %3715  ;;  %v2521_v34 = vadd.f32 1.0, %v3714_v30 }
0x3c39   :  { %v3718_v52 = vpop.eup %3717  ;;  %v2657_v20 = vadd.f32 1.0, %v3716_v57 }
0x3c3a   :  { %v3720_v46 = vpop.eup %3719  ;;  %v2519_v62 = vadd.f32 1.0, %v3718_v52  ;;  %3729 = vrcp.f32 %v2521_v34 }
0x3c3b   :  { %v3722_v38 = vpop.eup %3721  ;;  %v2655_v63 = vadd.f32 1.0, %v3720_v46 }
0x3c3c   :  { %v3724_v9 = vpop.eup %3723  ;;  %3731 = vrcp.f32 %v2519_v62  ;;  %v2522_v49 = vadd.f32 1.0, %v3722_v38 }
0x3c3d   :  { %v3726_v3 = vpop.eup %3725  ;;  %3733 = vrcp.f32 %v2655_v63  ;;  %v2658_v5 = vadd.f32 1.0, %v3724_v9 }
0x3c3e   :  { %v3728_v56 = vpop.eup %3727  ;;  %3735 = vrcp.f32 %v2522_v49  ;;  %v2520_v47 = vadd.f32 1.0, %v3726_v3 }
0x3c3f   :  { %3737 = vrcp.f32 %v2658_v5  ;;  %v2656_v7 = vadd.f32 1.0, %v3728_v56 }
0x3c40   :  { %3739 = vrcp.f32 %v2520_v47 }
0x3c41   :  { %3741 = vrcp.f32 %v2656_v7 }
0x3c42   :  { %3743 = vrcp.f32 %v2657_v20 }
0x3c47   :  { %v3730_v6 = vpop.eup %3729 }
0x3c49   :  { %v3732_v14 = vpop.eup %3731 }
0x3c4a   :  { %v3734_v15 = vpop.eup %3733 }
0x3c4b   :  { %v3736_v8 = vpop.eup %3735 }
0x3c4c   :  { %v3738_v36 = vpop.eup %3737  ;;  %v2680_v2 = vpack.c.bf16 %v3736_v8, %v3730_v6  ;;  %v3079_v6 = vld [vmem:[%s4798_s12] ss:$0 sm:$0xff]  ;;  %s3897_s12 = scalar_lea.vmem %s2930_s22, 384 }
0x3c4d   :  { %v3740_v11 = vpop.eup %3739  ;;  %p3898_p2 = scmp.ne.s32.totalorder %s2930_s22, %s3897_s12  ;;  %p3903_p4 = scmp.lt.s32.totalorder %s3897_s12, %s3897_s12 }
0x3c4e   :  { %v3742_v0 = vpop.eup %3741  ;;  %v2679_v16 = vpack.c.bf16 %v3740_v11, %v3732_v14  ;;  %v4752_v14 = vld [vmem:[%s4800_s14] ss:$0 sm:$0xff] }
0x3c4f   :  { %v3744_v26 = vpop.eup %3743  ;;  %v2784_v48 = vpack.c.bf16 %v3742_v0, %v3734_v15  ;;  %p3904_p5 = por %p3903_p4, %p3902_p3 }
0x3c50   :  { %3460 = vmatprep.mubr.msk.bf16.mxu1 %vm2698_vm4, %v2679_v16  ;;  %v2785_v4 = vpack.c.bf16 %v3738_v36, %v3744_v26 }
0x3c51   :  { %3470 = vmatprep.mubr.msk.bf16.mxu0 %vm2698_vm4, %v2784_v48  ;;  %3461 = vmatmul.mubr.msk.bf16.vlgmr.msra.gmra.mxu1 %vm2698_vm4, %v2680_v2  ;;  %p3905_p6 = pnand %p3904_p5, %p3898_p2 }
0x3c52   :  { %3471 = vmatmul.mubr.msk.bf16.vlgmr.msra.gmra.mxu0 %vm2698_vm4, %v2785_v4 }
0x3c9b   :  { %v3444_v23 = vpop.f32.mrf.mxu1  ;;  %v3456_v25 = vpop.f32.mrf.mxu0 }
0x3c9c   :  { %v2489_v13 = vadd.f32 %v3444_v23, %v4715_v44  ;;  %v2625_v37 = vadd.f32 %v3456_v25, %v4720_v32 }
0x3c9d   :  { %v2480_v17 = vpop.f32.mrf.mxu1  ;;  %v2616_v40 = vpop.f32.mrf.mxu0 }
0x3c9e   :  { %v3062_v54 = vmul.f32 -1.442695, %v2489_v13  ;;  %v3077_v1 = vmul.f32 -1.442695, %v2625_v37  ;;  %v2481_v22 = vadd.f32 %v4715_v44, %v2480_v17  ;;  %v2617_v12 = vadd.f32 %v4720_v32, %v2616_v40 }
0x3c9f   :  { %v3445_v27 = vpop.f32.mrf.mxu1  ;;  %v3457_v18 = vpop.f32.mrf.mxu0 }
0x3ca0   :  { %3745 = vpow2.f32 %v3062_v54  ;;  %v3060_v28 = vmul.f32 -1.442695, %v2481_v22  ;;  %v3075_v29 = vmul.f32 -1.442695, %v2617_v12  ;;  %v2492_v31 = vadd.f32 %v3445_v27, %v4715_v44 }
0x3ca1   :  { %3747 = vpow2.f32 %v3077_v1  ;;  %v2628_v33 = vadd.f32 %v3457_v18, %v4720_v32  ;;  %v2483_v35 = vpop.f32.mrf.mxu1  ;;  %v2619_v39 = vpop.f32.mrf.mxu0 }
0x3ca2   :  { %3749 = vpow2.f32 %v3060_v28  ;;  %v3063_v41 = vmul.f32 -1.442695, %v2492_v31  ;;  %v2484_v60 = vadd.f32 %v4715_v44, %v2483_v35  ;;  %v2620_v21 = vadd.f32 %v4720_v32, %v2619_v39 }
0x3ca3   :  { %3751 = vpow2.f32 %v3075_v29  ;;  %v3078_v42 = vmul.f32 -1.442695, %v2628_v33 }
0x3ca4   :  { %3753 = vpow2.f32 %v3063_v41  ;;  %v3061_v43 = vmul.f32 -1.442695, %v2484_v60  ;;  %v3076_v61 = vmul.f32 -1.442695, %v2620_v21 }
0x3ca5   :  { %3755 = vpow2.f32 %v3078_v42 }
0x3ca6   :  { %3757 = vpow2.f32 %v3061_v43 }
0x3ca7   :  { %3759 = vpow2.f32 %v3076_v61 }
0x3cad   :  { %v3746_v45 = vpop.eup %3745 }
0x3cae   :  { %v3748_v10 = vpop.eup %3747  ;;  %v2525_v24 = vadd.f32 1.0, %v3746_v45 }
0x3caf   :  { %v3750_v50 = vpop.eup %3749  ;;  %v2661_v57 = vadd.f32 1.0, %v3748_v10 }
0x3cb0   :  { %v3752_v51 = vpop.eup %3751  ;;  %v2523_v53 = vadd.f32 1.0, %v3750_v50  ;;  %3761 = vrcp.f32 %v2525_v24 }
0x3cb1   :  { %v3754_v55 = vpop.eup %3753  ;;  %v2659_v58 = vadd.f32 1.0, %v3752_v51 }
0x3cb2   :  { %v3756_v44 = vpop.eup %3755  ;;  %3763 = vrcp.f32 %v2523_v53  ;;  %v2526_v32 = vadd.f32 1.0, %v3754_v55 }
0x3cb3   :  { %v3758_v19 = vpop.eup %3757  ;;  %3765 = vrcp.f32 %v2659_v58  ;;  %v2662_v59 = vadd.f32 1.0, %v3756_v44 }
0x3cb4   :  { %v3760_v30 = vpop.eup %3759  ;;  %3767 = vrcp.f32 %v2526_v32  ;;  %v2524_v34 = vadd.f32 1.0, %v3758_v19 }
0x3cb5   :  { %3769 = vrcp.f32 %v2662_v59  ;;  %v2660_v52 = vadd.f32 1.0, %v3760_v30 }
0x3cb6   :  { %3771 = vrcp.f32 %v2524_v34 }
0x3cb7   :  { %3773 = vrcp.f32 %v2660_v52 }
0x3cb8   :  { %3775 = vrcp.f32 %v2661_v57 }
0x3cbd   :  { %v3762_v46 = vpop.eup %3761 }
0x3cbf   :  { %v3764_v62 = vpop.eup %3763 }
0x3cc0   :  { %v3766_v38 = vpop.eup %3765 }
0x3cc1   :  { %v3768_v63 = vpop.eup %3767 }
0x3cc2   :  { %v3770_v9 = vpop.eup %3769  ;;  %v2682_v47 = vpack.c.bf16 %v3768_v63, %v3762_v46 }
0x3cc3   :  { %v3772_v49 = vpop.eup %3771 }
0x3cc4   :  { %v3774_v3 = vpop.eup %3773  ;;  %v2681_v5 = vpack.c.bf16 %v3772_v49, %v3764_v62 }
0x3cc5   :  { %v3776_v56 = vpop.eup %3775  ;;  %v2786_v20 = vpack.c.bf16 %v3774_v3, %v3766_v38 }
0x3cc6   :  { %3464 = vmatprep.mubr.msk.bf16.mxu1 %vm2698_vm4, %v2681_v5  ;;  %v2787_v7 = vpack.c.bf16 %v3770_v9, %v3776_v56 }
0x3cc7   :  { %3474 = vmatprep.mubr.msk.bf16.mxu0 %vm2698_vm4, %v2786_v20  ;;  %3465 = vmatmul.mubr.msk.bf16.gmra.mxu1 %vm2698_vm4, %v2682_v47 }
0x3cc8   :  { %3475 = vmatmul.mubr.msk.bf16.gmra.mxu0 %vm2698_vm4, %v2787_v7 }
0x3d11   :  { %v3462_v15 = vpop.f32.mrf.mxu1 }
0x3d12   :  { %v2754_v8 = vadd.f32 %v3462_v15, %v3079_v6  ;;  %v3472_v36 = vpop.f32.mrf.mxu0 }
0x3d13   :  { %v2858_v11 = vadd.f32 %v3472_v36, %v4752_v14  ;;  %v2745_v0 = vpop.f32.mrf.mxu1 }
0x3d14   :  { %2778 = vst [vmem:[#allocation13 + $0x10] sm:$0xff] %v2754_v8  ;;  %v2746_v16 = vadd.f32 %v3079_v6, %v2745_v0  ;;  %v2849_v26 = vpop.f32.mrf.mxu0 }
0x3d15   :  { %2882 = vst [vmem:[#allocation14 + $0x10] sm:$0xff] %v2858_v11  ;;  %v2850_v48 = vadd.f32 %v4752_v14, %v2849_v26  ;;  %v3463_v2 = vpop.f32.mrf.mxu1 }
0x3d16   :  { %2776 = vst [vmem:[#allocation13] sm:$0xff] %v2746_v16  ;;  %v2757_v4 = vadd.f32 %v3463_v2, %v3079_v6  ;;  %v3473_v23 = vpop.f32.mrf.mxu0 }
0x3d17   :  { %3908 = shalt.err (!%p3905_p6)
}
0x3d18   :  { %2935 = dma.vmem_to_hbm [thread:$0]  %s2930_s22, 384, %s4804_s18, [#allocation18], %s3996_s3, %s3996_s3, %s3997_s28   ;;  %2880 = vst [vmem:[#allocation14] sm:$0xff] %v2850_v48  ;;  %v2861_v25 = vadd.f32 %v3473_v23, %v4752_v14  ;;  %v2748_v13 = vpop.f32.mrf.mxu1  ;;  %2779 = vst [vmem:[#allocation13 + $0x18] sm:$0xff] %v2757_v4  ;;  %v2852_v17 = vpop.f32.mrf.mxu0 }
0x3d19   :  { %v2749_v37 = vadd.f32 %v3079_v6, %v2748_v13  ;;  %v2853_v40 = vadd.f32 %v4752_v14, %v2852_v17  ;;  %s4008_s18 = smov [#allocation13]   ;;  %s4009_s11 = smov [#allocation14]  }
0x3d1a   :  { %2883 = vst [vmem:[#allocation14 + $0x18] sm:$0xff] %v2861_v25  ;;  %s2893_s21 = sshll.u32 %s4008_s18, 4  ;;  %s2905_s23 = sshll.u32 %s4009_s11, 4  ;;  %s2894_s21 = int_to_ptr.vmem [resolvable:$true] %s2893_s21  ;;  %s2906_s23 = int_to_ptr.vmem [resolvable:$true] %s2905_s23 }
0x3d1b   :  { %2777 = vst [vmem:[#allocation13 + $0x8] sm:$0xff] %v2749_v37  ;;  %2881 = vst [vmem:[#allocation14 + $0x8] sm:$0xff] %v2853_v40  ;;  %s4010_s13 = smov [#allocation16]   ;;  %s3917_s5 = scalar_lea.vmem %s2894_s21, 1024 }
0x3d1c   :  { %s2917_s0 = sshll.u32 %s4010_s13, 4  ;;  %p3918_p7 = scmp.ne.s32.totalorder %s2894_s21, %s3917_s5  ;;  %s2918_s0 = int_to_ptr.vmem [resolvable:$true] %s2917_s0 }
0x3d1d   :  { %p3922_p8 = scmp.lt.s32.totalorder %s2894_s21, %s2894_s21  ;;  %p3923_p9 = scmp.lt.s32.totalorder %s3917_s5, %s3917_s5 }
0x3d1f   :  { %p3924_p10 = por %p3923_p9, %p3922_p8 }
0x3d21   :  { %p3925_p11 = pnand %p3924_p10, %p3918_p7 }
0x3d87   :  { %v3466_v54 = vpop.f32.mrf.mxu1 }
0x3d88   :  { %v2770_v1 = vadd.f32 %v3466_v54, %v3079_v6  ;;  %v3476_v22 = vpop.f32.mrf.mxu0 }
0x3d89   :  { %v2874_v12 = vadd.f32 %v3476_v22, %v4752_v14  ;;  %v2761_v27 = vpop.f32.mrf.mxu1 }
0x3d8a   :  { %2782 = vst [vmem:[#allocation13 + $0x30] sm:$0xff] %v2770_v1  ;;  %v2762_v18 = vadd.f32 %v3079_v6, %v2761_v27  ;;  %v2865_v28 = vpop.f32.mrf.mxu0 }
0x3d8b   :  { %2886 = vst [vmem:[#allocation14 + $0x30] sm:$0xff] %v2874_v12  ;;  %v2866_v29 = vadd.f32 %v4752_v14, %v2865_v28  ;;  %v3467_v31 = vpop.f32.mrf.mxu1 }
0x3d8c   :  { %2780 = vst [vmem:[#allocation13 + $0x20] sm:$0xff] %v2762_v18  ;;  %v2773_v33 = vadd.f32 %v3467_v31, %v3079_v6  ;;  %v3477_v35 = vpop.f32.mrf.mxu0 }
0x3d8d   :  { %2884 = vst [vmem:[#allocation14 + $0x20] sm:$0xff] %v2866_v29  ;;  %v2877_v39 = vadd.f32 %v3477_v35, %v4752_v14  ;;  %v2764_v41 = vpop.f32.mrf.mxu1 }
0x3d8e   :  { %2783 = vst [vmem:[#allocation13 + $0x38] sm:$0xff] %v2773_v33  ;;  %v2765_v60 = vadd.f32 %v3079_v6, %v2764_v41  ;;  %v2868_v21 = vpop.f32.mrf.mxu0 }
0x3d8f   :  { %2887 = vst [vmem:[#allocation14 + $0x38] sm:$0xff] %v2877_v39  ;;  %v2869_v42 = vadd.f32 %v4752_v14, %v2868_v21 }
0x3d90   :  { %2781 = vst [vmem:[#allocation13 + $0x28] sm:$0xff] %v2765_v60 }
0x3d91   :  { %2885 = vst [vmem:[#allocation14 + $0x28] sm:$0xff] %v2869_v42 }
0x3d92   :  { %3928 = shalt.err (!%p3925_p11)
}
0x3d93   :  { %2899 = dma.vmem_to_hbm [thread:$0]  %s2894_s21, 1024, %s4801_s15, [#allocation4], %s3996_s3, %s3996_s3, %s3997_s28  }
0x3d94   :  { %s3937_s25 = scalar_lea.vmem %s2906_s23, 1024  ;;  %p3942_p13 = scmp.lt.s32.totalorder %s2906_s23, %s2906_s23 }
0x3d95   :  { %p3938_p12 = scmp.ne.s32.totalorder %s2906_s23, %s3937_s25  ;;  %p3943_p0 = scmp.lt.s32.totalorder %s3937_s25, %s3937_s25 }
0x3d97   :  { %p3944_p1 = por %p3943_p0, %p3942_p13 }
0x3d99   :  { %p3945_p2 = pnand %p3944_p1, %p3938_p12 }
0x3d9b   :  { %3948 = shalt.err (!%p3945_p2)
}
0x3d9c   :  { %2911 = dma.vmem_to_hbm [thread:$0]  %s2906_s23, 1024, %s4802_s16, [#allocation15], %s3996_s3, %s3996_s3, %s3997_s28  }
0x3d9d   :  { %s3957_s2 = scalar_lea.vmem %s2918_s0, 384  ;;  %p3962_p4 = scmp.lt.s32.totalorder %s2918_s0, %s2918_s0 }
0x3d9e   :  { %p3958_p3 = scmp.ne.s32.totalorder %s2918_s0, %s3957_s2  ;;  %p3963_p5 = scmp.lt.s32.totalorder %s3957_s2, %s3957_s2 }
0x3da0   :  { %p3964_p6 = por %p3963_p5, %p3962_p4 }
0x3da2   :  { %p3965_p7 = pnand %p3964_p6, %p3958_p3 }
0x3da4   :  { %3968 = shalt.err (!%p3965_p7)
}
0x3da5   :  { %2923 = dma.vmem_to_hbm [thread:$0]  %s2918_s0, 384, %s4803_s17, [#allocation15], %s3996_s3, %s3996_s3, %s3997_s28  }
0x3da6   :  { %3985 = dma.done.wait [#allocation4], 1024  }
0x3da7   :  { %3986 = vsyncadd [#allocation4], 4294966272 }
0x3da8   :  { %3987 = dma.done.wait [#allocation15], 1408  }
0x3da9   :  { %3988 = vsyncadd [#allocation15], 4294965888 }
0x3daa   :  { %3989 = dma.done.wait [#allocation18], 384  }
0x3dab   :  { %3990 = vsyncadd [#allocation18], 4294966912 }
0x3dac   :  { %2948 = vsyncpa [#allocation3], 1 }
0x3dad   :  { %2949 = vsyncpa [#allocation6], 1 }
0x3dae   :  { %2950 = vsyncpa [#allocation9], 1 }
0x3daf   :  { %2951 = vsyncpa [#allocation12], 1 }
0x3db0   :  { %2952 = vsyncpa [#allocation4], 1 }
0x3db1   :  { %2953 = vsyncpa [#allocation15], 1 }
0x3db2   :  { %2954 = vsyncpa [#allocation18], 1 }

</bundles_post_ra>
